<compile_context>
chip_gen: v5e
topology: v5e:2x2
jax: 0.10.0
libtpu: 0.0.40
codegen_flags: <defaults>
</compile_context>

<pallas_src>
import jax
import jax.numpy as jnp
from jax.experimental import pallas as pl
from jax.experimental.pallas import tpu as pltpu

# ----------------------------- model config ---------------------------------
SRC_VOCAB = 32
TRG_VOCAB = 32
ENC_EMB = 16
DEC_EMB = 16
HID_DIM = 32
N_LAYERS = 2
SRC_LEN = 8
TRG_LEN = 8
BATCH = 2

_VMEM = pl.BlockSpec(memory_space=pltpu.MemorySpace.VMEM)
_SMEM = pl.BlockSpec(memory_space=pltpu.MemorySpace.SMEM)


# ------------------------------ fused kernel ---------------------------------
def _seq2seq_kernel(tf_ref,                                 # SMEM (TRG_LEN,)
                    src_ref, trg_ref,                       # VMEM (B, L) int32
                    enc_ew0_ref, enc_whh0_ref, enc_b0_ref,  # VMEM weights
                    enc_wih1_ref, enc_whh1_ref, enc_b1_ref,
                    dec_ew0_ref, dec_whh0_ref, dec_b0_ref,
                    dec_wih1_ref, dec_whh1_ref, dec_b1_ref,
                    fc_w_ref, fc_b_ref,
                    out_ref):                               # VMEM (B, T*V)
    H = HID_DIM
    f32 = jnp.float32

    # ---- hoist every weight / bias / token array read out of the loops ----
    enc_ew0 = enc_ew0_ref[...]
    enc_whh0 = enc_whh0_ref[...]
    enc_b0 = enc_b0_ref[...]
    enc_wih1 = enc_wih1_ref[...]
    enc_whh1 = enc_whh1_ref[...]
    enc_b1 = enc_b1_ref[...]
    dec_ew0 = dec_ew0_ref[...]
    dec_whh0 = dec_whh0_ref[...]
    dec_b0 = dec_b0_ref[...]
    dec_wih1 = dec_wih1_ref[...]
    dec_whh1 = dec_whh1_ref[...]
    dec_b1 = dec_b1_ref[...]
    fc_w = fc_w_ref[...]
    fc_b = fc_b_ref[...]
    src_tok = src_ref[...]   # (B, SRC_LEN) int32
    trg_tok = trg_ref[...]   # (B, TRG_LEN) int32

    # hoisted column iota (SRC_VOCAB == TRG_VOCAB so one serves both phases)
    cols = jax.lax.broadcasted_iota(jnp.int32, (BATCH, TRG_VOCAB), 1)

    def cell(x_contrib, h, c, whh, b):
        """LSTM cell; x @ W_ih already folded into x_contrib. Gate order (i,f,o,g)."""
        gates = x_contrib + jnp.dot(h, whh, preferred_element_type=f32) + b
        sig = jax.nn.sigmoid(gates[:, :3 * H])
        g_g = jnp.tanh(gates[:, 3 * H:])
        c_new = sig[:, H:2 * H] * c + sig[:, :H] * g_g
        h_new = sig[:, 2 * H:3 * H] * jnp.tanh(c_new)
        return h_new, c_new

    h0 = jnp.zeros((BATCH, H), f32)
    c0 = jnp.zeros((BATCH, H), f32)
    h1 = jnp.zeros((BATCH, H), f32)
    c1 = jnp.zeros((BATCH, H), f32)

    # ----------------- encoder: all timesteps fully unrolled -----------------
    for t in range(SRC_LEN):
        onehot = (cols == src_tok[:, t:t + 1]).astype(f32)
        h0, c0 = cell(jnp.dot(onehot, enc_ew0, preferred_element_type=f32),
                      h0, c0, enc_whh0, enc_b0)
        h1, c1 = cell(jnp.dot(h0, enc_wih1, preferred_element_type=f32),
                      h1, c1, enc_whh1, enc_b1)

    # ------------- decoder with greedy feedback, fully unrolled --------------
    logits_slabs = [jnp.zeros((BATCH, TRG_VOCAB), f32)]   # outputs[0] stays zero
    inp_tok = trg_tok[:, 0:1]
    for t in range(1, TRG_LEN):
        onehot = (cols == inp_tok).astype(f32)
        h0, c0 = cell(jnp.dot(onehot, dec_ew0, preferred_element_type=f32),
                      h0, c0, dec_whh0, dec_b0)
        h1, c1 = cell(jnp.dot(h0, dec_wih1, preferred_element_type=f32),
                      h1, c1, dec_whh1, dec_b1)
        logits = jnp.dot(h1, fc_w, preferred_element_type=f32) + fc_b
        logits_slabs.append(logits)
        # greedy top1 = first maximal index (matches torch.argmax tie-break)
        maxv = jnp.max(logits, axis=1, keepdims=True)
        top1 = jnp.min(jnp.where(logits == maxv, cols, jnp.int32(TRG_VOCAB)),
                       axis=1, keepdims=True)
        # teacher-forcing select closes entirely inside the kernel
        inp_tok = jnp.where(tf_ref[t] != 0, trg_tok[:, t:t + 1], top1)

    # single unmasked lane-dense store of the whole (B, TRG_LEN*V) slab
    out_ref[...] = jnp.concatenate(logits_slabs, axis=1)


# ------------------------------ wrapper ---------------------------------------
def seq2seq_forward(params, src, trg, tf_mask):
    """Mirrors Seq2Seq.forward: outputs[0] stays zero; per-step teacher forcing."""
    src_t = jnp.transpose(src).astype(jnp.int32)   # (B, SRC_LEN)
    trg_t = jnp.transpose(trg).astype(jnp.int32)   # (B, TRG_LEN)
    tf_i32 = tf_mask.astype(jnp.int32)
    out_flat = pl.pallas_call(
        _seq2seq_kernel,
        out_shape=jax.ShapeDtypeStruct((BATCH, TRG_LEN * TRG_VOCAB), jnp.float32),
        in_specs=[_SMEM] + [_VMEM] * 16,
        out_specs=_VMEM,
    )(tf_i32, src_t, trg_t,
      params["enc_ew0"], params["enc_whh0"], params["enc_b0"],
      params["enc_wih1"], params["enc_whh1"], params["enc_b1"],
      params["dec_ew0"], params["dec_whh0"], params["dec_b0"],
      params["dec_wih1"], params["dec_whh1"], params["dec_b1"],
      params["fc_w"], params["fc_b"])
    # (B, T*V) lane-dense slab -> (T, B, V)
    return out_flat.reshape(BATCH, TRG_LEN, TRG_VOCAB).transpose(1, 0, 2)


# ------------------------------ param init ----------------------------------
def _uni(key, shape):
    return jax.random.uniform(key, shape, jnp.float32, -0.08, 0.08)


def _permute_gates(w):
    # torch gate order (i, f, g, o) -> kernel order (i, f, o, g)
    H = HID_DIM
    return jnp.concatenate([w[:, :2 * H], w[:, 3 * H:], w[:, 2 * H:3 * H]], axis=1)


def init_params(key):
    keys = iter(jax.random.split(key, 32))

    def lstm_stack(emb_dim, vocab):
        emb = _uni(next(keys), (vocab, emb_dim))
        w_ih0 = _uni(next(keys), (emb_dim, 4 * HID_DIM))
        w_hh0 = _uni(next(keys), (HID_DIM, 4 * HID_DIM))
        b0 = (_uni(next(keys), (1, 4 * HID_DIM))
              + _uni(next(keys), (1, 4 * HID_DIM)))          # b_ih + b_hh folded
        w_ih1 = _uni(next(keys), (HID_DIM, 4 * HID_DIM))
        w_hh1 = _uni(next(keys), (HID_DIM, 4 * HID_DIM))
        b1 = (_uni(next(keys), (1, 4 * HID_DIM))
              + _uni(next(keys), (1, 4 * HID_DIM)))
        # Fold embedding table into layer-0 input projection (V, 4H):
        # onehot @ (emb @ W_ih0)  ==  embed(tok) @ W_ih0
        ew0 = jnp.dot(emb, w_ih0)
        return (_permute_gates(ew0), _permute_gates(w_hh0), _permute_gates(b0),
                _permute_gates(w_ih1), _permute_gates(w_hh1), _permute_gates(b1))

    e_ew0, e_whh0, e_b0, e_wih1, e_whh1, e_b1 = lstm_stack(ENC_EMB, SRC_VOCAB)
    d_ew0, d_whh0, d_b0, d_wih1, d_whh1, d_b1 = lstm_stack(DEC_EMB, TRG_VOCAB)
    return {
        "enc_ew0": e_ew0, "enc_whh0": e_whh0, "enc_b0": e_b0,
        "enc_wih1": e_wih1, "enc_whh1": e_whh1, "enc_b1": e_b1,
        "dec_ew0": d_ew0, "dec_whh0": d_whh0, "dec_b0": d_b0,
        "dec_wih1": d_wih1, "dec_whh1": d_whh1, "dec_b1": d_b1,
        "fc_w": _uni(next(keys), (HID_DIM, TRG_VOCAB)),
        "fc_b": _uni(next(keys), (1, TRG_VOCAB)),
    }


# --------------------------------- main --------------------------------------
if __name__ == "__main__":
    key = jax.random.PRNGKey(0)
    k_param, k_src, k_trg, k_tf = jax.random.split(key, 4)

    params = init_params(k_param)
    src = jax.random.randint(k_src, (SRC_LEN, BATCH), 0, SRC_VOCAB, jnp.int32)
    trg = jax.random.randint(k_trg, (TRG_LEN, BATCH), 0, TRG_VOCAB, jnp.int32)
    # TODO(synk): PyTorch uses Python random.random() per step; replaced by a
    # deterministic precomputed Bernoulli(0.5) mask (same semantics).
    tf_mask = jax.random.bernoulli(k_tf, 0.5, (TRG_LEN,))

    outputs = seq2seq_forward(params, src, trg, tf_mask)
    jax.block_until_ready(outputs)

    assert outputs.shape == (TRG_LEN, BATCH, TRG_VOCAB)
    assert outputs.dtype == jnp.float32
    assert bool(jnp.all(outputs[0] == 0.0))
    print("KERNEL_OK")
</pallas_src>

<mosaic_0001>
module attributes {stable_mosaic.version = 11 : i64} {
  func.func @_seq2seq_kernel(%arg0: memref<8xi32, #tpu.memory_space<smem>>, %arg1: memref<2x8xi32, #tpu.memory_space<vmem>>, %arg2: memref<2x8xi32, #tpu.memory_space<vmem>>, %arg3: memref<32x128xf32, #tpu.memory_space<vmem>>, %arg4: memref<32x128xf32, #tpu.memory_space<vmem>>, %arg5: memref<1x128xf32, #tpu.memory_space<vmem>>, %arg6: memref<32x128xf32, #tpu.memory_space<vmem>>, %arg7: memref<32x128xf32, #tpu.memory_space<vmem>>, %arg8: memref<1x128xf32, #tpu.memory_space<vmem>>, %arg9: memref<32x128xf32, #tpu.memory_space<vmem>>, %arg10: memref<32x128xf32, #tpu.memory_space<vmem>>, %arg11: memref<1x128xf32, #tpu.memory_space<vmem>>, %arg12: memref<32x128xf32, #tpu.memory_space<vmem>>, %arg13: memref<32x128xf32, #tpu.memory_space<vmem>>, %arg14: memref<1x128xf32, #tpu.memory_space<vmem>>, %arg15: memref<32x32xf32, #tpu.memory_space<vmem>>, %arg16: memref<1x32xf32, #tpu.memory_space<vmem>>, %arg17: memref<2x256xf32, #tpu.memory_space<vmem>>) attributes {dimension_semantics = [], scalar_prefetch = 0 : i64, scratch_operands = 0 : i64, tpu.core_type = #tpu.core_type<tc>} {
    %c0 = arith.constant 0 : index
    %c0_0 = arith.constant 0 : index
    %0 = vector.load %arg3[%c0, %c0_0] : memref<32x128xf32, #tpu.memory_space<vmem>>, vector<32x128xf32>
    %c0_1 = arith.constant 0 : index
    %c0_2 = arith.constant 0 : index
    %1 = vector.load %arg4[%c0_1, %c0_2] : memref<32x128xf32, #tpu.memory_space<vmem>>, vector<32x128xf32>
    %c0_3 = arith.constant 0 : index
    %c0_4 = arith.constant 0 : index
    %2 = vector.load %arg5[%c0_3, %c0_4] : memref<1x128xf32, #tpu.memory_space<vmem>>, vector<1x128xf32>
    %c0_5 = arith.constant 0 : index
    %c0_6 = arith.constant 0 : index
    %3 = vector.load %arg6[%c0_5, %c0_6] : memref<32x128xf32, #tpu.memory_space<vmem>>, vector<32x128xf32>
    %c0_7 = arith.constant 0 : index
    %c0_8 = arith.constant 0 : index
    %4 = vector.load %arg7[%c0_7, %c0_8] : memref<32x128xf32, #tpu.memory_space<vmem>>, vector<32x128xf32>
    %c0_9 = arith.constant 0 : index
    %c0_10 = arith.constant 0 : index
    %5 = vector.load %arg8[%c0_9, %c0_10] : memref<1x128xf32, #tpu.memory_space<vmem>>, vector<1x128xf32>
    %c0_11 = arith.constant 0 : index
    %c0_12 = arith.constant 0 : index
    %6 = vector.load %arg9[%c0_11, %c0_12] : memref<32x128xf32, #tpu.memory_space<vmem>>, vector<32x128xf32>
    %c0_13 = arith.constant 0 : index
    %c0_14 = arith.constant 0 : index
    %7 = vector.load %arg10[%c0_13, %c0_14] : memref<32x128xf32, #tpu.memory_space<vmem>>, vector<32x128xf32>
    %c0_15 = arith.constant 0 : index
    %c0_16 = arith.constant 0 : index
    %8 = vector.load %arg11[%c0_15, %c0_16] : memref<1x128xf32, #tpu.memory_space<vmem>>, vector<1x128xf32>
    %c0_17 = arith.constant 0 : index
    %c0_18 = arith.constant 0 : index
    %9 = vector.load %arg12[%c0_17, %c0_18] : memref<32x128xf32, #tpu.memory_space<vmem>>, vector<32x128xf32>
    %c0_19 = arith.constant 0 : index
    %c0_20 = arith.constant 0 : index
    %10 = vector.load %arg13[%c0_19, %c0_20] : memref<32x128xf32, #tpu.memory_space<vmem>>, vector<32x128xf32>
    %c0_21 = arith.constant 0 : index
    %c0_22 = arith.constant 0 : index
    %11 = vector.load %arg14[%c0_21, %c0_22] : memref<1x128xf32, #tpu.memory_space<vmem>>, vector<1x128xf32>
    %c0_23 = arith.constant 0 : index
    %c0_24 = arith.constant 0 : index
    %12 = vector.load %arg15[%c0_23, %c0_24] : memref<32x32xf32, #tpu.memory_space<vmem>>, vector<32x32xf32>
    %c0_25 = arith.constant 0 : index
    %c0_26 = arith.constant 0 : index
    %13 = vector.load %arg16[%c0_25, %c0_26] : memref<1x32xf32, #tpu.memory_space<vmem>>, vector<1x32xf32>
    %c0_27 = arith.constant 0 : index
    %c0_28 = arith.constant 0 : index
    %14 = vector.load %arg1[%c0_27, %c0_28] : memref<2x8xi32, #tpu.memory_space<vmem>>, vector<2x8xi32>
    %c0_29 = arith.constant 0 : index
    %c0_30 = arith.constant 0 : index
    %15 = vector.load %arg2[%c0_29, %c0_30] : memref<2x8xi32, #tpu.memory_space<vmem>>, vector<2x8xi32>
    %16 = tpu.iota {dimensions = array<i32: 1>} : vector<2x32xi32>
    %cst = arith.constant 0.000000e+00 : f32
    %17 = vector.broadcast %cst : f32 to vector<2x32xf32>
    %cst_31 = arith.constant 0.000000e+00 : f32
    %18 = vector.broadcast %cst_31 : f32 to vector<2x32xf32>
    %cst_32 = arith.constant 0.000000e+00 : f32
    %19 = vector.broadcast %cst_32 : f32 to vector<2x32xf32>
    %cst_33 = arith.constant 0.000000e+00 : f32
    %20 = vector.broadcast %cst_33 : f32 to vector<2x32xf32>
    %21 = vector.extract_strided_slice %14 {offsets = [0, 0], sizes = [2, 1], strides = [1, 1]} : vector<2x8xi32> to vector<2x1xi32>
    %22 = vector.broadcast %21 : vector<2x1xi32> to vector<2x32xi32>
    %23 = arith.cmpi eq, %16, %22 : vector<2x32xi32>
    %24 = arith.extui %23 : vector<2x32xi1> to vector<2x32xi32>
    %25 = arith.sitofp %24 : vector<2x32xi32> to vector<2x32xf32>
    %cst_34 = arith.constant dense<0.000000e+00> : vector<2x128xf32>
    %26 = tpu.matmul %25, %0, %cst_34 {dimension_numbers = #tpu.dot_dimension_numbers<[1], [0], [0], [1], [0, 0, 1, 1], [], []>} : vector<2x32xf32>, vector<32x128xf32>, vector<2x128xf32> -> vector<2x128xf32>
    %cst_35 = arith.constant dense<0.000000e+00> : vector<2x128xf32>
    %27 = tpu.matmul %17, %1, %cst_35 {dimension_numbers = #tpu.dot_dimension_numbers<[1], [0], [0], [1], [0, 0, 1, 1], [], []>} : vector<2x32xf32>, vector<32x128xf32>, vector<2x128xf32> -> vector<2x128xf32>
    %28 = arith.addf %26, %27 : vector<2x128xf32>
    %29 = vector.broadcast %2 : vector<1x128xf32> to vector<2x128xf32>
    %30 = arith.addf %28, %29 : vector<2x128xf32>
    %31 = vector.extract_strided_slice %30 {offsets = [0, 0], sizes = [2, 96], strides = [1, 1]} : vector<2x128xf32> to vector<2x96xf32>
    %32 = arith.negf %31 : vector<2x96xf32>
    %33 = math.exp %32 : vector<2x96xf32>
    %cst_36 = arith.constant 1.000000e+00 : f32
    %34 = vector.broadcast %cst_36 : f32 to vector<2x96xf32>
    %35 = arith.addf %34, %33 : vector<2x96xf32>
    %36 = arith.divf %34, %35 : vector<2x96xf32>
    %37 = vector.extract_strided_slice %30 {offsets = [0, 96], sizes = [2, 32], strides = [1, 1]} : vector<2x128xf32> to vector<2x32xf32>
    %38 = math.tanh %37 : vector<2x32xf32>
    %39 = vector.extract_strided_slice %36 {offsets = [0, 32], sizes = [2, 32], strides = [1, 1]} : vector<2x96xf32> to vector<2x32xf32>
    %40 = arith.mulf %39, %18 : vector<2x32xf32>
    %41 = vector.extract_strided_slice %36 {offsets = [0, 0], sizes = [2, 32], strides = [1, 1]} : vector<2x96xf32> to vector<2x32xf32>
    %42 = arith.mulf %41, %38 : vector<2x32xf32>
    %43 = arith.addf %40, %42 : vector<2x32xf32>
    %44 = vector.extract_strided_slice %36 {offsets = [0, 64], sizes = [2, 32], strides = [1, 1]} : vector<2x96xf32> to vector<2x32xf32>
    %45 = math.tanh %43 : vector<2x32xf32>
    %46 = arith.mulf %44, %45 : vector<2x32xf32>
    %cst_37 = arith.constant dense<0.000000e+00> : vector<2x128xf32>
    %47 = tpu.matmul %46, %3, %cst_37 {dimension_numbers = #tpu.dot_dimension_numbers<[1], [0], [0], [1], [0, 0, 1, 1], [], []>} : vector<2x32xf32>, vector<32x128xf32>, vector<2x128xf32> -> vector<2x128xf32>
    %cst_38 = arith.constant dense<0.000000e+00> : vector<2x128xf32>
    %48 = tpu.matmul %19, %4, %cst_38 {dimension_numbers = #tpu.dot_dimension_numbers<[1], [0], [0], [1], [0, 0, 1, 1], [], []>} : vector<2x32xf32>, vector<32x128xf32>, vector<2x128xf32> -> vector<2x128xf32>
    %49 = arith.addf %47, %48 : vector<2x128xf32>
    %50 = vector.broadcast %5 : vector<1x128xf32> to vector<2x128xf32>
    %51 = arith.addf %49, %50 : vector<2x128xf32>
    %52 = vector.extract_strided_slice %51 {offsets = [0, 0], sizes = [2, 96], strides = [1, 1]} : vector<2x128xf32> to vector<2x96xf32>
    %53 = arith.negf %52 : vector<2x96xf32>
    %54 = math.exp %53 : vector<2x96xf32>
    %cst_39 = arith.constant 1.000000e+00 : f32
    %55 = vector.broadcast %cst_39 : f32 to vector<2x96xf32>
    %56 = arith.addf %55, %54 : vector<2x96xf32>
    %57 = arith.divf %55, %56 : vector<2x96xf32>
    %58 = vector.extract_strided_slice %51 {offsets = [0, 96], sizes = [2, 32], strides = [1, 1]} : vector<2x128xf32> to vector<2x32xf32>
    %59 = math.tanh %58 : vector<2x32xf32>
    %60 = vector.extract_strided_slice %57 {offsets = [0, 32], sizes = [2, 32], strides = [1, 1]} : vector<2x96xf32> to vector<2x32xf32>
    %61 = arith.mulf %60, %20 : vector<2x32xf32>
    %62 = vector.extract_strided_slice %57 {offsets = [0, 0], sizes = [2, 32], strides = [1, 1]} : vector<2x96xf32> to vector<2x32xf32>
    %63 = arith.mulf %62, %59 : vector<2x32xf32>
    %64 = arith.addf %61, %63 : vector<2x32xf32>
    %65 = vector.extract_strided_slice %57 {offsets = [0, 64], sizes = [2, 32], strides = [1, 1]} : vector<2x96xf32> to vector<2x32xf32>
    %66 = math.tanh %64 : vector<2x32xf32>
    %67 = arith.mulf %65, %66 : vector<2x32xf32>
    %68 = vector.extract_strided_slice %14 {offsets = [0, 1], sizes = [2, 1], strides = [1, 1]} : vector<2x8xi32> to vector<2x1xi32>
    %69 = vector.broadcast %68 : vector<2x1xi32> to vector<2x32xi32>
    %70 = arith.cmpi eq, %16, %69 : vector<2x32xi32>
    %71 = arith.extui %70 : vector<2x32xi1> to vector<2x32xi32>
    %72 = arith.sitofp %71 : vector<2x32xi32> to vector<2x32xf32>
    %cst_40 = arith.constant dense<0.000000e+00> : vector<2x128xf32>
    %73 = tpu.matmul %72, %0, %cst_40 {dimension_numbers = #tpu.dot_dimension_numbers<[1], [0], [0], [1], [0, 0, 1, 1], [], []>} : vector<2x32xf32>, vector<32x128xf32>, vector<2x128xf32> -> vector<2x128xf32>
    %cst_41 = arith.constant dense<0.000000e+00> : vector<2x128xf32>
    %74 = tpu.matmul %46, %1, %cst_41 {dimension_numbers = #tpu.dot_dimension_numbers<[1], [0], [0], [1], [0, 0, 1, 1], [], []>} : vector<2x32xf32>, vector<32x128xf32>, vector<2x128xf32> -> vector<2x128xf32>
    %75 = arith.addf %73, %74 : vector<2x128xf32>
    %76 = vector.broadcast %2 : vector<1x128xf32> to vector<2x128xf32>
    %77 = arith.addf %75, %76 : vector<2x128xf32>
    %78 = vector.extract_strided_slice %77 {offsets = [0, 0], sizes = [2, 96], strides = [1, 1]} : vector<2x128xf32> to vector<2x96xf32>
    %79 = arith.negf %78 : vector<2x96xf32>
    %80 = math.exp %79 : vector<2x96xf32>
    %cst_42 = arith.constant 1.000000e+00 : f32
    %81 = vector.broadcast %cst_42 : f32 to vector<2x96xf32>
    %82 = arith.addf %81, %80 : vector<2x96xf32>
    %83 = arith.divf %81, %82 : vector<2x96xf32>
    %84 = vector.extract_strided_slice %77 {offsets = [0, 96], sizes = [2, 32], strides = [1, 1]} : vector<2x128xf32> to vector<2x32xf32>
    %85 = math.tanh %84 : vector<2x32xf32>
    %86 = vector.extract_strided_slice %83 {offsets = [0, 32], sizes = [2, 32], strides = [1, 1]} : vector<2x96xf32> to vector<2x32xf32>
    %87 = arith.mulf %86, %43 : vector<2x32xf32>
    %88 = vector.extract_strided_slice %83 {offsets = [0, 0], sizes = [2, 32], strides = [1, 1]} : vector<2x96xf32> to vector<2x32xf32>
    %89 = arith.mulf %88, %85 : vector<2x32xf32>
    %90 = arith.addf %87, %89 : vector<2x32xf32>
    %91 = vector.extract_strided_slice %83 {offsets = [0, 64], sizes = [2, 32], strides = [1, 1]} : vector<2x96xf32> to vector<2x32xf32>
    %92 = math.tanh %90 : vector<2x32xf32>
    %93 = arith.mulf %91, %92 : vector<2x32xf32>
    %cst_43 = arith.constant dense<0.000000e+00> : vector<2x128xf32>
    %94 = tpu.matmul %93, %3, %cst_43 {dimension_numbers = #tpu.dot_dimension_numbers<[1], [0], [0], [1], [0, 0, 1, 1], [], []>} : vector<2x32xf32>, vector<32x128xf32>, vector<2x128xf32> -> vector<2x128xf32>
    %cst_44 = arith.constant dense<0.000000e+00> : vector<2x128xf32>
    %95 = tpu.matmul %67, %4, %cst_44 {dimension_numbers = #tpu.dot_dimension_numbers<[1], [0], [0], [1], [0, 0, 1, 1], [], []>} : vector<2x32xf32>, vector<32x128xf32>, vector<2x128xf32> -> vector<2x128xf32>
    %96 = arith.addf %94, %95 : vector<2x128xf32>
    %97 = vector.broadcast %5 : vector<1x128xf32> to vector<2x128xf32>
    %98 = arith.addf %96, %97 : vector<2x128xf32>
    %99 = vector.extract_strided_slice %98 {offsets = [0, 0], sizes = [2, 96], strides = [1, 1]} : vector<2x128xf32> to vector<2x96xf32>
    %100 = arith.negf %99 : vector<2x96xf32>
    %101 = math.exp %100 : vector<2x96xf32>
    %cst_45 = arith.constant 1.000000e+00 : f32
    %102 = vector.broadcast %cst_45 : f32 to vector<2x96xf32>
    %103 = arith.addf %102, %101 : vector<2x96xf32>
    %104 = arith.divf %102, %103 : vector<2x96xf32>
    %105 = vector.extract_strided_slice %98 {offsets = [0, 96], sizes = [2, 32], strides = [1, 1]} : vector<2x128xf32> to vector<2x32xf32>
    %106 = math.tanh %105 : vector<2x32xf32>
    %107 = vector.extract_strided_slice %104 {offsets = [0, 32], sizes = [2, 32], strides = [1, 1]} : vector<2x96xf32> to vector<2x32xf32>
    %108 = arith.mulf %107, %64 : vector<2x32xf32>
    %109 = vector.extract_strided_slice %104 {offsets = [0, 0], sizes = [2, 32], strides = [1, 1]} : vector<2x96xf32> to vector<2x32xf32>
    %110 = arith.mulf %109, %106 : vector<2x32xf32>
    %111 = arith.addf %108, %110 : vector<2x32xf32>
    %112 = vector.extract_strided_slice %104 {offsets = [0, 64], sizes = [2, 32], strides = [1, 1]} : vector<2x96xf32> to vector<2x32xf32>
    %113 = math.tanh %111 : vector<2x32xf32>
    %114 = arith.mulf %112, %113 : vector<2x32xf32>
    %115 = vector.extract_strided_slice %14 {offsets = [0, 2], sizes = [2, 1], strides = [1, 1]} : vector<2x8xi32> to vector<2x1xi32>
    %116 = vector.broadcast %115 : vector<2x1xi32> to vector<2x32xi32>
    %117 = arith.cmpi eq, %16, %116 : vector<2x32xi32>
    %118 = arith.extui %117 : vector<2x32xi1> to vector<2x32xi32>
    %119 = arith.sitofp %118 : vector<2x32xi32> to vector<2x32xf32>
    %cst_46 = arith.constant dense<0.000000e+00> : vector<2x128xf32>
    %120 = tpu.matmul %119, %0, %cst_46 {dimension_numbers = #tpu.dot_dimension_numbers<[1], [0], [0], [1], [0, 0, 1, 1], [], []>} : vector<2x32xf32>, vector<32x128xf32>, vector<2x128xf32> -> vector<2x128xf32>
    %cst_47 = arith.constant dense<0.000000e+00> : vector<2x128xf32>
    %121 = tpu.matmul %93, %1, %cst_47 {dimension_numbers = #tpu.dot_dimension_numbers<[1], [0], [0], [1], [0, 0, 1, 1], [], []>} : vector<2x32xf32>, vector<32x128xf32>, vector<2x128xf32> -> vector<2x128xf32>
    %122 = arith.addf %120, %121 : vector<2x128xf32>
    %123 = vector.broadcast %2 : vector<1x128xf32> to vector<2x128xf32>
    %124 = arith.addf %122, %123 : vector<2x128xf32>
    %125 = vector.extract_strided_slice %124 {offsets = [0, 0], sizes = [2, 96], strides = [1, 1]} : vector<2x128xf32> to vector<2x96xf32>
    %126 = arith.negf %125 : vector<2x96xf32>
    %127 = math.exp %126 : vector<2x96xf32>
    %cst_48 = arith.constant 1.000000e+00 : f32
    %128 = vector.broadcast %cst_48 : f32 to vector<2x96xf32>
    %129 = arith.addf %128, %127 : vector<2x96xf32>
    %130 = arith.divf %128, %129 : vector<2x96xf32>
    %131 = vector.extract_strided_slice %124 {offsets = [0, 96], sizes = [2, 32], strides = [1, 1]} : vector<2x128xf32> to vector<2x32xf32>
    %132 = math.tanh %131 : vector<2x32xf32>
    %133 = vector.extract_strided_slice %130 {offsets = [0, 32], sizes = [2, 32], strides = [1, 1]} : vector<2x96xf32> to vector<2x32xf32>
    %134 = arith.mulf %133, %90 : vector<2x32xf32>
    %135 = vector.extract_strided_slice %130 {offsets = [0, 0], sizes = [2, 32], strides = [1, 1]} : vector<2x96xf32> to vector<2x32xf32>
    %136 = arith.mulf %135, %132 : vector<2x32xf32>
    %137 = arith.addf %134, %136 : vector<2x32xf32>
    %138 = vector.extract_strided_slice %130 {offsets = [0, 64], sizes = [2, 32], strides = [1, 1]} : vector<2x96xf32> to vector<2x32xf32>
    %139 = math.tanh %137 : vector<2x32xf32>
    %140 = arith.mulf %138, %139 : vector<2x32xf32>
    %cst_49 = arith.constant dense<0.000000e+00> : vector<2x128xf32>
    %141 = tpu.matmul %140, %3, %cst_49 {dimension_numbers = #tpu.dot_dimension_numbers<[1], [0], [0], [1], [0, 0, 1, 1], [], []>} : vector<2x32xf32>, vector<32x128xf32>, vector<2x128xf32> -> vector<2x128xf32>
    %cst_50 = arith.constant dense<0.000000e+00> : vector<2x128xf32>
    %142 = tpu.matmul %114, %4, %cst_50 {dimension_numbers = #tpu.dot_dimension_numbers<[1], [0], [0], [1], [0, 0, 1, 1], [], []>} : vector<2x32xf32>, vector<32x128xf32>, vector<2x128xf32> -> vector<2x128xf32>
    %143 = arith.addf %141, %142 : vector<2x128xf32>
    %144 = vector.broadcast %5 : vector<1x128xf32> to vector<2x128xf32>
    %145 = arith.addf %143, %144 : vector<2x128xf32>
    %146 = vector.extract_strided_slice %145 {offsets = [0, 0], sizes = [2, 96], strides = [1, 1]} : vector<2x128xf32> to vector<2x96xf32>
    %147 = arith.negf %146 : vector<2x96xf32>
    %148 = math.exp %147 : vector<2x96xf32>
    %cst_51 = arith.constant 1.000000e+00 : f32
    %149 = vector.broadcast %cst_51 : f32 to vector<2x96xf32>
    %150 = arith.addf %149, %148 : vector<2x96xf32>
    %151 = arith.divf %149, %150 : vector<2x96xf32>
    %152 = vector.extract_strided_slice %145 {offsets = [0, 96], sizes = [2, 32], strides = [1, 1]} : vector<2x128xf32> to vector<2x32xf32>
    %153 = math.tanh %152 : vector<2x32xf32>
    %154 = vector.extract_strided_slice %151 {offsets = [0, 32], sizes = [2, 32], strides = [1, 1]} : vector<2x96xf32> to vector<2x32xf32>
    %155 = arith.mulf %154, %111 : vector<2x32xf32>
    %156 = vector.extract_strided_slice %151 {offsets = [0, 0], sizes = [2, 32], strides = [1, 1]} : vector<2x96xf32> to vector<2x32xf32>
    %157 = arith.mulf %156, %153 : vector<2x32xf32>
    %158 = arith.addf %155, %157 : vector<2x32xf32>
    %159 = vector.extract_strided_slice %151 {offsets = [0, 64], sizes = [2, 32], strides = [1, 1]} : vector<2x96xf32> to vector<2x32xf32>
    %160 = math.tanh %158 : vector<2x32xf32>
    %161 = arith.mulf %159, %160 : vector<2x32xf32>
    %162 = vector.extract_strided_slice %14 {offsets = [0, 3], sizes = [2, 1], strides = [1, 1]} : vector<2x8xi32> to vector<2x1xi32>
    %163 = vector.broadcast %162 : vector<2x1xi32> to vector<2x32xi32>
    %164 = arith.cmpi eq, %16, %163 : vector<2x32xi32>
    %165 = arith.extui %164 : vector<2x32xi1> to vector<2x32xi32>
    %166 = arith.sitofp %165 : vector<2x32xi32> to vector<2x32xf32>
    %cst_52 = arith.constant dense<0.000000e+00> : vector<2x128xf32>
    %167 = tpu.matmul %166, %0, %cst_52 {dimension_numbers = #tpu.dot_dimension_numbers<[1], [0], [0], [1], [0, 0, 1, 1], [], []>} : vector<2x32xf32>, vector<32x128xf32>, vector<2x128xf32> -> vector<2x128xf32>
    %cst_53 = arith.constant dense<0.000000e+00> : vector<2x128xf32>
    %168 = tpu.matmul %140, %1, %cst_53 {dimension_numbers = #tpu.dot_dimension_numbers<[1], [0], [0], [1], [0, 0, 1, 1], [], []>} : vector<2x32xf32>, vector<32x128xf32>, vector<2x128xf32> -> vector<2x128xf32>
    %169 = arith.addf %167, %168 : vector<2x128xf32>
    %170 = vector.broadcast %2 : vector<1x128xf32> to vector<2x128xf32>
    %171 = arith.addf %169, %170 : vector<2x128xf32>
    %172 = vector.extract_strided_slice %171 {offsets = [0, 0], sizes = [2, 96], strides = [1, 1]} : vector<2x128xf32> to vector<2x96xf32>
    %173 = arith.negf %172 : vector<2x96xf32>
    %174 = math.exp %173 : vector<2x96xf32>
    %cst_54 = arith.constant 1.000000e+00 : f32
    %175 = vector.broadcast %cst_54 : f32 to vector<2x96xf32>
    %176 = arith.addf %175, %174 : vector<2x96xf32>
    %177 = arith.divf %175, %176 : vector<2x96xf32>
    %178 = vector.extract_strided_slice %171 {offsets = [0, 96], sizes = [2, 32], strides = [1, 1]} : vector<2x128xf32> to vector<2x32xf32>
    %179 = math.tanh %178 : vector<2x32xf32>
    %180 = vector.extract_strided_slice %177 {offsets = [0, 32], sizes = [2, 32], strides = [1, 1]} : vector<2x96xf32> to vector<2x32xf32>
    %181 = arith.mulf %180, %137 : vector<2x32xf32>
    %182 = vector.extract_strided_slice %177 {offsets = [0, 0], sizes = [2, 32], strides = [1, 1]} : vector<2x96xf32> to vector<2x32xf32>
    %183 = arith.mulf %182, %179 : vector<2x32xf32>
    %184 = arith.addf %181, %183 : vector<2x32xf32>
    %185 = vector.extract_strided_slice %177 {offsets = [0, 64], sizes = [2, 32], strides = [1, 1]} : vector<2x96xf32> to vector<2x32xf32>
    %186 = math.tanh %184 : vector<2x32xf32>
    %187 = arith.mulf %185, %186 : vector<2x32xf32>
    %cst_55 = arith.constant dense<0.000000e+00> : vector<2x128xf32>
    %188 = tpu.matmul %187, %3, %cst_55 {dimension_numbers = #tpu.dot_dimension_numbers<[1], [0], [0], [1], [0, 0, 1, 1], [], []>} : vector<2x32xf32>, vector<32x128xf32>, vector<2x128xf32> -> vector<2x128xf32>
    %cst_56 = arith.constant dense<0.000000e+00> : vector<2x128xf32>
    %189 = tpu.matmul %161, %4, %cst_56 {dimension_numbers = #tpu.dot_dimension_numbers<[1], [0], [0], [1], [0, 0, 1, 1], [], []>} : vector<2x32xf32>, vector<32x128xf32>, vector<2x128xf32> -> vector<2x128xf32>
    %190 = arith.addf %188, %189 : vector<2x128xf32>
    %191 = vector.broadcast %5 : vector<1x128xf32> to vector<2x128xf32>
    %192 = arith.addf %190, %191 : vector<2x128xf32>
    %193 = vector.extract_strided_slice %192 {offsets = [0, 0], sizes = [2, 96], strides = [1, 1]} : vector<2x128xf32> to vector<2x96xf32>
    %194 = arith.negf %193 : vector<2x96xf32>
    %195 = math.exp %194 : vector<2x96xf32>
    %cst_57 = arith.constant 1.000000e+00 : f32
    %196 = vector.broadcast %cst_57 : f32 to vector<2x96xf32>
    %197 = arith.addf %196, %195 : vector<2x96xf32>
    %198 = arith.divf %196, %197 : vector<2x96xf32>
    %199 = vector.extract_strided_slice %192 {offsets = [0, 96], sizes = [2, 32], strides = [1, 1]} : vector<2x128xf32> to vector<2x32xf32>
    %200 = math.tanh %199 : vector<2x32xf32>
    %201 = vector.extract_strided_slice %198 {offsets = [0, 32], sizes = [2, 32], strides = [1, 1]} : vector<2x96xf32> to vector<2x32xf32>
    %202 = arith.mulf %201, %158 : vector<2x32xf32>
    %203 = vector.extract_strided_slice %198 {offsets = [0, 0], sizes = [2, 32], strides = [1, 1]} : vector<2x96xf32> to vector<2x32xf32>
    %204 = arith.mulf %203, %200 : vector<2x32xf32>
    %205 = arith.addf %202, %204 : vector<2x32xf32>
    %206 = vector.extract_strided_slice %198 {offsets = [0, 64], sizes = [2, 32], strides = [1, 1]} : vector<2x96xf32> to vector<2x32xf32>
    %207 = math.tanh %205 : vector<2x32xf32>
    %208 = arith.mulf %206, %207 : vector<2x32xf32>
    %209 = vector.extract_strided_slice %14 {offsets = [0, 4], sizes = [2, 1], strides = [1, 1]} : vector<2x8xi32> to vector<2x1xi32>
    %210 = vector.broadcast %209 : vector<2x1xi32> to vector<2x32xi32>
    %211 = arith.cmpi eq, %16, %210 : vector<2x32xi32>
    %212 = arith.extui %211 : vector<2x32xi1> to vector<2x32xi32>
    %213 = arith.sitofp %212 : vector<2x32xi32> to vector<2x32xf32>
    %cst_58 = arith.constant dense<0.000000e+00> : vector<2x128xf32>
    %214 = tpu.matmul %213, %0, %cst_58 {dimension_numbers = #tpu.dot_dimension_numbers<[1], [0], [0], [1], [0, 0, 1, 1], [], []>} : vector<2x32xf32>, vector<32x128xf32>, vector<2x128xf32> -> vector<2x128xf32>
    %cst_59 = arith.constant dense<0.000000e+00> : vector<2x128xf32>
    %215 = tpu.matmul %187, %1, %cst_59 {dimension_numbers = #tpu.dot_dimension_numbers<[1], [0], [0], [1], [0, 0, 1, 1], [], []>} : vector<2x32xf32>, vector<32x128xf32>, vector<2x128xf32> -> vector<2x128xf32>
    %216 = arith.addf %214, %215 : vector<2x128xf32>
    %217 = vector.broadcast %2 : vector<1x128xf32> to vector<2x128xf32>
    %218 = arith.addf %216, %217 : vector<2x128xf32>
    %219 = vector.extract_strided_slice %218 {offsets = [0, 0], sizes = [2, 96], strides = [1, 1]} : vector<2x128xf32> to vector<2x96xf32>
    %220 = arith.negf %219 : vector<2x96xf32>
    %221 = math.exp %220 : vector<2x96xf32>
    %cst_60 = arith.constant 1.000000e+00 : f32
    %222 = vector.broadcast %cst_60 : f32 to vector<2x96xf32>
    %223 = arith.addf %222, %221 : vector<2x96xf32>
    %224 = arith.divf %222, %223 : vector<2x96xf32>
    %225 = vector.extract_strided_slice %218 {offsets = [0, 96], sizes = [2, 32], strides = [1, 1]} : vector<2x128xf32> to vector<2x32xf32>
    %226 = math.tanh %225 : vector<2x32xf32>
    %227 = vector.extract_strided_slice %224 {offsets = [0, 32], sizes = [2, 32], strides = [1, 1]} : vector<2x96xf32> to vector<2x32xf32>
    %228 = arith.mulf %227, %184 : vector<2x32xf32>
    %229 = vector.extract_strided_slice %224 {offsets = [0, 0], sizes = [2, 32], strides = [1, 1]} : vector<2x96xf32> to vector<2x32xf32>
    %230 = arith.mulf %229, %226 : vector<2x32xf32>
    %231 = arith.addf %228, %230 : vector<2x32xf32>
    %232 = vector.extract_strided_slice %224 {offsets = [0, 64], sizes = [2, 32], strides = [1, 1]} : vector<2x96xf32> to vector<2x32xf32>
    %233 = math.tanh %231 : vector<2x32xf32>
    %234 = arith.mulf %232, %233 : vector<2x32xf32>
    %cst_61 = arith.constant dense<0.000000e+00> : vector<2x128xf32>
    %235 = tpu.matmul %234, %3, %cst_61 {dimension_numbers = #tpu.dot_dimension_numbers<[1], [0], [0], [1], [0, 0, 1, 1], [], []>} : vector<2x32xf32>, vector<32x128xf32>, vector<2x128xf32> -> vector<2x128xf32>
    %cst_62 = arith.constant dense<0.000000e+00> : vector<2x128xf32>
    %236 = tpu.matmul %208, %4, %cst_62 {dimension_numbers = #tpu.dot_dimension_numbers<[1], [0], [0], [1], [0, 0, 1, 1], [], []>} : vector<2x32xf32>, vector<32x128xf32>, vector<2x128xf32> -> vector<2x128xf32>
    %237 = arith.addf %235, %236 : vector<2x128xf32>
    %238 = vector.broadcast %5 : vector<1x128xf32> to vector<2x128xf32>
    %239 = arith.addf %237, %238 : vector<2x128xf32>
    %240 = vector.extract_strided_slice %239 {offsets = [0, 0], sizes = [2, 96], strides = [1, 1]} : vector<2x128xf32> to vector<2x96xf32>
    %241 = arith.negf %240 : vector<2x96xf32>
    %242 = math.exp %241 : vector<2x96xf32>
    %cst_63 = arith.constant 1.000000e+00 : f32
    %243 = vector.broadcast %cst_63 : f32 to vector<2x96xf32>
    %244 = arith.addf %243, %242 : vector<2x96xf32>
    %245 = arith.divf %243, %244 : vector<2x96xf32>
    %246 = vector.extract_strided_slice %239 {offsets = [0, 96], sizes = [2, 32], strides = [1, 1]} : vector<2x128xf32> to vector<2x32xf32>
    %247 = math.tanh %246 : vector<2x32xf32>
    %248 = vector.extract_strided_slice %245 {offsets = [0, 32], sizes = [2, 32], strides = [1, 1]} : vector<2x96xf32> to vector<2x32xf32>
    %249 = arith.mulf %248, %205 : vector<2x32xf32>
    %250 = vector.extract_strided_slice %245 {offsets = [0, 0], sizes = [2, 32], strides = [1, 1]} : vector<2x96xf32> to vector<2x32xf32>
    %251 = arith.mulf %250, %247 : vector<2x32xf32>
    %252 = arith.addf %249, %251 : vector<2x32xf32>
    %253 = vector.extract_strided_slice %245 {offsets = [0, 64], sizes = [2, 32], strides = [1, 1]} : vector<2x96xf32> to vector<2x32xf32>
    %254 = math.tanh %252 : vector<2x32xf32>
    %255 = arith.mulf %253, %254 : vector<2x32xf32>
    %256 = vector.extract_strided_slice %14 {offsets = [0, 5], sizes = [2, 1], strides = [1, 1]} : vector<2x8xi32> to vector<2x1xi32>
    %257 = vector.broadcast %256 : vector<2x1xi32> to vector<2x32xi32>
    %258 = arith.cmpi eq, %16, %257 : vector<2x32xi32>
    %259 = arith.extui %258 : vector<2x32xi1> to vector<2x32xi32>
    %260 = arith.sitofp %259 : vector<2x32xi32> to vector<2x32xf32>
    %cst_64 = arith.constant dense<0.000000e+00> : vector<2x128xf32>
    %261 = tpu.matmul %260, %0, %cst_64 {dimension_numbers = #tpu.dot_dimension_numbers<[1], [0], [0], [1], [0, 0, 1, 1], [], []>} : vector<2x32xf32>, vector<32x128xf32>, vector<2x128xf32> -> vector<2x128xf32>
    %cst_65 = arith.constant dense<0.000000e+00> : vector<2x128xf32>
    %262 = tpu.matmul %234, %1, %cst_65 {dimension_numbers = #tpu.dot_dimension_numbers<[1], [0], [0], [1], [0, 0, 1, 1], [], []>} : vector<2x32xf32>, vector<32x128xf32>, vector<2x128xf32> -> vector<2x128xf32>
    %263 = arith.addf %261, %262 : vector<2x128xf32>
    %264 = vector.broadcast %2 : vector<1x128xf32> to vector<2x128xf32>
    %265 = arith.addf %263, %264 : vector<2x128xf32>
    %266 = vector.extract_strided_slice %265 {offsets = [0, 0], sizes = [2, 96], strides = [1, 1]} : vector<2x128xf32> to vector<2x96xf32>
    %267 = arith.negf %266 : vector<2x96xf32>
    %268 = math.exp %267 : vector<2x96xf32>
    %cst_66 = arith.constant 1.000000e+00 : f32
    %269 = vector.broadcast %cst_66 : f32 to vector<2x96xf32>
    %270 = arith.addf %269, %268 : vector<2x96xf32>
    %271 = arith.divf %269, %270 : vector<2x96xf32>
    %272 = vector.extract_strided_slice %265 {offsets = [0, 96], sizes = [2, 32], strides = [1, 1]} : vector<2x128xf32> to vector<2x32xf32>
    %273 = math.tanh %272 : vector<2x32xf32>
    %274 = vector.extract_strided_slice %271 {offsets = [0, 32], sizes = [2, 32], strides = [1, 1]} : vector<2x96xf32> to vector<2x32xf32>
    %275 = arith.mulf %274, %231 : vector<2x32xf32>
    %276 = vector.extract_strided_slice %271 {offsets = [0, 0], sizes = [2, 32], strides = [1, 1]} : vector<2x96xf32> to vector<2x32xf32>
    %277 = arith.mulf %276, %273 : vector<2x32xf32>
    %278 = arith.addf %275, %277 : vector<2x32xf32>
    %279 = vector.extract_strided_slice %271 {offsets = [0, 64], sizes = [2, 32], strides = [1, 1]} : vector<2x96xf32> to vector<2x32xf32>
    %280 = math.tanh %278 : vector<2x32xf32>
    %281 = arith.mulf %279, %280 : vector<2x32xf32>
    %cst_67 = arith.constant dense<0.000000e+00> : vector<2x128xf32>
    %282 = tpu.matmul %281, %3, %cst_67 {dimension_numbers = #tpu.dot_dimension_numbers<[1], [0], [0], [1], [0, 0, 1, 1], [], []>} : vector<2x32xf32>, vector<32x128xf32>, vector<2x128xf32> -> vector<2x128xf32>
    %cst_68 = arith.constant dense<0.000000e+00> : vector<2x128xf32>
    %283 = tpu.matmul %255, %4, %cst_68 {dimension_numbers = #tpu.dot_dimension_numbers<[1], [0], [0], [1], [0, 0, 1, 1], [], []>} : vector<2x32xf32>, vector<32x128xf32>, vector<2x128xf32> -> vector<2x128xf32>
    %284 = arith.addf %282, %283 : vector<2x128xf32>
    %285 = vector.broadcast %5 : vector<1x128xf32> to vector<2x128xf32>
    %286 = arith.addf %284, %285 : vector<2x128xf32>
    %287 = vector.extract_strided_slice %286 {offsets = [0, 0], sizes = [2, 96], strides = [1, 1]} : vector<2x128xf32> to vector<2x96xf32>
    %288 = arith.negf %287 : vector<2x96xf32>
    %289 = math.exp %288 : vector<2x96xf32>
    %cst_69 = arith.constant 1.000000e+00 : f32
    %290 = vector.broadcast %cst_69 : f32 to vector<2x96xf32>
    %291 = arith.addf %290, %289 : vector<2x96xf32>
    %292 = arith.divf %290, %291 : vector<2x96xf32>
    %293 = vector.extract_strided_slice %286 {offsets = [0, 96], sizes = [2, 32], strides = [1, 1]} : vector<2x128xf32> to vector<2x32xf32>
    %294 = math.tanh %293 : vector<2x32xf32>
    %295 = vector.extract_strided_slice %292 {offsets = [0, 32], sizes = [2, 32], strides = [1, 1]} : vector<2x96xf32> to vector<2x32xf32>
    %296 = arith.mulf %295, %252 : vector<2x32xf32>
    %297 = vector.extract_strided_slice %292 {offsets = [0, 0], sizes = [2, 32], strides = [1, 1]} : vector<2x96xf32> to vector<2x32xf32>
    %298 = arith.mulf %297, %294 : vector<2x32xf32>
    %299 = arith.addf %296, %298 : vector<2x32xf32>
    %300 = vector.extract_strided_slice %292 {offsets = [0, 64], sizes = [2, 32], strides = [1, 1]} : vector<2x96xf32> to vector<2x32xf32>
    %301 = math.tanh %299 : vector<2x32xf32>
    %302 = arith.mulf %300, %301 : vector<2x32xf32>
    %303 = vector.extract_strided_slice %14 {offsets = [0, 6], sizes = [2, 1], strides = [1, 1]} : vector<2x8xi32> to vector<2x1xi32>
    %304 = vector.broadcast %303 : vector<2x1xi32> to vector<2x32xi32>
    %305 = arith.cmpi eq, %16, %304 : vector<2x32xi32>
    %306 = arith.extui %305 : vector<2x32xi1> to vector<2x32xi32>
    %307 = arith.sitofp %306 : vector<2x32xi32> to vector<2x32xf32>
    %cst_70 = arith.constant dense<0.000000e+00> : vector<2x128xf32>
    %308 = tpu.matmul %307, %0, %cst_70 {dimension_numbers = #tpu.dot_dimension_numbers<[1], [0], [0], [1], [0, 0, 1, 1], [], []>} : vector<2x32xf32>, vector<32x128xf32>, vector<2x128xf32> -> vector<2x128xf32>
    %cst_71 = arith.constant dense<0.000000e+00> : vector<2x128xf32>
    %309 = tpu.matmul %281, %1, %cst_71 {dimension_numbers = #tpu.dot_dimension_numbers<[1], [0], [0], [1], [0, 0, 1, 1], [], []>} : vector<2x32xf32>, vector<32x128xf32>, vector<2x128xf32> -> vector<2x128xf32>
    %310 = arith.addf %308, %309 : vector<2x128xf32>
    %311 = vector.broadcast %2 : vector<1x128xf32> to vector<2x128xf32>
    %312 = arith.addf %310, %311 : vector<2x128xf32>
    %313 = vector.extract_strided_slice %312 {offsets = [0, 0], sizes = [2, 96], strides = [1, 1]} : vector<2x128xf32> to vector<2x96xf32>
    %314 = arith.negf %313 : vector<2x96xf32>
    %315 = math.exp %314 : vector<2x96xf32>
    %cst_72 = arith.constant 1.000000e+00 : f32
    %316 = vector.broadcast %cst_72 : f32 to vector<2x96xf32>
    %317 = arith.addf %316, %315 : vector<2x96xf32>
    %318 = arith.divf %316, %317 : vector<2x96xf32>
    %319 = vector.extract_strided_slice %312 {offsets = [0, 96], sizes = [2, 32], strides = [1, 1]} : vector<2x128xf32> to vector<2x32xf32>
    %320 = math.tanh %319 : vector<2x32xf32>
    %321 = vector.extract_strided_slice %318 {offsets = [0, 32], sizes = [2, 32], strides = [1, 1]} : vector<2x96xf32> to vector<2x32xf32>
    %322 = arith.mulf %321, %278 : vector<2x32xf32>
    %323 = vector.extract_strided_slice %318 {offsets = [0, 0], sizes = [2, 32], strides = [1, 1]} : vector<2x96xf32> to vector<2x32xf32>
    %324 = arith.mulf %323, %320 : vector<2x32xf32>
    %325 = arith.addf %322, %324 : vector<2x32xf32>
    %326 = vector.extract_strided_slice %318 {offsets = [0, 64], sizes = [2, 32], strides = [1, 1]} : vector<2x96xf32> to vector<2x32xf32>
    %327 = math.tanh %325 : vector<2x32xf32>
    %328 = arith.mulf %326, %327 : vector<2x32xf32>
    %cst_73 = arith.constant dense<0.000000e+00> : vector<2x128xf32>
    %329 = tpu.matmul %328, %3, %cst_73 {dimension_numbers = #tpu.dot_dimension_numbers<[1], [0], [0], [1], [0, 0, 1, 1], [], []>} : vector<2x32xf32>, vector<32x128xf32>, vector<2x128xf32> -> vector<2x128xf32>
    %cst_74 = arith.constant dense<0.000000e+00> : vector<2x128xf32>
    %330 = tpu.matmul %302, %4, %cst_74 {dimension_numbers = #tpu.dot_dimension_numbers<[1], [0], [0], [1], [0, 0, 1, 1], [], []>} : vector<2x32xf32>, vector<32x128xf32>, vector<2x128xf32> -> vector<2x128xf32>
    %331 = arith.addf %329, %330 : vector<2x128xf32>
    %332 = vector.broadcast %5 : vector<1x128xf32> to vector<2x128xf32>
    %333 = arith.addf %331, %332 : vector<2x128xf32>
    %334 = vector.extract_strided_slice %333 {offsets = [0, 0], sizes = [2, 96], strides = [1, 1]} : vector<2x128xf32> to vector<2x96xf32>
    %335 = arith.negf %334 : vector<2x96xf32>
    %336 = math.exp %335 : vector<2x96xf32>
    %cst_75 = arith.constant 1.000000e+00 : f32
    %337 = vector.broadcast %cst_75 : f32 to vector<2x96xf32>
    %338 = arith.addf %337, %336 : vector<2x96xf32>
    %339 = arith.divf %337, %338 : vector<2x96xf32>
    %340 = vector.extract_strided_slice %333 {offsets = [0, 96], sizes = [2, 32], strides = [1, 1]} : vector<2x128xf32> to vector<2x32xf32>
    %341 = math.tanh %340 : vector<2x32xf32>
    %342 = vector.extract_strided_slice %339 {offsets = [0, 32], sizes = [2, 32], strides = [1, 1]} : vector<2x96xf32> to vector<2x32xf32>
    %343 = arith.mulf %342, %299 : vector<2x32xf32>
    %344 = vector.extract_strided_slice %339 {offsets = [0, 0], sizes = [2, 32], strides = [1, 1]} : vector<2x96xf32> to vector<2x32xf32>
    %345 = arith.mulf %344, %341 : vector<2x32xf32>
    %346 = arith.addf %343, %345 : vector<2x32xf32>
    %347 = vector.extract_strided_slice %339 {offsets = [0, 64], sizes = [2, 32], strides = [1, 1]} : vector<2x96xf32> to vector<2x32xf32>
    %348 = math.tanh %346 : vector<2x32xf32>
    %349 = arith.mulf %347, %348 : vector<2x32xf32>
    %350 = vector.extract_strided_slice %14 {offsets = [0, 7], sizes = [2, 1], strides = [1, 1]} : vector<2x8xi32> to vector<2x1xi32>
    %351 = vector.broadcast %350 : vector<2x1xi32> to vector<2x32xi32>
    %352 = arith.cmpi eq, %16, %351 : vector<2x32xi32>
    %353 = arith.extui %352 : vector<2x32xi1> to vector<2x32xi32>
    %354 = arith.sitofp %353 : vector<2x32xi32> to vector<2x32xf32>
    %cst_76 = arith.constant dense<0.000000e+00> : vector<2x128xf32>
    %355 = tpu.matmul %354, %0, %cst_76 {dimension_numbers = #tpu.dot_dimension_numbers<[1], [0], [0], [1], [0, 0, 1, 1], [], []>} : vector<2x32xf32>, vector<32x128xf32>, vector<2x128xf32> -> vector<2x128xf32>
    %cst_77 = arith.constant dense<0.000000e+00> : vector<2x128xf32>
    %356 = tpu.matmul %328, %1, %cst_77 {dimension_numbers = #tpu.dot_dimension_numbers<[1], [0], [0], [1], [0, 0, 1, 1], [], []>} : vector<2x32xf32>, vector<32x128xf32>, vector<2x128xf32> -> vector<2x128xf32>
    %357 = arith.addf %355, %356 : vector<2x128xf32>
    %358 = vector.broadcast %2 : vector<1x128xf32> to vector<2x128xf32>
    %359 = arith.addf %357, %358 : vector<2x128xf32>
    %360 = vector.extract_strided_slice %359 {offsets = [0, 0], sizes = [2, 96], strides = [1, 1]} : vector<2x128xf32> to vector<2x96xf32>
    %361 = arith.negf %360 : vector<2x96xf32>
    %362 = math.exp %361 : vector<2x96xf32>
    %cst_78 = arith.constant 1.000000e+00 : f32
    %363 = vector.broadcast %cst_78 : f32 to vector<2x96xf32>
    %364 = arith.addf %363, %362 : vector<2x96xf32>
    %365 = arith.divf %363, %364 : vector<2x96xf32>
    %366 = vector.extract_strided_slice %359 {offsets = [0, 96], sizes = [2, 32], strides = [1, 1]} : vector<2x128xf32> to vector<2x32xf32>
    %367 = math.tanh %366 : vector<2x32xf32>
    %368 = vector.extract_strided_slice %365 {offsets = [0, 32], sizes = [2, 32], strides = [1, 1]} : vector<2x96xf32> to vector<2x32xf32>
    %369 = arith.mulf %368, %325 : vector<2x32xf32>
    %370 = vector.extract_strided_slice %365 {offsets = [0, 0], sizes = [2, 32], strides = [1, 1]} : vector<2x96xf32> to vector<2x32xf32>
    %371 = arith.mulf %370, %367 : vector<2x32xf32>
    %372 = arith.addf %369, %371 : vector<2x32xf32>
    %373 = vector.extract_strided_slice %365 {offsets = [0, 64], sizes = [2, 32], strides = [1, 1]} : vector<2x96xf32> to vector<2x32xf32>
    %374 = math.tanh %372 : vector<2x32xf32>
    %375 = arith.mulf %373, %374 : vector<2x32xf32>
    %cst_79 = arith.constant dense<0.000000e+00> : vector<2x128xf32>
    %376 = tpu.matmul %375, %3, %cst_79 {dimension_numbers = #tpu.dot_dimension_numbers<[1], [0], [0], [1], [0, 0, 1, 1], [], []>} : vector<2x32xf32>, vector<32x128xf32>, vector<2x128xf32> -> vector<2x128xf32>
    %cst_80 = arith.constant dense<0.000000e+00> : vector<2x128xf32>
    %377 = tpu.matmul %349, %4, %cst_80 {dimension_numbers = #tpu.dot_dimension_numbers<[1], [0], [0], [1], [0, 0, 1, 1], [], []>} : vector<2x32xf32>, vector<32x128xf32>, vector<2x128xf32> -> vector<2x128xf32>
    %378 = arith.addf %376, %377 : vector<2x128xf32>
    %379 = vector.broadcast %5 : vector<1x128xf32> to vector<2x128xf32>
    %380 = arith.addf %378, %379 : vector<2x128xf32>
    %381 = vector.extract_strided_slice %380 {offsets = [0, 0], sizes = [2, 96], strides = [1, 1]} : vector<2x128xf32> to vector<2x96xf32>
    %382 = arith.negf %381 : vector<2x96xf32>
    %383 = math.exp %382 : vector<2x96xf32>
    %cst_81 = arith.constant 1.000000e+00 : f32
    %384 = vector.broadcast %cst_81 : f32 to vector<2x96xf32>
    %385 = arith.addf %384, %383 : vector<2x96xf32>
    %386 = arith.divf %384, %385 : vector<2x96xf32>
    %387 = vector.extract_strided_slice %380 {offsets = [0, 96], sizes = [2, 32], strides = [1, 1]} : vector<2x128xf32> to vector<2x32xf32>
    %388 = math.tanh %387 : vector<2x32xf32>
    %389 = vector.extract_strided_slice %386 {offsets = [0, 32], sizes = [2, 32], strides = [1, 1]} : vector<2x96xf32> to vector<2x32xf32>
    %390 = arith.mulf %389, %346 : vector<2x32xf32>
    %391 = vector.extract_strided_slice %386 {offsets = [0, 0], sizes = [2, 32], strides = [1, 1]} : vector<2x96xf32> to vector<2x32xf32>
    %392 = arith.mulf %391, %388 : vector<2x32xf32>
    %393 = arith.addf %390, %392 : vector<2x32xf32>
    %394 = vector.extract_strided_slice %386 {offsets = [0, 64], sizes = [2, 32], strides = [1, 1]} : vector<2x96xf32> to vector<2x32xf32>
    %395 = math.tanh %393 : vector<2x32xf32>
    %396 = arith.mulf %394, %395 : vector<2x32xf32>
    %cst_82 = arith.constant 0.000000e+00 : f32
    %397 = vector.broadcast %cst_82 : f32 to vector<2x32xf32>
    %398 = vector.extract_strided_slice %15 {offsets = [0, 0], sizes = [2, 1], strides = [1, 1]} : vector<2x8xi32> to vector<2x1xi32>
    %399 = vector.broadcast %398 : vector<2x1xi32> to vector<2x32xi32>
    %400 = arith.cmpi eq, %16, %399 : vector<2x32xi32>
    %401 = arith.extui %400 : vector<2x32xi1> to vector<2x32xi32>
    %402 = arith.sitofp %401 : vector<2x32xi32> to vector<2x32xf32>
    %cst_83 = arith.constant dense<0.000000e+00> : vector<2x128xf32>
    %403 = tpu.matmul %402, %6, %cst_83 {dimension_numbers = #tpu.dot_dimension_numbers<[1], [0], [0], [1], [0, 0, 1, 1], [], []>} : vector<2x32xf32>, vector<32x128xf32>, vector<2x128xf32> -> vector<2x128xf32>
    %cst_84 = arith.constant dense<0.000000e+00> : vector<2x128xf32>
    %404 = tpu.matmul %375, %7, %cst_84 {dimension_numbers = #tpu.dot_dimension_numbers<[1], [0], [0], [1], [0, 0, 1, 1], [], []>} : vector<2x32xf32>, vector<32x128xf32>, vector<2x128xf32> -> vector<2x128xf32>
    %405 = arith.addf %403, %404 : vector<2x128xf32>
    %406 = vector.broadcast %8 : vector<1x128xf32> to vector<2x128xf32>
    %407 = arith.addf %405, %406 : vector<2x128xf32>
    %408 = vector.extract_strided_slice %407 {offsets = [0, 0], sizes = [2, 96], strides = [1, 1]} : vector<2x128xf32> to vector<2x96xf32>
    %409 = arith.negf %408 : vector<2x96xf32>
    %410 = math.exp %409 : vector<2x96xf32>
    %cst_85 = arith.constant 1.000000e+00 : f32
    %411 = vector.broadcast %cst_85 : f32 to vector<2x96xf32>
    %412 = arith.addf %411, %410 : vector<2x96xf32>
    %413 = arith.divf %411, %412 : vector<2x96xf32>
    %414 = vector.extract_strided_slice %407 {offsets = [0, 96], sizes = [2, 32], strides = [1, 1]} : vector<2x128xf32> to vector<2x32xf32>
    %415 = math.tanh %414 : vector<2x32xf32>
    %416 = vector.extract_strided_slice %413 {offsets = [0, 32], sizes = [2, 32], strides = [1, 1]} : vector<2x96xf32> to vector<2x32xf32>
    %417 = arith.mulf %416, %372 : vector<2x32xf32>
    %418 = vector.extract_strided_slice %413 {offsets = [0, 0], sizes = [2, 32], strides = [1, 1]} : vector<2x96xf32> to vector<2x32xf32>
    %419 = arith.mulf %418, %415 : vector<2x32xf32>
    %420 = arith.addf %417, %419 : vector<2x32xf32>
    %421 = vector.extract_strided_slice %413 {offsets = [0, 64], sizes = [2, 32], strides = [1, 1]} : vector<2x96xf32> to vector<2x32xf32>
    %422 = math.tanh %420 : vector<2x32xf32>
    %423 = arith.mulf %421, %422 : vector<2x32xf32>
    %cst_86 = arith.constant dense<0.000000e+00> : vector<2x128xf32>
    %424 = tpu.matmul %423, %9, %cst_86 {dimension_numbers = #tpu.dot_dimension_numbers<[1], [0], [0], [1], [0, 0, 1, 1], [], []>} : vector<2x32xf32>, vector<32x128xf32>, vector<2x128xf32> -> vector<2x128xf32>
    %cst_87 = arith.constant dense<0.000000e+00> : vector<2x128xf32>
    %425 = tpu.matmul %396, %10, %cst_87 {dimension_numbers = #tpu.dot_dimension_numbers<[1], [0], [0], [1], [0, 0, 1, 1], [], []>} : vector<2x32xf32>, vector<32x128xf32>, vector<2x128xf32> -> vector<2x128xf32>
    %426 = arith.addf %424, %425 : vector<2x128xf32>
    %427 = vector.broadcast %11 : vector<1x128xf32> to vector<2x128xf32>
    %428 = arith.addf %426, %427 : vector<2x128xf32>
    %429 = vector.extract_strided_slice %428 {offsets = [0, 0], sizes = [2, 96], strides = [1, 1]} : vector<2x128xf32> to vector<2x96xf32>
    %430 = arith.negf %429 : vector<2x96xf32>
    %431 = math.exp %430 : vector<2x96xf32>
    %cst_88 = arith.constant 1.000000e+00 : f32
    %432 = vector.broadcast %cst_88 : f32 to vector<2x96xf32>
    %433 = arith.addf %432, %431 : vector<2x96xf32>
    %434 = arith.divf %432, %433 : vector<2x96xf32>
    %435 = vector.extract_strided_slice %428 {offsets = [0, 96], sizes = [2, 32], strides = [1, 1]} : vector<2x128xf32> to vector<2x32xf32>
    %436 = math.tanh %435 : vector<2x32xf32>
    %437 = vector.extract_strided_slice %434 {offsets = [0, 32], sizes = [2, 32], strides = [1, 1]} : vector<2x96xf32> to vector<2x32xf32>
    %438 = arith.mulf %437, %393 : vector<2x32xf32>
    %439 = vector.extract_strided_slice %434 {offsets = [0, 0], sizes = [2, 32], strides = [1, 1]} : vector<2x96xf32> to vector<2x32xf32>
    %440 = arith.mulf %439, %436 : vector<2x32xf32>
    %441 = arith.addf %438, %440 : vector<2x32xf32>
    %442 = vector.extract_strided_slice %434 {offsets = [0, 64], sizes = [2, 32], strides = [1, 1]} : vector<2x96xf32> to vector<2x32xf32>
    %443 = math.tanh %441 : vector<2x32xf32>
    %444 = arith.mulf %442, %443 : vector<2x32xf32>
    %cst_89 = arith.constant dense<0.000000e+00> : vector<2x32xf32>
    %445 = tpu.matmul %444, %12, %cst_89 {dimension_numbers = #tpu.dot_dimension_numbers<[1], [0], [0], [1], [0, 0, 1, 1], [], []>} : vector<2x32xf32>, vector<32x32xf32>, vector<2x32xf32> -> vector<2x32xf32>
    %446 = vector.broadcast %13 : vector<1x32xf32> to vector<2x32xf32>
    %447 = arith.addf %445, %446 : vector<2x32xf32>
    %cst_90 = arith.constant dense<0xFF800000> : vector<2xf32>
    %448 = vector.multi_reduction <maximumf>, %447, %cst_90 [1] : vector<2x32xf32> to vector<2xf32>
    %449 = vector.shape_cast %448 : vector<2xf32> to vector<2x1xf32>
    %450 = vector.broadcast %449 : vector<2x1xf32> to vector<2x32xf32>
    %451 = arith.cmpf oeq, %447, %450 : vector<2x32xf32>
    %c32_i32 = arith.constant 32 : i32
    %452 = vector.broadcast %c32_i32 : i32 to vector<2x32xi32>
    %453 = arith.select %451, %16, %452 : vector<2x32xi1>, vector<2x32xi32>
    %cst_91 = arith.constant dense<2147483647> : vector<2xi32>
    %454 = vector.multi_reduction <minsi>, %453, %cst_91 [1] : vector<2x32xi32> to vector<2xi32>
    %455 = vector.shape_cast %454 : vector<2xi32> to vector<2x1xi32>
    %c1 = arith.constant 1 : index
    %456 = memref.load %arg0[%c1] : memref<8xi32, #tpu.memory_space<smem>>
    %c0_i32 = arith.constant 0 : i32
    %457 = arith.cmpi ne, %456, %c0_i32 : i32
    %458 = vector.extract_strided_slice %15 {offsets = [0, 1], sizes = [2, 1], strides = [1, 1]} : vector<2x8xi32> to vector<2x1xi32>
    %459 = arith.select %457, %458, %455 : vector<2x1xi32>
    %460 = vector.broadcast %459 : vector<2x1xi32> to vector<2x32xi32>
    %461 = arith.cmpi eq, %16, %460 : vector<2x32xi32>
    %462 = arith.extui %461 : vector<2x32xi1> to vector<2x32xi32>
    %463 = arith.sitofp %462 : vector<2x32xi32> to vector<2x32xf32>
    %cst_92 = arith.constant dense<0.000000e+00> : vector<2x128xf32>
    %464 = tpu.matmul %463, %6, %cst_92 {dimension_numbers = #tpu.dot_dimension_numbers<[1], [0], [0], [1], [0, 0, 1, 1], [], []>} : vector<2x32xf32>, vector<32x128xf32>, vector<2x128xf32> -> vector<2x128xf32>
    %cst_93 = arith.constant dense<0.000000e+00> : vector<2x128xf32>
    %465 = tpu.matmul %423, %7, %cst_93 {dimension_numbers = #tpu.dot_dimension_numbers<[1], [0], [0], [1], [0, 0, 1, 1], [], []>} : vector<2x32xf32>, vector<32x128xf32>, vector<2x128xf32> -> vector<2x128xf32>
    %466 = arith.addf %464, %465 : vector<2x128xf32>
    %467 = vector.broadcast %8 : vector<1x128xf32> to vector<2x128xf32>
    %468 = arith.addf %466, %467 : vector<2x128xf32>
    %469 = vector.extract_strided_slice %468 {offsets = [0, 0], sizes = [2, 96], strides = [1, 1]} : vector<2x128xf32> to vector<2x96xf32>
    %470 = arith.negf %469 : vector<2x96xf32>
    %471 = math.exp %470 : vector<2x96xf32>
    %cst_94 = arith.constant 1.000000e+00 : f32
    %472 = vector.broadcast %cst_94 : f32 to vector<2x96xf32>
    %473 = arith.addf %472, %471 : vector<2x96xf32>
    %474 = arith.divf %472, %473 : vector<2x96xf32>
    %475 = vector.extract_strided_slice %468 {offsets = [0, 96], sizes = [2, 32], strides = [1, 1]} : vector<2x128xf32> to vector<2x32xf32>
    %476 = math.tanh %475 : vector<2x32xf32>
    %477 = vector.extract_strided_slice %474 {offsets = [0, 32], sizes = [2, 32], strides = [1, 1]} : vector<2x96xf32> to vector<2x32xf32>
    %478 = arith.mulf %477, %420 : vector<2x32xf32>
    %479 = vector.extract_strided_slice %474 {offsets = [0, 0], sizes = [2, 32], strides = [1, 1]} : vector<2x96xf32> to vector<2x32xf32>
    %480 = arith.mulf %479, %476 : vector<2x32xf32>
    %481 = arith.addf %478, %480 : vector<2x32xf32>
    %482 = vector.extract_strided_slice %474 {offsets = [0, 64], sizes = [2, 32], strides = [1, 1]} : vector<2x96xf32> to vector<2x32xf32>
    %483 = math.tanh %481 : vector<2x32xf32>
    %484 = arith.mulf %482, %483 : vector<2x32xf32>
    %cst_95 = arith.constant dense<0.000000e+00> : vector<2x128xf32>
    %485 = tpu.matmul %484, %9, %cst_95 {dimension_numbers = #tpu.dot_dimension_numbers<[1], [0], [0], [1], [0, 0, 1, 1], [], []>} : vector<2x32xf32>, vector<32x128xf32>, vector<2x128xf32> -> vector<2x128xf32>
    %cst_96 = arith.constant dense<0.000000e+00> : vector<2x128xf32>
    %486 = tpu.matmul %444, %10, %cst_96 {dimension_numbers = #tpu.dot_dimension_numbers<[1], [0], [0], [1], [0, 0, 1, 1], [], []>} : vector<2x32xf32>, vector<32x128xf32>, vector<2x128xf32> -> vector<2x128xf32>
    %487 = arith.addf %485, %486 : vector<2x128xf32>
    %488 = vector.broadcast %11 : vector<1x128xf32> to vector<2x128xf32>
    %489 = arith.addf %487, %488 : vector<2x128xf32>
    %490 = vector.extract_strided_slice %489 {offsets = [0, 0], sizes = [2, 96], strides = [1, 1]} : vector<2x128xf32> to vector<2x96xf32>
    %491 = arith.negf %490 : vector<2x96xf32>
    %492 = math.exp %491 : vector<2x96xf32>
    %cst_97 = arith.constant 1.000000e+00 : f32
    %493 = vector.broadcast %cst_97 : f32 to vector<2x96xf32>
    %494 = arith.addf %493, %492 : vector<2x96xf32>
    %495 = arith.divf %493, %494 : vector<2x96xf32>
    %496 = vector.extract_strided_slice %489 {offsets = [0, 96], sizes = [2, 32], strides = [1, 1]} : vector<2x128xf32> to vector<2x32xf32>
    %497 = math.tanh %496 : vector<2x32xf32>
    %498 = vector.extract_strided_slice %495 {offsets = [0, 32], sizes = [2, 32], strides = [1, 1]} : vector<2x96xf32> to vector<2x32xf32>
    %499 = arith.mulf %498, %441 : vector<2x32xf32>
    %500 = vector.extract_strided_slice %495 {offsets = [0, 0], sizes = [2, 32], strides = [1, 1]} : vector<2x96xf32> to vector<2x32xf32>
    %501 = arith.mulf %500, %497 : vector<2x32xf32>
    %502 = arith.addf %499, %501 : vector<2x32xf32>
    %503 = vector.extract_strided_slice %495 {offsets = [0, 64], sizes = [2, 32], strides = [1, 1]} : vector<2x96xf32> to vector<2x32xf32>
    %504 = math.tanh %502 : vector<2x32xf32>
    %505 = arith.mulf %503, %504 : vector<2x32xf32>
    %cst_98 = arith.constant dense<0.000000e+00> : vector<2x32xf32>
    %506 = tpu.matmul %505, %12, %cst_98 {dimension_numbers = #tpu.dot_dimension_numbers<[1], [0], [0], [1], [0, 0, 1, 1], [], []>} : vector<2x32xf32>, vector<32x32xf32>, vector<2x32xf32> -> vector<2x32xf32>
    %507 = vector.broadcast %13 : vector<1x32xf32> to vector<2x32xf32>
    %508 = arith.addf %506, %507 : vector<2x32xf32>
    %cst_99 = arith.constant dense<0xFF800000> : vector<2xf32>
    %509 = vector.multi_reduction <maximumf>, %508, %cst_99 [1] : vector<2x32xf32> to vector<2xf32>
    %510 = vector.shape_cast %509 : vector<2xf32> to vector<2x1xf32>
    %511 = vector.broadcast %510 : vector<2x1xf32> to vector<2x32xf32>
    %512 = arith.cmpf oeq, %508, %511 : vector<2x32xf32>
    %c32_i32_100 = arith.constant 32 : i32
    %513 = vector.broadcast %c32_i32_100 : i32 to vector<2x32xi32>
    %514 = arith.select %512, %16, %513 : vector<2x32xi1>, vector<2x32xi32>
    %cst_101 = arith.constant dense<2147483647> : vector<2xi32>
    %515 = vector.multi_reduction <minsi>, %514, %cst_101 [1] : vector<2x32xi32> to vector<2xi32>
    %516 = vector.shape_cast %515 : vector<2xi32> to vector<2x1xi32>
    %c2 = arith.constant 2 : index
    %517 = memref.load %arg0[%c2] : memref<8xi32, #tpu.memory_space<smem>>
    %c0_i32_102 = arith.constant 0 : i32
    %518 = arith.cmpi ne, %517, %c0_i32_102 : i32
    %519 = vector.extract_strided_slice %15 {offsets = [0, 2], sizes = [2, 1], strides = [1, 1]} : vector<2x8xi32> to vector<2x1xi32>
    %520 = arith.select %518, %519, %516 : vector<2x1xi32>
    %521 = vector.broadcast %520 : vector<2x1xi32> to vector<2x32xi32>
    %522 = arith.cmpi eq, %16, %521 : vector<2x32xi32>
    %523 = arith.extui %522 : vector<2x32xi1> to vector<2x32xi32>
    %524 = arith.sitofp %523 : vector<2x32xi32> to vector<2x32xf32>
    %cst_103 = arith.constant dense<0.000000e+00> : vector<2x128xf32>
    %525 = tpu.matmul %524, %6, %cst_103 {dimension_numbers = #tpu.dot_dimension_numbers<[1], [0], [0], [1], [0, 0, 1, 1], [], []>} : vector<2x32xf32>, vector<32x128xf32>, vector<2x128xf32> -> vector<2x128xf32>
    %cst_104 = arith.constant dense<0.000000e+00> : vector<2x128xf32>
    %526 = tpu.matmul %484, %7, %cst_104 {dimension_numbers = #tpu.dot_dimension_numbers<[1], [0], [0], [1], [0, 0, 1, 1], [], []>} : vector<2x32xf32>, vector<32x128xf32>, vector<2x128xf32> -> vector<2x128xf32>
    %527 = arith.addf %525, %526 : vector<2x128xf32>
    %528 = vector.broadcast %8 : vector<1x128xf32> to vector<2x128xf32>
    %529 = arith.addf %527, %528 : vector<2x128xf32>
    %530 = vector.extract_strided_slice %529 {offsets = [0, 0], sizes = [2, 96], strides = [1, 1]} : vector<2x128xf32> to vector<2x96xf32>
    %531 = arith.negf %530 : vector<2x96xf32>
    %532 = math.exp %531 : vector<2x96xf32>
    %cst_105 = arith.constant 1.000000e+00 : f32
    %533 = vector.broadcast %cst_105 : f32 to vector<2x96xf32>
    %534 = arith.addf %533, %532 : vector<2x96xf32>
    %535 = arith.divf %533, %534 : vector<2x96xf32>
    %536 = vector.extract_strided_slice %529 {offsets = [0, 96], sizes = [2, 32], strides = [1, 1]} : vector<2x128xf32> to vector<2x32xf32>
    %537 = math.tanh %536 : vector<2x32xf32>
    %538 = vector.extract_strided_slice %535 {offsets = [0, 32], sizes = [2, 32], strides = [1, 1]} : vector<2x96xf32> to vector<2x32xf32>
    %539 = arith.mulf %538, %481 : vector<2x32xf32>
    %540 = vector.extract_strided_slice %535 {offsets = [0, 0], sizes = [2, 32], strides = [1, 1]} : vector<2x96xf32> to vector<2x32xf32>
    %541 = arith.mulf %540, %537 : vector<2x32xf32>
    %542 = arith.addf %539, %541 : vector<2x32xf32>
    %543 = vector.extract_strided_slice %535 {offsets = [0, 64], sizes = [2, 32], strides = [1, 1]} : vector<2x96xf32> to vector<2x32xf32>
    %544 = math.tanh %542 : vector<2x32xf32>
    %545 = arith.mulf %543, %544 : vector<2x32xf32>
    %cst_106 = arith.constant dense<0.000000e+00> : vector<2x128xf32>
    %546 = tpu.matmul %545, %9, %cst_106 {dimension_numbers = #tpu.dot_dimension_numbers<[1], [0], [0], [1], [0, 0, 1, 1], [], []>} : vector<2x32xf32>, vector<32x128xf32>, vector<2x128xf32> -> vector<2x128xf32>
    %cst_107 = arith.constant dense<0.000000e+00> : vector<2x128xf32>
    %547 = tpu.matmul %505, %10, %cst_107 {dimension_numbers = #tpu.dot_dimension_numbers<[1], [0], [0], [1], [0, 0, 1, 1], [], []>} : vector<2x32xf32>, vector<32x128xf32>, vector<2x128xf32> -> vector<2x128xf32>
    %548 = arith.addf %546, %547 : vector<2x128xf32>
    %549 = vector.broadcast %11 : vector<1x128xf32> to vector<2x128xf32>
    %550 = arith.addf %548, %549 : vector<2x128xf32>
    %551 = vector.extract_strided_slice %550 {offsets = [0, 0], sizes = [2, 96], strides = [1, 1]} : vector<2x128xf32> to vector<2x96xf32>
    %552 = arith.negf %551 : vector<2x96xf32>
    %553 = math.exp %552 : vector<2x96xf32>
    %cst_108 = arith.constant 1.000000e+00 : f32
    %554 = vector.broadcast %cst_108 : f32 to vector<2x96xf32>
    %555 = arith.addf %554, %553 : vector<2x96xf32>
    %556 = arith.divf %554, %555 : vector<2x96xf32>
    %557 = vector.extract_strided_slice %550 {offsets = [0, 96], sizes = [2, 32], strides = [1, 1]} : vector<2x128xf32> to vector<2x32xf32>
    %558 = math.tanh %557 : vector<2x32xf32>
    %559 = vector.extract_strided_slice %556 {offsets = [0, 32], sizes = [2, 32], strides = [1, 1]} : vector<2x96xf32> to vector<2x32xf32>
    %560 = arith.mulf %559, %502 : vector<2x32xf32>
    %561 = vector.extract_strided_slice %556 {offsets = [0, 0], sizes = [2, 32], strides = [1, 1]} : vector<2x96xf32> to vector<2x32xf32>
    %562 = arith.mulf %561, %558 : vector<2x32xf32>
    %563 = arith.addf %560, %562 : vector<2x32xf32>
    %564 = vector.extract_strided_slice %556 {offsets = [0, 64], sizes = [2, 32], strides = [1, 1]} : vector<2x96xf32> to vector<2x32xf32>
    %565 = math.tanh %563 : vector<2x32xf32>
    %566 = arith.mulf %564, %565 : vector<2x32xf32>
    %cst_109 = arith.constant dense<0.000000e+00> : vector<2x32xf32>
    %567 = tpu.matmul %566, %12, %cst_109 {dimension_numbers = #tpu.dot_dimension_numbers<[1], [0], [0], [1], [0, 0, 1, 1], [], []>} : vector<2x32xf32>, vector<32x32xf32>, vector<2x32xf32> -> vector<2x32xf32>
    %568 = vector.broadcast %13 : vector<1x32xf32> to vector<2x32xf32>
    %569 = arith.addf %567, %568 : vector<2x32xf32>
    %cst_110 = arith.constant dense<0xFF800000> : vector<2xf32>
    %570 = vector.multi_reduction <maximumf>, %569, %cst_110 [1] : vector<2x32xf32> to vector<2xf32>
    %571 = vector.shape_cast %570 : vector<2xf32> to vector<2x1xf32>
    %572 = vector.broadcast %571 : vector<2x1xf32> to vector<2x32xf32>
    %573 = arith.cmpf oeq, %569, %572 : vector<2x32xf32>
    %c32_i32_111 = arith.constant 32 : i32
    %574 = vector.broadcast %c32_i32_111 : i32 to vector<2x32xi32>
    %575 = arith.select %573, %16, %574 : vector<2x32xi1>, vector<2x32xi32>
    %cst_112 = arith.constant dense<2147483647> : vector<2xi32>
    %576 = vector.multi_reduction <minsi>, %575, %cst_112 [1] : vector<2x32xi32> to vector<2xi32>
    %577 = vector.shape_cast %576 : vector<2xi32> to vector<2x1xi32>
    %c3 = arith.constant 3 : index
    %578 = memref.load %arg0[%c3] : memref<8xi32, #tpu.memory_space<smem>>
    %c0_i32_113 = arith.constant 0 : i32
    %579 = arith.cmpi ne, %578, %c0_i32_113 : i32
    %580 = vector.extract_strided_slice %15 {offsets = [0, 3], sizes = [2, 1], strides = [1, 1]} : vector<2x8xi32> to vector<2x1xi32>
    %581 = arith.select %579, %580, %577 : vector<2x1xi32>
    %582 = vector.broadcast %581 : vector<2x1xi32> to vector<2x32xi32>
    %583 = arith.cmpi eq, %16, %582 : vector<2x32xi32>
    %584 = arith.extui %583 : vector<2x32xi1> to vector<2x32xi32>
    %585 = arith.sitofp %584 : vector<2x32xi32> to vector<2x32xf32>
    %cst_114 = arith.constant dense<0.000000e+00> : vector<2x128xf32>
    %586 = tpu.matmul %585, %6, %cst_114 {dimension_numbers = #tpu.dot_dimension_numbers<[1], [0], [0], [1], [0, 0, 1, 1], [], []>} : vector<2x32xf32>, vector<32x128xf32>, vector<2x128xf32> -> vector<2x128xf32>
    %cst_115 = arith.constant dense<0.000000e+00> : vector<2x128xf32>
    %587 = tpu.matmul %545, %7, %cst_115 {dimension_numbers = #tpu.dot_dimension_numbers<[1], [0], [0], [1], [0, 0, 1, 1], [], []>} : vector<2x32xf32>, vector<32x128xf32>, vector<2x128xf32> -> vector<2x128xf32>
    %588 = arith.addf %586, %587 : vector<2x128xf32>
    %589 = vector.broadcast %8 : vector<1x128xf32> to vector<2x128xf32>
    %590 = arith.addf %588, %589 : vector<2x128xf32>
    %591 = vector.extract_strided_slice %590 {offsets = [0, 0], sizes = [2, 96], strides = [1, 1]} : vector<2x128xf32> to vector<2x96xf32>
    %592 = arith.negf %591 : vector<2x96xf32>
    %593 = math.exp %592 : vector<2x96xf32>
    %cst_116 = arith.constant 1.000000e+00 : f32
    %594 = vector.broadcast %cst_116 : f32 to vector<2x96xf32>
    %595 = arith.addf %594, %593 : vector<2x96xf32>
    %596 = arith.divf %594, %595 : vector<2x96xf32>
    %597 = vector.extract_strided_slice %590 {offsets = [0, 96], sizes = [2, 32], strides = [1, 1]} : vector<2x128xf32> to vector<2x32xf32>
    %598 = math.tanh %597 : vector<2x32xf32>
    %599 = vector.extract_strided_slice %596 {offsets = [0, 32], sizes = [2, 32], strides = [1, 1]} : vector<2x96xf32> to vector<2x32xf32>
    %600 = arith.mulf %599, %542 : vector<2x32xf32>
    %601 = vector.extract_strided_slice %596 {offsets = [0, 0], sizes = [2, 32], strides = [1, 1]} : vector<2x96xf32> to vector<2x32xf32>
    %602 = arith.mulf %601, %598 : vector<2x32xf32>
    %603 = arith.addf %600, %602 : vector<2x32xf32>
    %604 = vector.extract_strided_slice %596 {offsets = [0, 64], sizes = [2, 32], strides = [1, 1]} : vector<2x96xf32> to vector<2x32xf32>
    %605 = math.tanh %603 : vector<2x32xf32>
    %606 = arith.mulf %604, %605 : vector<2x32xf32>
    %cst_117 = arith.constant dense<0.000000e+00> : vector<2x128xf32>
    %607 = tpu.matmul %606, %9, %cst_117 {dimension_numbers = #tpu.dot_dimension_numbers<[1], [0], [0], [1], [0, 0, 1, 1], [], []>} : vector<2x32xf32>, vector<32x128xf32>, vector<2x128xf32> -> vector<2x128xf32>
    %cst_118 = arith.constant dense<0.000000e+00> : vector<2x128xf32>
    %608 = tpu.matmul %566, %10, %cst_118 {dimension_numbers = #tpu.dot_dimension_numbers<[1], [0], [0], [1], [0, 0, 1, 1], [], []>} : vector<2x32xf32>, vector<32x128xf32>, vector<2x128xf32> -> vector<2x128xf32>
    %609 = arith.addf %607, %608 : vector<2x128xf32>
    %610 = vector.broadcast %11 : vector<1x128xf32> to vector<2x128xf32>
    %611 = arith.addf %609, %610 : vector<2x128xf32>
    %612 = vector.extract_strided_slice %611 {offsets = [0, 0], sizes = [2, 96], strides = [1, 1]} : vector<2x128xf32> to vector<2x96xf32>
    %613 = arith.negf %612 : vector<2x96xf32>
    %614 = math.exp %613 : vector<2x96xf32>
    %cst_119 = arith.constant 1.000000e+00 : f32
    %615 = vector.broadcast %cst_119 : f32 to vector<2x96xf32>
    %616 = arith.addf %615, %614 : vector<2x96xf32>
    %617 = arith.divf %615, %616 : vector<2x96xf32>
    %618 = vector.extract_strided_slice %611 {offsets = [0, 96], sizes = [2, 32], strides = [1, 1]} : vector<2x128xf32> to vector<2x32xf32>
    %619 = math.tanh %618 : vector<2x32xf32>
    %620 = vector.extract_strided_slice %617 {offsets = [0, 32], sizes = [2, 32], strides = [1, 1]} : vector<2x96xf32> to vector<2x32xf32>
    %621 = arith.mulf %620, %563 : vector<2x32xf32>
    %622 = vector.extract_strided_slice %617 {offsets = [0, 0], sizes = [2, 32], strides = [1, 1]} : vector<2x96xf32> to vector<2x32xf32>
    %623 = arith.mulf %622, %619 : vector<2x32xf32>
    %624 = arith.addf %621, %623 : vector<2x32xf32>
    %625 = vector.extract_strided_slice %617 {offsets = [0, 64], sizes = [2, 32], strides = [1, 1]} : vector<2x96xf32> to vector<2x32xf32>
    %626 = math.tanh %624 : vector<2x32xf32>
    %627 = arith.mulf %625, %626 : vector<2x32xf32>
    %cst_120 = arith.constant dense<0.000000e+00> : vector<2x32xf32>
    %628 = tpu.matmul %627, %12, %cst_120 {dimension_numbers = #tpu.dot_dimension_numbers<[1], [0], [0], [1], [0, 0, 1, 1], [], []>} : vector<2x32xf32>, vector<32x32xf32>, vector<2x32xf32> -> vector<2x32xf32>
    %629 = vector.broadcast %13 : vector<1x32xf32> to vector<2x32xf32>
    %630 = arith.addf %628, %629 : vector<2x32xf32>
    %cst_121 = arith.constant dense<0xFF800000> : vector<2xf32>
    %631 = vector.multi_reduction <maximumf>, %630, %cst_121 [1] : vector<2x32xf32> to vector<2xf32>
    %632 = vector.shape_cast %631 : vector<2xf32> to vector<2x1xf32>
    %633 = vector.broadcast %632 : vector<2x1xf32> to vector<2x32xf32>
    %634 = arith.cmpf oeq, %630, %633 : vector<2x32xf32>
    %c32_i32_122 = arith.constant 32 : i32
    %635 = vector.broadcast %c32_i32_122 : i32 to vector<2x32xi32>
    %636 = arith.select %634, %16, %635 : vector<2x32xi1>, vector<2x32xi32>
    %cst_123 = arith.constant dense<2147483647> : vector<2xi32>
    %637 = vector.multi_reduction <minsi>, %636, %cst_123 [1] : vector<2x32xi32> to vector<2xi32>
    %638 = vector.shape_cast %637 : vector<2xi32> to vector<2x1xi32>
    %c4 = arith.constant 4 : index
    %639 = memref.load %arg0[%c4] : memref<8xi32, #tpu.memory_space<smem>>
    %c0_i32_124 = arith.constant 0 : i32
    %640 = arith.cmpi ne, %639, %c0_i32_124 : i32
    %641 = vector.extract_strided_slice %15 {offsets = [0, 4], sizes = [2, 1], strides = [1, 1]} : vector<2x8xi32> to vector<2x1xi32>
    %642 = arith.select %640, %641, %638 : vector<2x1xi32>
    %643 = vector.broadcast %642 : vector<2x1xi32> to vector<2x32xi32>
    %644 = arith.cmpi eq, %16, %643 : vector<2x32xi32>
    %645 = arith.extui %644 : vector<2x32xi1> to vector<2x32xi32>
    %646 = arith.sitofp %645 : vector<2x32xi32> to vector<2x32xf32>
    %cst_125 = arith.constant dense<0.000000e+00> : vector<2x128xf32>
    %647 = tpu.matmul %646, %6, %cst_125 {dimension_numbers = #tpu.dot_dimension_numbers<[1], [0], [0], [1], [0, 0, 1, 1], [], []>} : vector<2x32xf32>, vector<32x128xf32>, vector<2x128xf32> -> vector<2x128xf32>
    %cst_126 = arith.constant dense<0.000000e+00> : vector<2x128xf32>
    %648 = tpu.matmul %606, %7, %cst_126 {dimension_numbers = #tpu.dot_dimension_numbers<[1], [0], [0], [1], [0, 0, 1, 1], [], []>} : vector<2x32xf32>, vector<32x128xf32>, vector<2x128xf32> -> vector<2x128xf32>
    %649 = arith.addf %647, %648 : vector<2x128xf32>
    %650 = vector.broadcast %8 : vector<1x128xf32> to vector<2x128xf32>
    %651 = arith.addf %649, %650 : vector<2x128xf32>
    %652 = vector.extract_strided_slice %651 {offsets = [0, 0], sizes = [2, 96], strides = [1, 1]} : vector<2x128xf32> to vector<2x96xf32>
    %653 = arith.negf %652 : vector<2x96xf32>
    %654 = math.exp %653 : vector<2x96xf32>
    %cst_127 = arith.constant 1.000000e+00 : f32
    %655 = vector.broadcast %cst_127 : f32 to vector<2x96xf32>
    %656 = arith.addf %655, %654 : vector<2x96xf32>
    %657 = arith.divf %655, %656 : vector<2x96xf32>
    %658 = vector.extract_strided_slice %651 {offsets = [0, 96], sizes = [2, 32], strides = [1, 1]} : vector<2x128xf32> to vector<2x32xf32>
    %659 = math.tanh %658 : vector<2x32xf32>
    %660 = vector.extract_strided_slice %657 {offsets = [0, 32], sizes = [2, 32], strides = [1, 1]} : vector<2x96xf32> to vector<2x32xf32>
    %661 = arith.mulf %660, %603 : vector<2x32xf32>
    %662 = vector.extract_strided_slice %657 {offsets = [0, 0], sizes = [2, 32], strides = [1, 1]} : vector<2x96xf32> to vector<2x32xf32>
    %663 = arith.mulf %662, %659 : vector<2x32xf32>
    %664 = arith.addf %661, %663 : vector<2x32xf32>
    %665 = vector.extract_strided_slice %657 {offsets = [0, 64], sizes = [2, 32], strides = [1, 1]} : vector<2x96xf32> to vector<2x32xf32>
    %666 = math.tanh %664 : vector<2x32xf32>
    %667 = arith.mulf %665, %666 : vector<2x32xf32>
    %cst_128 = arith.constant dense<0.000000e+00> : vector<2x128xf32>
    %668 = tpu.matmul %667, %9, %cst_128 {dimension_numbers = #tpu.dot_dimension_numbers<[1], [0], [0], [1], [0, 0, 1, 1], [], []>} : vector<2x32xf32>, vector<32x128xf32>, vector<2x128xf32> -> vector<2x128xf32>
    %cst_129 = arith.constant dense<0.000000e+00> : vector<2x128xf32>
    %669 = tpu.matmul %627, %10, %cst_129 {dimension_numbers = #tpu.dot_dimension_numbers<[1], [0], [0], [1], [0, 0, 1, 1], [], []>} : vector<2x32xf32>, vector<32x128xf32>, vector<2x128xf32> -> vector<2x128xf32>
    %670 = arith.addf %668, %669 : vector<2x128xf32>
    %671 = vector.broadcast %11 : vector<1x128xf32> to vector<2x128xf32>
    %672 = arith.addf %670, %671 : vector<2x128xf32>
    %673 = vector.extract_strided_slice %672 {offsets = [0, 0], sizes = [2, 96], strides = [1, 1]} : vector<2x128xf32> to vector<2x96xf32>
    %674 = arith.negf %673 : vector<2x96xf32>
    %675 = math.exp %674 : vector<2x96xf32>
    %cst_130 = arith.constant 1.000000e+00 : f32
    %676 = vector.broadcast %cst_130 : f32 to vector<2x96xf32>
    %677 = arith.addf %676, %675 : vector<2x96xf32>
    %678 = arith.divf %676, %677 : vector<2x96xf32>
    %679 = vector.extract_strided_slice %672 {offsets = [0, 96], sizes = [2, 32], strides = [1, 1]} : vector<2x128xf32> to vector<2x32xf32>
    %680 = math.tanh %679 : vector<2x32xf32>
    %681 = vector.extract_strided_slice %678 {offsets = [0, 32], sizes = [2, 32], strides = [1, 1]} : vector<2x96xf32> to vector<2x32xf32>
    %682 = arith.mulf %681, %624 : vector<2x32xf32>
    %683 = vector.extract_strided_slice %678 {offsets = [0, 0], sizes = [2, 32], strides = [1, 1]} : vector<2x96xf32> to vector<2x32xf32>
    %684 = arith.mulf %683, %680 : vector<2x32xf32>
    %685 = arith.addf %682, %684 : vector<2x32xf32>
    %686 = vector.extract_strided_slice %678 {offsets = [0, 64], sizes = [2, 32], strides = [1, 1]} : vector<2x96xf32> to vector<2x32xf32>
    %687 = math.tanh %685 : vector<2x32xf32>
    %688 = arith.mulf %686, %687 : vector<2x32xf32>
    %cst_131 = arith.constant dense<0.000000e+00> : vector<2x32xf32>
    %689 = tpu.matmul %688, %12, %cst_131 {dimension_numbers = #tpu.dot_dimension_numbers<[1], [0], [0], [1], [0, 0, 1, 1], [], []>} : vector<2x32xf32>, vector<32x32xf32>, vector<2x32xf32> -> vector<2x32xf32>
    %690 = vector.broadcast %13 : vector<1x32xf32> to vector<2x32xf32>
    %691 = arith.addf %689, %690 : vector<2x32xf32>
    %cst_132 = arith.constant dense<0xFF800000> : vector<2xf32>
    %692 = vector.multi_reduction <maximumf>, %691, %cst_132 [1] : vector<2x32xf32> to vector<2xf32>
    %693 = vector.shape_cast %692 : vector<2xf32> to vector<2x1xf32>
    %694 = vector.broadcast %693 : vector<2x1xf32> to vector<2x32xf32>
    %695 = arith.cmpf oeq, %691, %694 : vector<2x32xf32>
    %c32_i32_133 = arith.constant 32 : i32
    %696 = vector.broadcast %c32_i32_133 : i32 to vector<2x32xi32>
    %697 = arith.select %695, %16, %696 : vector<2x32xi1>, vector<2x32xi32>
    %cst_134 = arith.constant dense<2147483647> : vector<2xi32>
    %698 = vector.multi_reduction <minsi>, %697, %cst_134 [1] : vector<2x32xi32> to vector<2xi32>
    %699 = vector.shape_cast %698 : vector<2xi32> to vector<2x1xi32>
    %c5 = arith.constant 5 : index
    %700 = memref.load %arg0[%c5] : memref<8xi32, #tpu.memory_space<smem>>
    %c0_i32_135 = arith.constant 0 : i32
    %701 = arith.cmpi ne, %700, %c0_i32_135 : i32
    %702 = vector.extract_strided_slice %15 {offsets = [0, 5], sizes = [2, 1], strides = [1, 1]} : vector<2x8xi32> to vector<2x1xi32>
    %703 = arith.select %701, %702, %699 : vector<2x1xi32>
    %704 = vector.broadcast %703 : vector<2x1xi32> to vector<2x32xi32>
    %705 = arith.cmpi eq, %16, %704 : vector<2x32xi32>
    %706 = arith.extui %705 : vector<2x32xi1> to vector<2x32xi32>
    %707 = arith.sitofp %706 : vector<2x32xi32> to vector<2x32xf32>
    %cst_136 = arith.constant dense<0.000000e+00> : vector<2x128xf32>
    %708 = tpu.matmul %707, %6, %cst_136 {dimension_numbers = #tpu.dot_dimension_numbers<[1], [0], [0], [1], [0, 0, 1, 1], [], []>} : vector<2x32xf32>, vector<32x128xf32>, vector<2x128xf32> -> vector<2x128xf32>
    %cst_137 = arith.constant dense<0.000000e+00> : vector<2x128xf32>
    %709 = tpu.matmul %667, %7, %cst_137 {dimension_numbers = #tpu.dot_dimension_numbers<[1], [0], [0], [1], [0, 0, 1, 1], [], []>} : vector<2x32xf32>, vector<32x128xf32>, vector<2x128xf32> -> vector<2x128xf32>
    %710 = arith.addf %708, %709 : vector<2x128xf32>
    %711 = vector.broadcast %8 : vector<1x128xf32> to vector<2x128xf32>
    %712 = arith.addf %710, %711 : vector<2x128xf32>
    %713 = vector.extract_strided_slice %712 {offsets = [0, 0], sizes = [2, 96], strides = [1, 1]} : vector<2x128xf32> to vector<2x96xf32>
    %714 = arith.negf %713 : vector<2x96xf32>
    %715 = math.exp %714 : vector<2x96xf32>
    %cst_138 = arith.constant 1.000000e+00 : f32
    %716 = vector.broadcast %cst_138 : f32 to vector<2x96xf32>
    %717 = arith.addf %716, %715 : vector<2x96xf32>
    %718 = arith.divf %716, %717 : vector<2x96xf32>
    %719 = vector.extract_strided_slice %712 {offsets = [0, 96], sizes = [2, 32], strides = [1, 1]} : vector<2x128xf32> to vector<2x32xf32>
    %720 = math.tanh %719 : vector<2x32xf32>
    %721 = vector.extract_strided_slice %718 {offsets = [0, 32], sizes = [2, 32], strides = [1, 1]} : vector<2x96xf32> to vector<2x32xf32>
    %722 = arith.mulf %721, %664 : vector<2x32xf32>
    %723 = vector.extract_strided_slice %718 {offsets = [0, 0], sizes = [2, 32], strides = [1, 1]} : vector<2x96xf32> to vector<2x32xf32>
    %724 = arith.mulf %723, %720 : vector<2x32xf32>
    %725 = arith.addf %722, %724 : vector<2x32xf32>
    %726 = vector.extract_strided_slice %718 {offsets = [0, 64], sizes = [2, 32], strides = [1, 1]} : vector<2x96xf32> to vector<2x32xf32>
    %727 = math.tanh %725 : vector<2x32xf32>
    %728 = arith.mulf %726, %727 : vector<2x32xf32>
    %cst_139 = arith.constant dense<0.000000e+00> : vector<2x128xf32>
    %729 = tpu.matmul %728, %9, %cst_139 {dimension_numbers = #tpu.dot_dimension_numbers<[1], [0], [0], [1], [0, 0, 1, 1], [], []>} : vector<2x32xf32>, vector<32x128xf32>, vector<2x128xf32> -> vector<2x128xf32>
    %cst_140 = arith.constant dense<0.000000e+00> : vector<2x128xf32>
    %730 = tpu.matmul %688, %10, %cst_140 {dimension_numbers = #tpu.dot_dimension_numbers<[1], [0], [0], [1], [0, 0, 1, 1], [], []>} : vector<2x32xf32>, vector<32x128xf32>, vector<2x128xf32> -> vector<2x128xf32>
    %731 = arith.addf %729, %730 : vector<2x128xf32>
    %732 = vector.broadcast %11 : vector<1x128xf32> to vector<2x128xf32>
    %733 = arith.addf %731, %732 : vector<2x128xf32>
    %734 = vector.extract_strided_slice %733 {offsets = [0, 0], sizes = [2, 96], strides = [1, 1]} : vector<2x128xf32> to vector<2x96xf32>
    %735 = arith.negf %734 : vector<2x96xf32>
    %736 = math.exp %735 : vector<2x96xf32>
    %cst_141 = arith.constant 1.000000e+00 : f32
    %737 = vector.broadcast %cst_141 : f32 to vector<2x96xf32>
    %738 = arith.addf %737, %736 : vector<2x96xf32>
    %739 = arith.divf %737, %738 : vector<2x96xf32>
    %740 = vector.extract_strided_slice %733 {offsets = [0, 96], sizes = [2, 32], strides = [1, 1]} : vector<2x128xf32> to vector<2x32xf32>
    %741 = math.tanh %740 : vector<2x32xf32>
    %742 = vector.extract_strided_slice %739 {offsets = [0, 32], sizes = [2, 32], strides = [1, 1]} : vector<2x96xf32> to vector<2x32xf32>
    %743 = arith.mulf %742, %685 : vector<2x32xf32>
    %744 = vector.extract_strided_slice %739 {offsets = [0, 0], sizes = [2, 32], strides = [1, 1]} : vector<2x96xf32> to vector<2x32xf32>
    %745 = arith.mulf %744, %741 : vector<2x32xf32>
    %746 = arith.addf %743, %745 : vector<2x32xf32>
    %747 = vector.extract_strided_slice %739 {offsets = [0, 64], sizes = [2, 32], strides = [1, 1]} : vector<2x96xf32> to vector<2x32xf32>
    %748 = math.tanh %746 : vector<2x32xf32>
    %749 = arith.mulf %747, %748 : vector<2x32xf32>
    %cst_142 = arith.constant dense<0.000000e+00> : vector<2x32xf32>
    %750 = tpu.matmul %749, %12, %cst_142 {dimension_numbers = #tpu.dot_dimension_numbers<[1], [0], [0], [1], [0, 0, 1, 1], [], []>} : vector<2x32xf32>, vector<32x32xf32>, vector<2x32xf32> -> vector<2x32xf32>
    %751 = vector.broadcast %13 : vector<1x32xf32> to vector<2x32xf32>
    %752 = arith.addf %750, %751 : vector<2x32xf32>
    %cst_143 = arith.constant dense<0xFF800000> : vector<2xf32>
    %753 = vector.multi_reduction <maximumf>, %752, %cst_143 [1] : vector<2x32xf32> to vector<2xf32>
    %754 = vector.shape_cast %753 : vector<2xf32> to vector<2x1xf32>
    %755 = vector.broadcast %754 : vector<2x1xf32> to vector<2x32xf32>
    %756 = arith.cmpf oeq, %752, %755 : vector<2x32xf32>
    %c32_i32_144 = arith.constant 32 : i32
    %757 = vector.broadcast %c32_i32_144 : i32 to vector<2x32xi32>
    %758 = arith.select %756, %16, %757 : vector<2x32xi1>, vector<2x32xi32>
    %cst_145 = arith.constant dense<2147483647> : vector<2xi32>
    %759 = vector.multi_reduction <minsi>, %758, %cst_145 [1] : vector<2x32xi32> to vector<2xi32>
    %760 = vector.shape_cast %759 : vector<2xi32> to vector<2x1xi32>
    %c6 = arith.constant 6 : index
    %761 = memref.load %arg0[%c6] : memref<8xi32, #tpu.memory_space<smem>>
    %c0_i32_146 = arith.constant 0 : i32
    %762 = arith.cmpi ne, %761, %c0_i32_146 : i32
    %763 = vector.extract_strided_slice %15 {offsets = [0, 6], sizes = [2, 1], strides = [1, 1]} : vector<2x8xi32> to vector<2x1xi32>
    %764 = arith.select %762, %763, %760 : vector<2x1xi32>
    %765 = vector.broadcast %764 : vector<2x1xi32> to vector<2x32xi32>
    %766 = arith.cmpi eq, %16, %765 : vector<2x32xi32>
    %767 = arith.extui %766 : vector<2x32xi1> to vector<2x32xi32>
    %768 = arith.sitofp %767 : vector<2x32xi32> to vector<2x32xf32>
    %cst_147 = arith.constant dense<0.000000e+00> : vector<2x128xf32>
    %769 = tpu.matmul %768, %6, %cst_147 {dimension_numbers = #tpu.dot_dimension_numbers<[1], [0], [0], [1], [0, 0, 1, 1], [], []>} : vector<2x32xf32>, vector<32x128xf32>, vector<2x128xf32> -> vector<2x128xf32>
    %cst_148 = arith.constant dense<0.000000e+00> : vector<2x128xf32>
    %770 = tpu.matmul %728, %7, %cst_148 {dimension_numbers = #tpu.dot_dimension_numbers<[1], [0], [0], [1], [0, 0, 1, 1], [], []>} : vector<2x32xf32>, vector<32x128xf32>, vector<2x128xf32> -> vector<2x128xf32>
    %771 = arith.addf %769, %770 : vector<2x128xf32>
    %772 = vector.broadcast %8 : vector<1x128xf32> to vector<2x128xf32>
    %773 = arith.addf %771, %772 : vector<2x128xf32>
    %774 = vector.extract_strided_slice %773 {offsets = [0, 0], sizes = [2, 96], strides = [1, 1]} : vector<2x128xf32> to vector<2x96xf32>
    %775 = arith.negf %774 : vector<2x96xf32>
    %776 = math.exp %775 : vector<2x96xf32>
    %cst_149 = arith.constant 1.000000e+00 : f32
    %777 = vector.broadcast %cst_149 : f32 to vector<2x96xf32>
    %778 = arith.addf %777, %776 : vector<2x96xf32>
    %779 = arith.divf %777, %778 : vector<2x96xf32>
    %780 = vector.extract_strided_slice %773 {offsets = [0, 96], sizes = [2, 32], strides = [1, 1]} : vector<2x128xf32> to vector<2x32xf32>
    %781 = math.tanh %780 : vector<2x32xf32>
    %782 = vector.extract_strided_slice %779 {offsets = [0, 32], sizes = [2, 32], strides = [1, 1]} : vector<2x96xf32> to vector<2x32xf32>
    %783 = arith.mulf %782, %725 : vector<2x32xf32>
    %784 = vector.extract_strided_slice %779 {offsets = [0, 0], sizes = [2, 32], strides = [1, 1]} : vector<2x96xf32> to vector<2x32xf32>
    %785 = arith.mulf %784, %781 : vector<2x32xf32>
    %786 = arith.addf %783, %785 : vector<2x32xf32>
    %787 = vector.extract_strided_slice %779 {offsets = [0, 64], sizes = [2, 32], strides = [1, 1]} : vector<2x96xf32> to vector<2x32xf32>
    %788 = math.tanh %786 : vector<2x32xf32>
    %789 = arith.mulf %787, %788 : vector<2x32xf32>
    %cst_150 = arith.constant dense<0.000000e+00> : vector<2x128xf32>
    %790 = tpu.matmul %789, %9, %cst_150 {dimension_numbers = #tpu.dot_dimension_numbers<[1], [0], [0], [1], [0, 0, 1, 1], [], []>} : vector<2x32xf32>, vector<32x128xf32>, vector<2x128xf32> -> vector<2x128xf32>
    %cst_151 = arith.constant dense<0.000000e+00> : vector<2x128xf32>
    %791 = tpu.matmul %749, %10, %cst_151 {dimension_numbers = #tpu.dot_dimension_numbers<[1], [0], [0], [1], [0, 0, 1, 1], [], []>} : vector<2x32xf32>, vector<32x128xf32>, vector<2x128xf32> -> vector<2x128xf32>
    %792 = arith.addf %790, %791 : vector<2x128xf32>
    %793 = vector.broadcast %11 : vector<1x128xf32> to vector<2x128xf32>
    %794 = arith.addf %792, %793 : vector<2x128xf32>
    %795 = vector.extract_strided_slice %794 {offsets = [0, 0], sizes = [2, 96], strides = [1, 1]} : vector<2x128xf32> to vector<2x96xf32>
    %796 = arith.negf %795 : vector<2x96xf32>
    %797 = math.exp %796 : vector<2x96xf32>
    %cst_152 = arith.constant 1.000000e+00 : f32
    %798 = vector.broadcast %cst_152 : f32 to vector<2x96xf32>
    %799 = arith.addf %798, %797 : vector<2x96xf32>
    %800 = arith.divf %798, %799 : vector<2x96xf32>
    %801 = vector.extract_strided_slice %794 {offsets = [0, 96], sizes = [2, 32], strides = [1, 1]} : vector<2x128xf32> to vector<2x32xf32>
    %802 = math.tanh %801 : vector<2x32xf32>
    %803 = vector.extract_strided_slice %800 {offsets = [0, 32], sizes = [2, 32], strides = [1, 1]} : vector<2x96xf32> to vector<2x32xf32>
    %804 = arith.mulf %803, %746 : vector<2x32xf32>
    %805 = vector.extract_strided_slice %800 {offsets = [0, 0], sizes = [2, 32], strides = [1, 1]} : vector<2x96xf32> to vector<2x32xf32>
    %806 = arith.mulf %805, %802 : vector<2x32xf32>
    %807 = arith.addf %804, %806 : vector<2x32xf32>
    %808 = vector.extract_strided_slice %800 {offsets = [0, 64], sizes = [2, 32], strides = [1, 1]} : vector<2x96xf32> to vector<2x32xf32>
    %809 = math.tanh %807 : vector<2x32xf32>
    %810 = arith.mulf %808, %809 : vector<2x32xf32>
    %cst_153 = arith.constant dense<0.000000e+00> : vector<2x32xf32>
    %811 = tpu.matmul %810, %12, %cst_153 {dimension_numbers = #tpu.dot_dimension_numbers<[1], [0], [0], [1], [0, 0, 1, 1], [], []>} : vector<2x32xf32>, vector<32x32xf32>, vector<2x32xf32> -> vector<2x32xf32>
    %812 = vector.broadcast %13 : vector<1x32xf32> to vector<2x32xf32>
    %813 = arith.addf %811, %812 : vector<2x32xf32>
    %814 = tpu.concatenate %397, %447, %508, %569, %630, %691, %752, %813 in 1 : vector<2x32xf32>, vector<2x32xf32>, vector<2x32xf32>, vector<2x32xf32>, vector<2x32xf32>, vector<2x32xf32>, vector<2x32xf32>, vector<2x32xf32> -> vector<2x256xf32>
    %c0_154 = arith.constant 0 : index
    %c0_155 = arith.constant 0 : index
    %815 = vector.load %arg17[%c0_154, %c0_155] : memref<2x256xf32, #tpu.memory_space<vmem>>, vector<2x256xf32>
    tpu.vector_store %arg17[%c0_154, %c0_155], %814 {strides = array<i32>} : memref<2x256xf32, #tpu.memory_space<vmem>>, vector<2x256xf32>,
    return
  }
}

</mosaic_0001>

<bundles_post_ra>
// kernel: tpu_custom_call.1
= control target key start
LH: loop header
LB: loop body
LE: loop exit
PB: predicated region body
PF: predicated region fallthrough
CT: control target
= control target key end

     0   :  { %s5051_s0 = inlined_call_operand.hbm [shape: s32[8], index: 0, kind: input, shape index: {}]   ;;  %s5052_s1 = inlined_call_operand.hbm [shape: s32[2,8], index: 1, kind: input, shape index: {}]   ;;  %s5053_s2 = inlined_call_operand.hbm [shape: s32[2,8], index: 2, kind: input, shape index: {}]   ;;  %s5054_s3 = inlined_call_operand.hbm [shape: f32[32,128], index: 3, kind: input, shape index: {}]   ;;  %s5055_s4 = inlined_call_operand.hbm [shape: f32[32,128], index: 4, kind: input, shape index: {}]   ;;  %s5056_s5 = inlined_call_operand.vmem [shape: f32[1,128], index: 5, kind: input, shape index: {}]   ;;  %s5057_s6 = inlined_call_operand.hbm [shape: f32[32,128], index: 6, kind: input, shape index: {}]   ;;  %s5058_s7 = inlined_call_operand.hbm [shape: f32[32,128], index: 7, kind: input, shape index: {}]   ;;  %s5059_s8 = inlined_call_operand.vmem [shape: f32[1,128], index: 8, kind: input, shape index: {}]   ;;  %s5060_s9 = inlined_call_operand.hbm [shape: f32[32,128], index: 9, kind: input, shape index: {}]   ;;  %s5061_s10 = inlined_call_operand.hbm [shape: f32[32,128], index: 10, kind: input, shape index: {}]   ;;  %s5062_s11 = inlined_call_operand.vmem [shape: f32[1,128], index: 11, kind: input, shape index: {}]   ;;  %s5063_s12 = inlined_call_operand.hbm [shape: f32[32,128], index: 12, kind: input, shape index: {}]   ;;  %s5064_s13 = inlined_call_operand.hbm [shape: f32[32,128], index: 13, kind: input, shape index: {}]   ;;  %s5065_s14 = inlined_call_operand.vmem [shape: f32[1,128], index: 14, kind: input, shape index: {}]   ;;  %s5066_s15 = inlined_call_operand.hbm [shape: f32[32,32], index: 15, kind: input, shape index: {}]   ;;  %s5067_s16 = inlined_call_operand.vmem [shape: f32[1,32], index: 16, kind: input, shape index: {}]   ;;  %s5068_s17 = inlined_call_operand.hbm [shape: f32[2,256], index: 17, kind: output, shape index: {}]  }
   0x1   :  { %5069 = sst [smem:[#allocation31_spill]] %s5051_s0 }
   0x2   :  { %5070 = sst [smem:[#allocation32_spill]] %s5052_s1 }
   0x3   :  { %22 = vsyncpa [#allocation5], 0 }
   0x4   :  { %23 = vsyncpa [#allocation3], 0 }
   0x5   :  { %24 = vsyncpa [#allocation8], 0 }
   0x6   :  { %25 = vsyncpa [#allocation11], 0 }
   0x7   :  { %26 = vsyncpa [#allocation14], 0 }
   0x8   :  { %27 = vsyncpa [#allocation17], 0 }
   0x9   :  { %28 = vsyncpa [#allocation20], 0  ;;  %s55_s26 = sshll.u32 %s5053_s2, 4  ;;  %s56_s26 = int_to_ptr.hbm [resolvable:$true] %s55_s26 }
   0xa   :  { %29 = vsyncpa [#allocation4], 0  ;;  %s4047_s27 = smov [#allocation7]   ;;  %s78_s30 = sshll.u32 %s5055_s4, 4  ;;  %s79_s30 = int_to_ptr.hbm [resolvable:$true] %s78_s30 }
   0xb   :  { %s57_s28 = sshll.u32 %s4047_s27, 4  ;;  %s4048_s18 = smov [#allocation10]   ;;  %s58_s28 = int_to_ptr.vmem [resolvable:$true] %s57_s28 }
   0xc   :  { %60 = dma.hbm_to_vmem [thread:$0]  %s56_s26, 32, %s58_s28, [#allocation8]  }
   0xd   :  { %s80_s19 = sshll.u32 %s4048_s18, 4  ;;  %s106_s21 = sshll.u32 %s5058_s7, 4  ;;  %s81_s19 = int_to_ptr.vmem [resolvable:$true] %s80_s19  ;;  %s107_s21 = int_to_ptr.hbm [resolvable:$true] %s106_s21 }
   0xe   :  { %s4049_s2 = smov 128   ;;  %s4050_s22 = smov 8  }
   0xf   :  { %86 = dma.hbm_to_vmem [thread:$0]  %s79_s30, 512, %s81_s19, [#allocation11], %s4049_s2, %s4049_s2, %s4050_s22  }
  0x10   :  { %s134_s25 = sshll.u32 %s5061_s10, 4  ;;  %s4051_s4 = smov [#allocation13]   ;;  %s135_s25 = int_to_ptr.hbm [resolvable:$true] %s134_s25 }
  0x11   :  { %s108_s26 = sshll.u32 %s4051_s4, 4  ;;  %s4052_s7 = smov [#allocation16]   ;;  %s109_s26 = int_to_ptr.vmem [resolvable:$true] %s108_s26 }
  0x12   :  { %114 = dma.hbm_to_vmem [thread:$0]  %s107_s21, 512, %s109_s26, [#allocation14], %s4049_s2, %s4049_s2, %s4050_s22  }
  0x13   :  { %s136_s27 = sshll.u32 %s4052_s7, 4  ;;  %s162_s0 = sshll.u32 %s5064_s13, 4  ;;  %s137_s27 = int_to_ptr.vmem [resolvable:$true] %s136_s27  ;;  %s163_s0 = int_to_ptr.hbm [resolvable:$true] %s162_s0 }
  0x14   :  { %142 = dma.hbm_to_vmem [thread:$0]  %s135_s25, 512, %s137_s27, [#allocation17], %s4049_s2, %s4049_s2, %s4050_s22  }
  0x15   :  { %s5071_s18 = sld [smem:[#allocation31_spill]]  ;;  %s4053_s1 = smov [#allocation19]  }
  0x16   :  { %s164_s20 = sshll.u32 %s4053_s1, 4  ;;  %s4054_s21 = smov [#allocation2]   ;;  %s165_s20 = int_to_ptr.vmem [resolvable:$true] %s164_s20 }
  0x17   :  { %170 = dma.hbm_to_vmem [thread:$0]  %s163_s0, 512, %s165_s20, [#allocation20], %s4049_s2, %s4049_s2, %s4050_s22  }
  0x18   :  { %s5072_s24 = sld [smem:[#allocation32_spill]]  ;;  %s4055_s25 = smov [#allocation6]  }
  0x19   :  { %s46_s26 = sshll.u32 %s4055_s25, 4  ;;  %s65_s28 = sshll.u32 %s5054_s3, 4  ;;  %s47_s26 = int_to_ptr.vmem [resolvable:$true] %s46_s26  ;;  %s66_s28 = int_to_ptr.hbm [resolvable:$true] %s65_s28 }
  0x1a   :  { %s4056_s29 = smov [#allocation9]   ;;  %s121_s20 = sshll.u32 %s5060_s9, 4  ;;  %s122_s20 = int_to_ptr.hbm [resolvable:$true] %s121_s20 }
  0x1b   :  { %s35_s19 = sshll.u32 %s5071_s18, 4  ;;  %s67_s10 = sshll.u32 %s4056_s29, 4  ;;  %s36_s19 = int_to_ptr.hbm [resolvable:$true] %s35_s19  ;;  %s68_s10 = int_to_ptr.vmem [resolvable:$true] %s67_s10 }
  0x1c   :  { %38 = dma.hbm_to_smem %s36_s19, 16, %s4054_s21, [#allocation5]  }
  0x1d   :  { %s93_s18 = sshll.u32 %s5057_s6, 4  ;;  %s4057_s21 = smov [#allocation12]   ;;  %s94_s18 = int_to_ptr.hbm [resolvable:$true] %s93_s18 }
  0x1e   :  { %s44_s4 = sshll.u32 %s5072_s24, 4  ;;  %s95_s3 = sshll.u32 %s4057_s21, 4  ;;  %s45_s4 = int_to_ptr.hbm [resolvable:$true] %s44_s4  ;;  %s96_s3 = int_to_ptr.vmem [resolvable:$true] %s95_s3 }
  0x1f   :  { %49 = dma.hbm_to_vmem [thread:$0]  %s45_s4, 32, %s47_s26, [#allocation3]  }
  0x20   :  { %73 = dma.hbm_to_vmem [thread:$0]  %s66_s28, 512, %s68_s10, [#allocation8], %s4049_s2, %s4049_s2, %s4050_s22  }
  0x21   :  { %101 = dma.hbm_to_vmem [thread:$0]  %s94_s18, 512, %s96_s3, [#allocation11], %s4049_s2, %s4049_s2, %s4050_s22  }
  0x22   :  { %s4058_s13 = smov [#allocation15]   ;;  %s149_s4 = sshll.u32 %s5063_s12, 4  ;;  %s150_s4 = int_to_ptr.hbm [resolvable:$true] %s149_s4 }
  0x23   :  { %s123_s6 = sshll.u32 %s4058_s13, 4  ;;  %s177_s26 = sshll.u32 %s5066_s15, 4  ;;  %s124_s6 = int_to_ptr.vmem [resolvable:$true] %s123_s6  ;;  %s178_s26 = int_to_ptr.hbm [resolvable:$true] %s177_s26 }
  0x24   :  { %129 = dma.hbm_to_vmem [thread:$0]  %s122_s20, 512, %s124_s6, [#allocation14], %s4049_s2, %s4049_s2, %s4050_s22  }
  0x25   :  { %s4059_s7 = smov [#allocation18]   ;;  %s4060_s28 = smov [#allocation21]  }
  0x26   :  { %s151_s27 = sshll.u32 %s4059_s7, 4  ;;  %s179_s12 = sshll.u32 %s4060_s28, 4  ;;  %s152_s27 = int_to_ptr.vmem [resolvable:$true] %s151_s27  ;;  %s180_s12 = int_to_ptr.vmem [resolvable:$true] %s179_s12 }
  0x27   :  { %157 = dma.hbm_to_vmem [thread:$0]  %s150_s4, 512, %s152_s27, [#allocation17], %s4049_s2, %s4049_s2, %s4050_s22  }
  0x28   :  { %185 = dma.hbm_to_vmem [thread:$0]  %s178_s26, 512, %s180_s12, [#allocation20], %s4049_s2, %s4049_s2, %s4050_s22  }
  0x29   :  { %4031 = dma.done.wait [#allocation5], 16  }
  0x2a   :  { %4032 = vsyncadd [#allocation5], 4294967280 }
  0x2b   :  { %4033 = dma.done.wait [#allocation3], 32  }
  0x2c   :  { %4034 = vsyncadd [#allocation3], 4294967264 }
  0x2d   :  { %4035 = dma.done.wait [#allocation8], 544  }
  0x2e   :  { %4036 = vsyncadd [#allocation8], 4294966752 }
  0x2f   :  { %4037 = dma.done.wait [#allocation11], 1024  }
  0x30   :  { %4038 = vsyncadd [#allocation11], 4294966272 }
  0x31   :  { %4039 = dma.done.wait [#allocation14], 1024  }
  0x32   :  { %4040 = vsyncadd [#allocation14], 4294966272 }
  0x33   :  { %4041 = dma.done.wait [#allocation17], 1024  }
  0x34   :  { %4042 = vsyncadd [#allocation17], 4294966272 }
  0x35   :  { %4043 = dma.done.wait [#allocation20], 1024  }
  0x36   :  { %4044 = vsyncadd [#allocation20], 4294966272 }
  0x37   :  { %236 = sfence }
  0x38   :  { %v4227_v0 = vld [vmem:[#allocation6] sm:$0x3]  ;;  %v4061_v3 = vmov 0   ;;  %v4235_v4 = vld [vmem:[#allocation10 + $0x10] sm:$0xff]  ;;  %v4243_v6 = vld [vmem:[#allocation10 + $0x8] sm:$0xff]  ;;  %v4062_v10 = vmov 0.0   ;;  %v280_v11 = vlaneseq }
  0x39   :  { %v4229_v1 = vld [vmem:[#allocation10 + $0x18] sm:$0xff]  ;;  %3428 = vset.pattern.permute.xlu0 %v4061_v3  ;;  %v4237_v5 = vld [vmem:[#allocation9 + $0x10] sm:$0xff]  ;;  %v4245_v7 = vld [vmem:[#allocation9 + $0x8] sm:$0xff]  ;;  %vm288_vm0 = vcmask 261120   ;;  %s4063_s22 = smov 32   ;;  %v4064_v40 = vmov 1  }
  0x3a   :  { %v4231_v2 = vld [vmem:[#allocation9 + $0x18] sm:$0xff]  ;;  %304 = vmatpush.msra.mxu0 %v4229_v1  ;;  %283 = vperm.xlu0 %3428, %v4227_v0   ;;  %v4249_v8 = vld [vmem:[#allocation10] sm:$0xff]  ;;  %v4268_v12 = vand.u32 127, %v280_v11  ;;  %v4294_v43 = vld [vmem:[#allocation13 + $0x10] sm:$0xff]  ;;  %s4065_s29 = smov 64   ;;  %s3347_s6 = sld [smem:[#allocation2 + $0x1]] }
  0x3b   :  { %327 = vmatpush.msra.mxu1 %v4231_v2  ;;  %v4251_v9 = vld [vmem:[#allocation9] sm:$0xff]  ;;  %v4280_v16 = vld [vmem:[%s5056_s5] ss:$0 sm:$0xff]  ;;  %3429 = vset.pattern.permute.xlu2 %v4064_v40  ;;  %v4298_v44 = vld [vmem:[#allocation12 + $0x10] sm:$0xff]  ;;  %s3356_s24 = sld [smem:[#allocation2 + $0x2]]  ;;  %s4072_s0 = smov 96  }
  0x3c   :  { %305 = vmatpush.msra.mxu0 %v4235_v4  ;;  %v4290_v41 = vld [vmem:[#allocation13 + $0x18] sm:$0xff]  ;;  %v4300_v45 = vld [vmem:[#allocation13 + $0x8] sm:$0xff]  ;;  %v4306_v47 = vld [vmem:[#allocation13] sm:$0xff]  ;;  %s3365_s9 = sld [smem:[#allocation2 + $0x3]]  ;;  %s3269_s19 = sshll.u32 %s5068_s17, 4  ;;  %s3270_s19 = int_to_ptr.hbm [resolvable:$true] %s3269_s19 }
  0x3d   :  { %328 = vmatpush.msra.mxu1 %v4237_v5  ;;  %v4292_v42 = vld [vmem:[#allocation12 + $0x18] sm:$0xff]  ;;  %388 = vmatpush.msra.mxu2 %v4290_v41  ;;  %v4302_v46 = vld [vmem:[#allocation12 + $0x8] sm:$0xff]  ;;  %v4308_v48 = vld [vmem:[#allocation12] sm:$0xff]  ;;  %s3374_s26 = sld [smem:[#allocation2 + $0x4]] }
  0x3e   :  { %306 = vmatpush.msra.mxu0 %v4243_v6  ;;  %413 = vmatpush.msra.mxu3 %v4292_v42  ;;  %v4349_v55 = vld [vmem:[%s5059_s8] ss:$0 sm:$0xff]  ;;  %s3392_s10 = sld [smem:[#allocation2 + $0x6]] }
  0x3f   :  { %329 = vmatpush.msra.mxu1 %v4245_v7  ;;  %389 = vmatpush.msra.mxu2 %v4294_v43 }
  0x40   :  { %307 = vmatpush.msra.mxu0 %v4249_v8  ;;  %414 = vmatpush.msra.mxu3 %v4298_v44  ;;  %p1918_p0 = scmp.ne.s32.totalorder %s3347_s6, 0 }
  0x41   :  { %330 = vmatpush.msra.mxu1 %v4251_v9  ;;  %308 = vmatmul.f32.vlgmr.msra.gmra.mxu0 %v4062_v10  ;;  %p2139_p1 = scmp.ne.s32.totalorder %s3356_s24, 0 }
  0x42   :  { %480 = vmatpush.msrb.mxu0 %v4229_v1  ;;  %390 = vmatpush.msra.mxu2 %v4300_v45  ;;  %s1919_s23 = scalar_select %p1918_p0, 1, 0 }
  0x43   :  { %503 = vmatpush.msrb.mxu1 %v4231_v2  ;;  %415 = vmatpush.msra.mxu3 %v4302_v46  ;;  %s2140_s4 = scalar_select %p2139_p1, 1, 0 }
  0x44   :  { %481 = vmatpush.msrb.mxu0 %v4235_v4  ;;  %391 = vmatpush.msra.mxu2 %v4306_v47  ;;  %p2360_p2 = scmp.ne.s32.totalorder %s3365_s9, 0  ;;  %p2581_p3 = scmp.ne.s32.totalorder %s3374_s26, 0 }
  0x45   :  { %504 = vmatpush.msrb.mxu1 %v4237_v5  ;;  %416 = vmatpush.msra.mxu3 %v4308_v48  ;;  %p3023_p5 = scmp.ne.s32.totalorder %s3392_s10, 0 }
  0x46   :  { %482 = vmatpush.msrb.mxu0 %v4243_v6  ;;  %392 = vmatmul.f32.vlgmr.msra.gmra.mxu2 %v4062_v10  ;;  %s2361_s25 = scalar_select %p2360_p2, 1, 0 }
  0x47   :  { %505 = vmatpush.msrb.mxu1 %v4245_v7  ;;  %591 = vmatpush.msrb.mxu3 %v4292_v42  ;;  %s2582_s7 = scalar_select %p2581_p3, 1, 0 }
  0x48   :  { %483 = vmatpush.msrb.mxu0 %v4249_v8  ;;  %566 = vmatpush.msrb.mxu2 %v4290_v41  ;;  %s3024_s30 = scalar_select %p3023_p5, 1, 0 }
  0x49   :  { %506 = vmatpush.msrb.mxu1 %v4251_v9  ;;  %592 = vmatpush.msrb.mxu3 %v4298_v44 }
  0x4a   :  { %655 = vmatpush.msra.mxu0 %v4229_v1  ;;  %567 = vmatpush.msrb.mxu2 %v4294_v43 }
  0x4b   :  { %593 = vmatpush.msrb.mxu3 %v4302_v46 }
  0x4c   :  { %656 = vmatpush.msra.mxu0 %v4235_v4  ;;  %568 = vmatpush.msrb.mxu2 %v4300_v45 }
  0x4d   :  { %594 = vmatpush.msrb.mxu3 %v4308_v48 }
  0x4e   :  { %657 = vmatpush.msra.mxu0 %v4243_v6  ;;  %569 = vmatpush.msrb.mxu2 %v4306_v47 }
  0x50   :  { %658 = vmatpush.msra.mxu0 %v4249_v8  ;;  %741 = vmatpush.msra.mxu2 %v4290_v41 }
  0x52   :  { %742 = vmatpush.msra.mxu2 %v4294_v43 }
  0x54   :  { %743 = vmatpush.msra.mxu2 %v4300_v45 }
  0x56   :  { %744 = vmatpush.msra.mxu2 %v4306_v47 }
  0xac   :  { %v284_v13 = vpop.permute.xlu0 %283 }
  0xad   :  { %vm285_vm1 = vcmp.eq.s32.totalorder %v4268_v12, %v284_v13 }
  0xae   :  { %v3285_v14 = vsel %vm285_vm1, 1.0, %v4062_v10 }
  0xaf   :  { %3286 = vmatmul.msk.f32.vlgmr.msra.gmra.mxu1 %vm288_vm0, %v3285_v14 }
  0xb0   :  { %678 = vmatpush.msra.mxu1 %v4231_v2 }
  0xb2   :  { %679 = vmatpush.msra.mxu1 %v4237_v5 }
  0xb4   :  { %680 = vmatpush.msra.mxu1 %v4245_v7 }
  0xb6   :  { %681 = vmatpush.msra.mxu1 %v4251_v9 }
  0xbe   :  { %v309_v15 = vpop.f32.mrf.mxu0 }
  0xc9   :  { %v393_v54 = vpop.f32.mrf.mxu2 }
 0x12c   :  { %v332_v17 = vpop.f32.mrf.mxu1 }
 0x12d   :  { %v333_v18 = vadd.f32 %v332_v17, %v309_v15 }
 0x12f   :  { %v338_v19 = vadd.f32 %v4280_v16, %v333_v18 }
 0x131   :  { %3448 = vtanh.f32 %v338_v19  ;;  %v3287_v21 = vmul.f32 -1.442695, %v338_v19 }
 0x133   :  { %3450 = vpow2.f32 %v3287_v21 }
 0x137   :  { %v3449_v20 = vpop.eup %3448 }
 0x138   :  { %361 = vrot.lane.b32.xlu0 %v3449_v20, %s4063_s22 }
 0x139   :  { %v3451_v22 = vpop.eup %3450 }
 0x13a   :  { %v342_v23 = vadd.f32 1.0, %v3451_v22 }
 0x13c   :  { %3452 = vrcp.f32 %v342_v23  ;;  %v354_v29 = vand.u32 2147483648, %v342_v23  ;;  %vm348_vm3 = vweird.f32 %v342_v23  ;;  %v352_v30 = vand.u32 2147483647, %v342_v23 }
 0x13e   :  { %v355_v32 = vor.u32 1.1754944e-38, %v354_v29  ;;  %vm353_vm5 = vcmp.eq.f32.partialorder %v352_v30, 8.507059e+37 }
 0x142   :  { %v3453_v24 = vpop.eup %3452 }
 0x143   :  { %v344_v25 = vmul.f32 %v3453_v24, %v342_v23  ;;  %vm349_vm2 = vweird.f32 %v3453_v24 }
 0x144   :  { %vm350_vm4 = vmor %vm348_vm3, %vm349_vm2 }
 0x145   :  { %v345_v26 = vsub.f32 1.0, %v344_v25 }
 0x147   :  { %v346_v27 = vmul.f32 %v3453_v24, %v345_v26 }
 0x149   :  { %v347_v28 = vadd.f32 %v3453_v24, %v346_v27 }
 0x14b   :  { %v351_v31 = vsel %vm350_vm4, %v3453_v24, %v347_v28 }
 0x14c   :  { %v356_v34 = vsel %vm353_vm5, %v355_v32, %v351_v31 }
 0x14d   :  { %v359_v36 = vmul.f32 0.0, %v356_v34 }
 0x1aa   :  { %v362_v33 = vpop.permute.xlu0 %361 }
 0x1ab   :  { %v364_v35 = vmul.f32 %v362_v33, %v356_v34 }
 0x1ad   :  { %366 = vrot.lane.b32.xlu1 %v364_v35, %s4063_s22 }
 0x21f   :  { %v367_v37 = vpop.permute.xlu1 %366 }
 0x220   :  { %v4285_v38 = vadd.f32 %v367_v37, %v359_v36 }
 0x222   :  { %3454 = vtanh.f32 %v4285_v38 }
 0x228   :  { %v3455_v39 = vpop.eup %3454 }
 0x229   :  { %372 = vrot.lane.b32.xlu1 %v3455_v39, %s4063_s22 }
 0x29b   :  { %v373_v49 = vpop.permute.xlu1 %372 }
 0x29c   :  { %v375_v50 = vmul.f32 %v373_v49, %v356_v34 }
 0x29e   :  { %397 = vrot.lane.b32.xlu2 %v375_v50, %s4065_s29 }
 0x2a6   :  { %463 = vperm.xlu2 %3429, %v4227_v0  }
 0x2f8   :  { %v398_v51 = vpop.permute.xlu2 %397 }
 0x2f9   :  { %3288 = vmatmul.msk.f32.vlgmr.msra.gmra.mxu3 %vm288_vm0, %v398_v51  ;;  %3291 = vmatmul.msk.f32.vlgmr.msrb.gmra.mxu0 %vm288_vm0, %v398_v51 }
 0x2fa   :  { %766 = vmatpush.msra.mxu3 %v4292_v42  ;;  %830 = vmatpush.msrb.mxu0 %v4229_v1 }
 0x2fc   :  { %767 = vmatpush.msra.mxu3 %v4298_v44  ;;  %831 = vmatpush.msrb.mxu0 %v4235_v4 }
 0x2fe   :  { %768 = vmatpush.msra.mxu3 %v4302_v46  ;;  %832 = vmatpush.msrb.mxu0 %v4243_v6 }
 0x300   :  { %v464_v52 = vpop.permute.xlu2 %463  ;;  %769 = vmatpush.msra.mxu3 %v4308_v48  ;;  %833 = vmatpush.msrb.mxu0 %v4249_v8 }
 0x301   :  { %vm465_vm6 = vcmp.eq.s32.totalorder %v4268_v12, %v464_v52 }
 0x302   :  { %v3290_v53 = vsel %vm465_vm6, 1.0, %v4062_v10 }
 0x303   :  { %3292 = vmatmul.msk.f32.vlgmr.msrb.gmra.mxu1 %vm288_vm0, %v3290_v53 }
 0x304   :  { %853 = vmatpush.msrb.mxu1 %v4231_v2 }
 0x306   :  { %854 = vmatpush.msrb.mxu1 %v4237_v5 }
 0x308   :  { %855 = vmatpush.msrb.mxu1 %v4245_v7 }
 0x30a   :  { %856 = vmatpush.msrb.mxu1 %v4251_v9 }
 0x376   :  { %v485_v59 = vpop.f32.mrf.mxu0 }
 0x37c   :  { %v418_v56 = vpop.f32.mrf.mxu3 }
 0x37d   :  { %v419_v57 = vadd.f32 %v418_v56, %v393_v54 }
 0x37f   :  { %v424_v58 = vadd.f32 %v4349_v55, %v419_v57 }
 0x380   :  { %v508_v60 = vpop.f32.mrf.mxu1 }
 0x381   :  { %3456 = vtanh.f32 %v424_v58  ;;  %v509_v61 = vadd.f32 %v508_v60, %v485_v59  ;;  %v3289_v13 = vmul.f32 -1.442695, %v424_v58 }
 0x383   :  { %v511_v62 = vadd.f32 %v4280_v16, %v509_v61 }
 0x385   :  { %3458 = vtanh.f32 %v511_v62  ;;  %v3293_v14 = vmul.f32 -1.442695, %v511_v62 }
 0x386   :  { %3460 = vpow2.f32 %v3289_v13 }
 0x387   :  { %v3457_v63 = vpop.eup %3456  ;;  %3462 = vpow2.f32 %v3293_v14 }
 0x388   :  { %447 = vrot.lane.b32.xlu0 %v3457_v63, %s4063_s22  ;;  %v4066_v63 = vmov 2  }
 0x389   :  { %3430 = vset.pattern.permute.xlu2 %v4066_v63  ;;  %3438 = vset.pattern.permute.xlu0 %v4066_v63 }
 0x38b   :  { %v3459_v11 = vpop.eup %3458 }
 0x38c   :  { %534 = vrot.lane.b32.xlu1 %v3459_v11, %s4063_s22  ;;  %v3461_v15 = vpop.eup %3460 }
 0x38d   :  { %v428_v17 = vadd.f32 1.0, %v3461_v15  ;;  %v3463_v18 = vpop.eup %3462 }
 0x38e   :  { %v515_v19 = vadd.f32 1.0, %v3463_v18 }
 0x38f   :  { %3464 = vrcp.f32 %v428_v17  ;;  %v440_v29 = vand.u32 2147483648, %v428_v17  ;;  %vm434_vm8 = vweird.f32 %v428_v17  ;;  %v438_v30 = vand.u32 2147483647, %v428_v17 }
 0x390   :  { %3466 = vrcp.f32 %v515_v19  ;;  %v527_v34 = vand.u32 2147483648, %v515_v19  ;;  %vm521_vm12 = vweird.f32 %v515_v19  ;;  %v525_v35 = vand.u32 2147483647, %v515_v19 }
 0x391   :  { %v441_v33 = vor.u32 1.1754944e-38, %v440_v29  ;;  %vm439_vm11 = vcmp.eq.f32.partialorder %v438_v30, 8.507059e+37 }
 0x392   :  { %v528_v50 = vor.u32 1.1754944e-38, %v527_v34  ;;  %vm526_vm14 = vcmp.eq.f32.partialorder %v525_v35, 8.507059e+37 }
 0x395   :  { %v3465_v20 = vpop.eup %3464 }
 0x396   :  { %v430_v21 = vmul.f32 %v3465_v20, %v428_v17  ;;  %v3467_v22 = vpop.eup %3466  ;;  %vm435_vm7 = vweird.f32 %v3465_v20 }
 0x397   :  { %v517_v24 = vmul.f32 %v3467_v22, %v515_v19  ;;  %vm436_vm9 = vmor %vm434_vm8, %vm435_vm7  ;;  %vm522_vm10 = vweird.f32 %v3467_v22 }
 0x398   :  { %v431_v23 = vsub.f32 1.0, %v430_v21  ;;  %vm523_vm13 = vmor %vm521_vm12, %vm522_vm10 }
 0x399   :  { %v518_v26 = vsub.f32 1.0, %v517_v24 }
 0x39a   :  { %v432_v25 = vmul.f32 %v3465_v20, %v431_v23 }
 0x39b   :  { %v519_v28 = vmul.f32 %v3467_v22, %v518_v26 }
 0x39c   :  { %v433_v27 = vadd.f32 %v3465_v20, %v432_v25 }
 0x39d   :  { %v520_v32 = vadd.f32 %v3467_v22, %v519_v28 }
 0x39e   :  { %v437_v31 = vsel %vm436_vm9, %v3465_v20, %v433_v27 }
 0x39f   :  { %v442_v37 = vsel %vm439_vm11, %v441_v33, %v437_v31  ;;  %v524_v49 = vsel %vm523_vm13, %v3467_v22, %v520_v32 }
 0x3a0   :  { %v529_v52 = vsel %vm526_vm14, %v528_v50, %v524_v49  ;;  %v445_v54 = vmul.f32 0.0, %v442_v37 }
 0x3a1   :  { %v532_v59 = vmul.f32 %v529_v52, %v4285_v38 }
 0x3fa   :  { %v448_v36 = vpop.permute.xlu0 %447 }
 0x3fb   :  { %v450_v39 = vmul.f32 %v448_v36, %v442_v37 }
 0x3fd   :  { %452 = vrot.lane.b32.xlu2 %v450_v39, %s4063_s22 }
 0x3fe   :  { %v535_v51 = vpop.permute.xlu1 %534 }
 0x3ff   :  { %v537_v53 = vmul.f32 %v535_v51, %v529_v52 }
 0x401   :  { %539 = vrot.lane.b32.xlu0 %v537_v53, %s4063_s22 }
 0x457   :  { %v453_v56 = vpop.permute.xlu2 %452 }
 0x458   :  { %v4357_v57 = vadd.f32 %v453_v56, %v445_v54 }
 0x45a   :  { %3468 = vtanh.f32 %v4357_v57 }
 0x460   :  { %v3469_v58 = vpop.eup %3468 }
 0x461   :  { %458 = vrot.lane.b32.xlu1 %v3469_v58, %s4063_s22 }
 0x473   :  { %v540_v60 = vpop.permute.xlu0 %539 }
 0x474   :  { %v4362_v61 = vadd.f32 %v540_v60, %v532_v59 }
 0x476   :  { %3470 = vtanh.f32 %v4362_v61 }
 0x47c   :  { %v3471_v62 = vpop.eup %3470 }
 0x47d   :  { %545 = vrot.lane.b32.xlu2 %v3471_v62, %s4063_s22 }
 0x485   :  { %638 = vperm.xlu2 %3430, %v4227_v0  }
 0x4d3   :  { %v459_v11 = vpop.permute.xlu1 %458 }
 0x4d4   :  { %v461_v13 = vmul.f32 %v459_v11, %v442_v37 }
 0x4d6   :  { %550 = vrot.lane.b32.xlu0 %v461_v13, %s4065_s29 }
 0x4d7   :  { %v546_v14 = vpop.permute.xlu2 %545 }
 0x4d8   :  { %v548_v15 = vmul.f32 %v546_v14, %v529_v52 }
 0x4da   :  { %575 = vrot.lane.b32.xlu1 %v548_v15, %s4065_s29 }
 0x4df   :  { %v639_v38 = vpop.permute.xlu2 %638 }
 0x4e0   :  { %vm640_vm15 = vcmp.eq.s32.totalorder %v4268_v12, %v639_v38 }
 0x4e1   :  { %v3297_v17 = vsel %vm640_vm15, 1.0, %v4062_v10 }
 0x4e2   :  { %3299 = vmatmul.msk.f32.vlgmr.msra.gmra.mxu1 %vm288_vm0, %v3297_v17 }
 0x4e3   :  { %1028 = vmatpush.msra.mxu1 %v4231_v2 }
 0x4e5   :  { %1029 = vmatpush.msra.mxu1 %v4237_v5 }
 0x4e7   :  { %1030 = vmatpush.msra.mxu1 %v4245_v7 }
 0x4e9   :  { %1031 = vmatpush.msra.mxu1 %v4251_v9 }
 0x548   :  { %v551_v18 = vpop.permute.xlu0 %550 }
 0x549   :  { %3294 = vmatmul.msk.f32.vlgmr.msrb.gmra.mxu2 %vm288_vm0, %v551_v18 }
 0x54a   :  { %916 = vmatpush.msrb.mxu2 %v4290_v41 }
 0x54c   :  { %v576_v19 = vpop.permute.xlu1 %575  ;;  %917 = vmatpush.msrb.mxu2 %v4294_v43 }
 0x54d   :  { %3295 = vmatmul.msk.f32.vlgmr.msrb.gmra.mxu3 %vm288_vm0, %v576_v19  ;;  %3298 = vmatmul.msk.f32.vlgmr.msra.gmra.mxu0 %vm288_vm0, %v576_v19 }
 0x54e   :  { %941 = vmatpush.msrb.mxu3 %v4292_v42  ;;  %1005 = vmatpush.msra.mxu0 %v4229_v1 }
 0x54f   :  { %918 = vmatpush.msrb.mxu2 %v4300_v45 }
 0x550   :  { %942 = vmatpush.msrb.mxu3 %v4298_v44  ;;  %1006 = vmatpush.msra.mxu0 %v4235_v4 }
 0x551   :  { %919 = vmatpush.msrb.mxu2 %v4306_v47 }
 0x552   :  { %943 = vmatpush.msrb.mxu3 %v4302_v46  ;;  %1007 = vmatpush.msra.mxu0 %v4243_v6 }
 0x554   :  { %944 = vmatpush.msrb.mxu3 %v4308_v48  ;;  %1008 = vmatpush.msra.mxu0 %v4249_v8 }
 0x55f   :  { %v683_v20 = vpop.f32.mrf.mxu1 }
 0x5ca   :  { %v660_v21 = vpop.f32.mrf.mxu0 }
 0x5cb   :  { %v684_v22 = vadd.f32 %v683_v20, %v660_v21 }
 0x5cc   :  { %v571_v24 = vpop.f32.mrf.mxu2 }
 0x5cd   :  { %v686_v23 = vadd.f32 %v4280_v16, %v684_v22 }
 0x5cf   :  { %3472 = vtanh.f32 %v686_v23  ;;  %v3300_v30 = vmul.f32 -1.442695, %v686_v23 }
 0x5d0   :  { %v596_v25 = vpop.f32.mrf.mxu3 }
 0x5d1   :  { %v597_v26 = vadd.f32 %v596_v25, %v571_v24 }
 0x5d3   :  { %v599_v27 = vadd.f32 %v4349_v55, %v597_v26 }
 0x5d5   :  { %v3473_v28 = vpop.eup %3472  ;;  %3474 = vtanh.f32 %v599_v27  ;;  %v3296_v31 = vmul.f32 -1.442695, %v599_v27 }
 0x5d6   :  { %709 = vrot.lane.b32.xlu1 %v3473_v28, %s4063_s22  ;;  %3476 = vpow2.f32 %v3300_v30 }
 0x5d7   :  { %3478 = vpow2.f32 %v3296_v31 }
 0x5db   :  { %v3475_v29 = vpop.eup %3474 }
 0x5dc   :  { %622 = vrot.lane.b32.xlu0 %v3475_v29, %s4063_s22  ;;  %v3477_v32 = vpop.eup %3476  ;;  %v4067_v29 = vmov 3  }
 0x5dd   :  { %v690_v33 = vadd.f32 1.0, %v3477_v32  ;;  %v3479_v34 = vpop.eup %3478  ;;  %3431 = vset.pattern.permute.xlu2 %v4067_v29  ;;  %3439 = vset.pattern.permute.xlu1 %v4067_v29 }
 0x5de   :  { %v603_v35 = vadd.f32 1.0, %v3479_v34 }
 0x5df   :  { %3480 = vrcp.f32 %v690_v33  ;;  %v702_v54 = vand.u32 2147483648, %v690_v33  ;;  %vm696_vm2 = vweird.f32 %v690_v33  ;;  %v700_v56 = vand.u32 2147483647, %v690_v33 }
 0x5e0   :  { %3482 = vrcp.f32 %v603_v35  ;;  %v615_v13 = vand.u32 2147483648, %v603_v35  ;;  %vm609_vm6 = vweird.f32 %v603_v35  ;;  %v613_v15 = vand.u32 2147483647, %v603_v35 }
 0x5e1   :  { %v703_v60 = vor.u32 1.1754944e-38, %v702_v54  ;;  %vm701_vm4 = vcmp.eq.f32.partialorder %v700_v56, 8.507059e+37 }
 0x5e2   :  { %v616_v17 = vor.u32 1.1754944e-38, %v615_v13  ;;  %vm614_vm8 = vcmp.eq.f32.partialorder %v613_v15, 8.507059e+37 }
 0x5e5   :  { %v3481_v36 = vpop.eup %3480 }
 0x5e6   :  { %v692_v37 = vmul.f32 %v3481_v36, %v690_v33  ;;  %v3483_v39 = vpop.eup %3482  ;;  %vm697_vm1 = vweird.f32 %v3481_v36 }
 0x5e7   :  { %v605_v50 = vmul.f32 %v3483_v39, %v603_v35  ;;  %vm698_vm3 = vmor %vm696_vm2, %vm697_vm1  ;;  %vm610_vm5 = vweird.f32 %v3483_v39 }
 0x5e8   :  { %v693_v49 = vsub.f32 1.0, %v692_v37  ;;  %vm611_vm7 = vmor %vm609_vm6, %vm610_vm5 }
 0x5e9   :  { %v606_v52 = vsub.f32 1.0, %v605_v50 }
 0x5ea   :  { %v694_v51 = vmul.f32 %v3481_v36, %v693_v49 }
 0x5eb   :  { %v607_v58 = vmul.f32 %v3483_v39, %v606_v52 }
 0x5ec   :  { %v695_v53 = vadd.f32 %v3481_v36, %v694_v51 }
 0x5ed   :  { %v608_v62 = vadd.f32 %v3483_v39, %v607_v58 }
 0x5ee   :  { %v699_v59 = vsel %vm698_vm3, %v3481_v36, %v695_v53 }
 0x5ef   :  { %v704_v11 = vsel %vm701_vm4, %v703_v60, %v699_v59  ;;  %v612_v38 = vsel %vm611_vm7, %v3483_v39, %v608_v62 }
 0x5f0   :  { %v617_v19 = vsel %vm614_vm8, %v616_v17, %v612_v38  ;;  %v707_v25 = vmul.f32 %v704_v11, %v4362_v61 }
 0x5f1   :  { %v620_v21 = vmul.f32 %v617_v19, %v4357_v57 }
 0x648   :  { %v710_v63 = vpop.permute.xlu1 %709 }
 0x649   :  { %v712_v14 = vmul.f32 %v710_v63, %v704_v11 }
 0x64b   :  { %714 = vrot.lane.b32.xlu0 %v712_v14, %s4063_s22 }
 0x64e   :  { %v623_v18 = vpop.permute.xlu0 %622 }
 0x64f   :  { %v625_v20 = vmul.f32 %v623_v18, %v617_v19 }
 0x651   :  { %627 = vrot.lane.b32.xlu2 %v625_v20, %s4063_s22 }
 0x6ab   :  { %v628_v22 = vpop.permute.xlu2 %627 }
 0x6ac   :  { %v4398_v23 = vadd.f32 %v628_v22, %v620_v21 }
 0x6ae   :  { %3484 = vtanh.f32 %v4398_v23 }
 0x6b4   :  { %v3485_v24 = vpop.eup %3484 }
 0x6b5   :  { %633 = vrot.lane.b32.xlu1 %v3485_v24, %s4063_s22 }
 0x6bd   :  { %v715_v26 = vpop.permute.xlu0 %714 }
 0x6be   :  { %v4403_v27 = vadd.f32 %v715_v26, %v707_v25 }
 0x6c0   :  { %3486 = vtanh.f32 %v4403_v27 }
 0x6c6   :  { %v3487_v28 = vpop.eup %3486 }
 0x6c7   :  { %720 = vrot.lane.b32.xlu2 %v3487_v28, %s4063_s22 }
 0x6cf   :  { %813 = vperm.xlu2 %3431, %v4227_v0  }
 0x721   :  { %v721_v57 = vpop.permute.xlu2 %720 }
 0x722   :  { %v723_v30 = vmul.f32 %v721_v57, %v704_v11 }
 0x724   :  { %750 = vrot.lane.b32.xlu1 %v723_v30, %s4065_s29 }
 0x727   :  { %v634_v31 = vpop.permute.xlu1 %633 }
 0x728   :  { %v636_v32 = vmul.f32 %v634_v31, %v617_v19 }
 0x729   :  { %v814_v61 = vpop.permute.xlu2 %813 }
 0x72a   :  { %725 = vrot.lane.b32.xlu0 %v636_v32, %s4065_s29  ;;  %vm815_vm9 = vcmp.eq.s32.totalorder %v4268_v12, %v814_v61 }
 0x72b   :  { %v3304_v33 = vsel %vm815_vm9, 1.0, %v4062_v10 }
 0x72c   :  { %3306 = vmatmul.msk.f32.vlgmr.msrb.gmra.mxu1 %vm288_vm0, %v3304_v33 }
 0x72d   :  { %1203 = vmatpush.msrb.mxu1 %v4231_v2 }
 0x72f   :  { %1204 = vmatpush.msrb.mxu1 %v4237_v5 }
 0x731   :  { %1205 = vmatpush.msrb.mxu1 %v4245_v7 }
 0x733   :  { %1206 = vmatpush.msrb.mxu1 %v4251_v9 }
 0x796   :  { %v751_v34 = vpop.permute.xlu1 %750 }
 0x797   :  { %3302 = vmatmul.msk.f32.vlgmr.msra.gmra.mxu3 %vm288_vm0, %v751_v34  ;;  %3305 = vmatmul.msk.f32.vlgmr.msrb.gmra.mxu0 %vm288_vm0, %v751_v34 }
 0x798   :  { %1116 = vmatpush.msra.mxu3 %v4292_v42  ;;  %1180 = vmatpush.msrb.mxu0 %v4229_v1 }
 0x79a   :  { %1117 = vmatpush.msra.mxu3 %v4298_v44  ;;  %1181 = vmatpush.msrb.mxu0 %v4235_v4 }
 0x79c   :  { %v726_v35 = vpop.permute.xlu0 %725  ;;  %1118 = vmatpush.msra.mxu3 %v4302_v46  ;;  %1182 = vmatpush.msrb.mxu0 %v4243_v6 }
 0x79d   :  { %3301 = vmatmul.msk.f32.vlgmr.msra.gmra.mxu2 %vm288_vm0, %v726_v35 }
 0x79e   :  { %1119 = vmatpush.msra.mxu3 %v4308_v48  ;;  %1183 = vmatpush.msrb.mxu0 %v4249_v8 }
 0x79f   :  { %1091 = vmatpush.msra.mxu2 %v4290_v41 }
 0x7a1   :  { %1092 = vmatpush.msra.mxu2 %v4294_v43 }
 0x7a3   :  { %1093 = vmatpush.msra.mxu2 %v4300_v45 }
 0x7a5   :  { %1094 = vmatpush.msra.mxu2 %v4306_v47 }
 0x7a9   :  { %v858_v36 = vpop.f32.mrf.mxu1 }
 0x814   :  { %v835_v37 = vpop.f32.mrf.mxu0 }
 0x815   :  { %v859_v39 = vadd.f32 %v858_v36, %v835_v37 }
 0x817   :  { %v861_v49 = vadd.f32 %v4280_v16, %v859_v39 }
 0x819   :  { %3488 = vtanh.f32 %v861_v49  ;;  %v3307_v58 = vmul.f32 -1.442695, %v861_v49 }
 0x81a   :  { %v771_v51 = vpop.f32.mrf.mxu3 }
 0x81f   :  { %v3489_v50 = vpop.eup %3488 }
 0x820   :  { %v746_v52 = vpop.f32.mrf.mxu2  ;;  %884 = vrot.lane.b32.xlu1 %v3489_v50, %s4063_s22 }
 0x821   :  { %v772_v53 = vadd.f32 %v771_v51, %v746_v52 }
 0x823   :  { %v774_v54 = vadd.f32 %v4349_v55, %v772_v53 }
 0x825   :  { %3490 = vtanh.f32 %v774_v54  ;;  %v3303_v60 = vmul.f32 -1.442695, %v774_v54 }
 0x826   :  { %3492 = vpow2.f32 %v3307_v58 }
 0x827   :  { %3494 = vpow2.f32 %v3303_v60 }
 0x82b   :  { %v3491_v56 = vpop.eup %3490 }
 0x82c   :  { %797 = vrot.lane.b32.xlu0 %v3491_v56, %s4063_s22  ;;  %v3493_v59 = vpop.eup %3492  ;;  %v4068_v56 = vmov 4  }
 0x82d   :  { %v865_v62 = vadd.f32 1.0, %v3493_v59  ;;  %v3495_v63 = vpop.eup %3494  ;;  %3432 = vset.pattern.permute.xlu2 %v4068_v56 }
 0x82e   :  { %v778_v13 = vadd.f32 1.0, %v3495_v63 }
 0x82f   :  { %3496 = vrcp.f32 %v865_v62  ;;  %v877_v20 = vand.u32 2147483648, %v865_v62  ;;  %vm871_vm11 = vweird.f32 %v865_v62  ;;  %v875_v21 = vand.u32 2147483647, %v865_v62 }
 0x830   :  { %3498 = vrcp.f32 %v778_v13  ;;  %v790_v31 = vand.u32 2147483648, %v778_v13  ;;  %vm784_vm15 = vweird.f32 %v778_v13  ;;  %v788_v32 = vand.u32 2147483647, %v778_v13 }
 0x831   :  { %v878_v25 = vor.u32 1.1754944e-38, %v877_v20  ;;  %vm876_vm13 = vcmp.eq.f32.partialorder %v875_v21, 8.507059e+37 }
 0x832   :  { %v791_v33 = vor.u32 1.1754944e-38, %v790_v31  ;;  %vm789_vm2 = vcmp.eq.f32.partialorder %v788_v32, 8.507059e+37 }
 0x835   :  { %v3497_v11 = vpop.eup %3496 }
 0x836   :  { %v867_v14 = vmul.f32 %v3497_v11, %v865_v62  ;;  %v3499_v17 = vpop.eup %3498  ;;  %vm872_vm10 = vweird.f32 %v3497_v11 }
 0x837   :  { %v780_v19 = vmul.f32 %v3499_v17, %v778_v13  ;;  %vm873_vm12 = vmor %vm871_vm11, %vm872_vm10  ;;  %vm785_vm14 = vweird.f32 %v3499_v17 }
 0x838   :  { %v868_v15 = vsub.f32 1.0, %v867_v14  ;;  %vm786_vm1 = vmor %vm784_vm15, %vm785_vm14 }
 0x839   :  { %v781_v24 = vsub.f32 1.0, %v780_v19 }
 0x83a   :  { %v869_v38 = vmul.f32 %v3497_v11, %v868_v15 }
 0x83b   :  { %v782_v57 = vmul.f32 %v3499_v17, %v781_v24 }
 0x83c   :  { %v870_v18 = vadd.f32 %v3497_v11, %v869_v38 }
 0x83d   :  { %v783_v30 = vadd.f32 %v3499_v17, %v782_v57 }
 0x83e   :  { %v874_v22 = vsel %vm873_vm12, %v3497_v11, %v870_v18 }
 0x83f   :  { %v879_v28 = vsel %vm876_vm13, %v878_v25, %v874_v22  ;;  %v787_v61 = vsel %vm786_vm1, %v3499_v17, %v783_v30 }
 0x840   :  { %v792_v35 = vsel %vm789_vm2, %v791_v33, %v787_v61  ;;  %v882_v51 = vmul.f32 %v879_v28, %v4403_v27 }
 0x841   :  { %v795_v37 = vmul.f32 %v792_v35, %v4398_v23 }
 0x892   :  { %v885_v26 = vpop.permute.xlu1 %884 }
 0x893   :  { %v887_v29 = vmul.f32 %v885_v26, %v879_v28 }
 0x895   :  { %889 = vrot.lane.b32.xlu0 %v887_v29, %s4063_s22 }
 0x89e   :  { %v798_v34 = vpop.permute.xlu0 %797 }
 0x89f   :  { %v800_v36 = vmul.f32 %v798_v34, %v792_v35 }
 0x8a1   :  { %802 = vrot.lane.b32.xlu2 %v800_v36, %s4063_s22 }
 0x8fb   :  { %v803_v39 = vpop.permute.xlu2 %802 }
 0x8fc   :  { %v4439_v49 = vadd.f32 %v803_v39, %v795_v37 }
 0x8fe   :  { %3500 = vtanh.f32 %v4439_v49 }
 0x904   :  { %v3501_v50 = vpop.eup %3500 }
 0x905   :  { %808 = vrot.lane.b32.xlu1 %v3501_v50, %s4063_s22 }
 0x907   :  { %v890_v52 = vpop.permute.xlu0 %889 }
 0x908   :  { %v4444_v53 = vadd.f32 %v890_v52, %v882_v51 }
 0x90a   :  { %3502 = vtanh.f32 %v4444_v53 }
 0x910   :  { %v3503_v54 = vpop.eup %3502 }
 0x911   :  { %895 = vrot.lane.b32.xlu2 %v3503_v54, %s4063_s22 }
 0x919   :  { %988 = vperm.xlu2 %3432, %v4227_v0  }
 0x96b   :  { %v896_v23 = vpop.permute.xlu2 %895 }
 0x96c   :  { %v898_v58 = vmul.f32 %v896_v23, %v879_v28 }
 0x96e   :  { %925 = vrot.lane.b32.xlu1 %v898_v58, %s4065_s29 }
 0x973   :  { %v989_v27 = vpop.permute.xlu2 %988 }
 0x974   :  { %vm990_vm3 = vcmp.eq.s32.totalorder %v4268_v12, %v989_v27 }
 0x975   :  { %v3311_v62 = vsel %vm990_vm3, 1.0, %v4062_v10 }
 0x976   :  { %3313 = vmatmul.msk.f32.vlgmr.msra.gmra.mxu1 %vm288_vm0, %v3311_v62 }
 0x977   :  { %v809_v59 = vpop.permute.xlu1 %808  ;;  %1378 = vmatpush.msra.mxu1 %v4231_v2 }
 0x978   :  { %v811_v60 = vmul.f32 %v809_v59, %v792_v35 }
 0x979   :  { %1379 = vmatpush.msra.mxu1 %v4237_v5 }
 0x97a   :  { %900 = vrot.lane.b32.xlu0 %v811_v60, %s4065_s29 }
 0x97b   :  { %1380 = vmatpush.msra.mxu1 %v4245_v7 }
 0x97d   :  { %1381 = vmatpush.msra.mxu1 %v4251_v9 }
 0x9e0   :  { %v926_v0 = vpop.permute.xlu1 %925 }
 0x9e1   :  { %3309 = vmatmul.msk.f32.vlgmr.msrb.gmra.mxu3 %vm288_vm0, %v926_v0  ;;  %3312 = vmatmul.msk.f32.vlgmr.msra.gmra.mxu0 %vm288_vm0, %v926_v0 }
 0x9e2   :  { %1291 = vmatpush.msrb.mxu3 %v4292_v42  ;;  %1355 = vmatpush.msra.mxu0 %v4229_v1 }
 0x9e4   :  { %1292 = vmatpush.msrb.mxu3 %v4298_v44  ;;  %1356 = vmatpush.msra.mxu0 %v4235_v4 }
 0x9e6   :  { %1293 = vmatpush.msrb.mxu3 %v4302_v46  ;;  %1357 = vmatpush.msra.mxu0 %v4243_v6 }
 0x9e8   :  { %1294 = vmatpush.msrb.mxu3 %v4308_v48  ;;  %1358 = vmatpush.msra.mxu0 %v4249_v8 }
 0x9ec   :  { %v901_v2 = vpop.permute.xlu0 %900 }
 0x9ed   :  { %3308 = vmatmul.msk.f32.vlgmr.msrb.gmra.mxu2 %vm288_vm0, %v901_v2 }
 0x9ee   :  { %1266 = vmatpush.msrb.mxu2 %v4290_v41 }
 0x9f0   :  { %1267 = vmatpush.msrb.mxu2 %v4294_v43 }
 0x9f2   :  { %1268 = vmatpush.msrb.mxu2 %v4300_v45 }
 0x9f3   :  { %v1033_v1 = vpop.f32.mrf.mxu1 }
 0x9f4   :  { %1269 = vmatpush.msrb.mxu2 %v4306_v47 }
 0xa5e   :  { %v1010_v4 = vpop.f32.mrf.mxu0 }
 0xa5f   :  { %v1034_v5 = vadd.f32 %v1033_v1, %v1010_v4  ;;  %v4069_v1 = vmov 5  }
 0xa60   :  { %3433 = vset.pattern.permute.xlu2 %v4069_v1 }
 0xa61   :  { %v1036_v6 = vadd.f32 %v4280_v16, %v1034_v5 }
 0xa63   :  { %3504 = vtanh.f32 %v1036_v6  ;;  %v3314_v14 = vmul.f32 -1.442695, %v1036_v6 }
 0xa64   :  { %v946_v8 = vpop.f32.mrf.mxu3 }
 0xa69   :  { %v3505_v7 = vpop.eup %3504 }
 0xa6a   :  { %1059 = vrot.lane.b32.xlu1 %v3505_v7, %s4063_s22 }
 0xa70   :  { %v921_v9 = vpop.f32.mrf.mxu2 }
 0xa71   :  { %v947_v63 = vadd.f32 %v946_v8, %v921_v9  ;;  %v3689_v9 = vld [vmem:[#allocation9 + $0x18] sm:$0xff] }
 0xa73   :  { %v949_v11 = vadd.f32 %v4349_v55, %v947_v63  ;;  %v3690_v63 = vld [vmem:[#allocation9 + $0x10] sm:$0xff] }
 0xa75   :  { %3506 = vtanh.f32 %v949_v11  ;;  %v3310_v17 = vmul.f32 -1.442695, %v949_v11  ;;  %v3691_v11 = vld [vmem:[#allocation9 + $0x8] sm:$0xff] }
 0xa76   :  { %3508 = vpow2.f32 %v3314_v14 }
 0xa7b   :  { %v3507_v13 = vpop.eup %3506 }
 0xa7c   :  { %972 = vrot.lane.b32.xlu0 %v3507_v13, %s4063_s22  ;;  %v3509_v15 = vpop.eup %3508  ;;  %v3692_v13 = vld [vmem:[#allocation9] sm:$0xff] }
 0xa7d   :  { %v1040_v38 = vadd.f32 1.0, %v3509_v15  ;;  %v3693_v15 = vld [vmem:[#allocation10 + $0x18] sm:$0xff] }
 0xa7f   :  { %3510 = vrcp.f32 %v1040_v38  ;;  %v1052_v25 = vand.u32 2147483648, %v1040_v38  ;;  %vm1046_vm5 = vweird.f32 %v1040_v38  ;;  %v1050_v26 = vand.u32 2147483647, %v1040_v38 }
 0xa80   :  { %3512 = vpow2.f32 %v3310_v17  ;;  %v3695_v17 = vld [vmem:[#allocation10 + $0x8] sm:$0xff] }
 0xa81   :  { %v1053_v57 = vor.u32 1.1754944e-38, %v1052_v25  ;;  %vm1051_vm7 = vcmp.eq.f32.partialorder %v1050_v26, 8.507059e+37 }
 0xa85   :  { %v3511_v16 = vpop.eup %3510 }
 0xa86   :  { %v1042_v18 = vmul.f32 %v3511_v16, %v1040_v38  ;;  %v3513_v19 = vpop.eup %3512  ;;  %vm1047_vm4 = vweird.f32 %v3511_v16  ;;  %v3694_v38 = vld [vmem:[#allocation10 + $0x10] sm:$0xff] }
 0xa87   :  { %v953_v21 = vadd.f32 1.0, %v3513_v19  ;;  %vm1048_vm6 = vmor %vm1046_vm5, %vm1047_vm4 }
 0xa88   :  { %v1043_v20 = vsub.f32 1.0, %v1042_v18 }
 0xa89   :  { %3514 = vrcp.f32 %v953_v21  ;;  %v965_v36 = vand.u32 2147483648, %v953_v21  ;;  %vm959_vm9 = vweird.f32 %v953_v21  ;;  %v963_v37 = vand.u32 2147483647, %v953_v21 }
 0xa8a   :  { %v1044_v22 = vmul.f32 %v3511_v16, %v1043_v20 }
 0xa8b   :  { %v966_v50 = vor.u32 1.1754944e-38, %v965_v36  ;;  %vm964_vm11 = vcmp.eq.f32.partialorder %v963_v37, 8.507059e+37 }
 0xa8c   :  { %v1045_v24 = vadd.f32 %v3511_v16, %v1044_v22 }
 0xa8e   :  { %v1049_v29 = vsel %vm1048_vm6, %v3511_v16, %v1045_v24  ;;  %v3696_v16 = vld [vmem:[#allocation10] sm:$0xff] }
 0xa8f   :  { %v3515_v28 = vpop.eup %3514  ;;  %v1054_v32 = vsel %vm1051_vm7, %v1053_v57, %v1049_v29 }
 0xa90   :  { %v955_v30 = vmul.f32 %v3515_v28, %v953_v21  ;;  %vm960_vm8 = vweird.f32 %v3515_v28  ;;  %v1057_v60 = vmul.f32 %v1054_v32, %v4444_v53 }
 0xa91   :  { %vm961_vm10 = vmor %vm959_vm9, %vm960_vm8 }
 0xa92   :  { %v956_v33 = vsub.f32 1.0, %v955_v30 }
 0xa94   :  { %v957_v34 = vmul.f32 %v3515_v28, %v956_v33 }
 0xa96   :  { %v958_v35 = vadd.f32 %v3515_v28, %v957_v34 }
 0xa98   :  { %v962_v39 = vsel %vm961_vm10, %v3515_v28, %v958_v35 }
 0xa99   :  { %v967_v52 = vsel %vm964_vm11, %v966_v50, %v962_v39 }
 0xa9a   :  { %v970_v23 = vmul.f32 %v967_v52, %v4439_v49  ;;  %v4491_v49 = vld [vmem:[#allocation6] sm:$0x3] }
 0xadc   :  { %v1060_v31 = vpop.permute.xlu1 %1059 }
 0xadd   :  { %v1062_v61 = vmul.f32 %v1060_v31, %v1054_v32 }
 0xadf   :  { %1064 = vrot.lane.b32.xlu0 %v1062_v61, %s4063_s22 }
 0xaee   :  { %v973_v51 = vpop.permute.xlu0 %972 }
 0xaef   :  { %v975_v54 = vmul.f32 %v973_v51, %v967_v52 }
 0xaf1   :  { %977 = vrot.lane.b32.xlu2 %v975_v54, %s4063_s22 }
 0xb4b   :  { %v978_v58 = vpop.permute.xlu2 %977 }
 0xb4c   :  { %v4481_v59 = vadd.f32 %v978_v58, %v970_v23 }
 0xb4e   :  { %3516 = vtanh.f32 %v4481_v59 }
 0xb51   :  { %v1065_v27 = vpop.permute.xlu0 %1064 }
 0xb52   :  { %v4485_v62 = vadd.f32 %v1065_v27, %v1057_v60 }
 0xb54   :  { %v3517_v0 = vpop.eup %3516  ;;  %3518 = vtanh.f32 %v4485_v62 }
 0xb55   :  { %983 = vrot.lane.b32.xlu1 %v3517_v0, %s4063_s22 }
 0xb5a   :  { %v3519_v2 = vpop.eup %3518 }
 0xb5b   :  { %1070 = vrot.lane.b32.xlu2 %v3519_v2, %s4063_s22 }
 0xb63   :  { %1163 = vperm.xlu2 %3433, %v4491_v49  }
 0xbb5   :  { %v1071_v4 = vpop.permute.xlu2 %1070 }
 0xbb6   :  { %v1073_v53 = vmul.f32 %v1071_v4, %v1054_v32 }
 0xbb8   :  { %1100 = vrot.lane.b32.xlu1 %v1073_v53, %s4065_s29 }
 0xbbd   :  { %v1164_v7 = vpop.permute.xlu2 %1163 }
 0xbbe   :  { %vm1165_vm12 = vcmp.eq.s32.totalorder %v4268_v12, %v1164_v7 }
 0xbbf   :  { %v3318_v8 = vsel %vm1165_vm12, 1.0, %v4062_v10 }
 0xbc0   :  { %3320 = vmatmul.msk.f32.vlgmr.msrb.gmra.mxu1 %vm288_vm0, %v3318_v8 }
 0xbc1   :  { %1553 = vmatpush.msrb.mxu1 %v3689_v9 }
 0xbc3   :  { %1554 = vmatpush.msrb.mxu1 %v3690_v63 }
 0xbc5   :  { %1555 = vmatpush.msrb.mxu1 %v3691_v11 }
 0xbc7   :  { %v984_v5 = vpop.permute.xlu1 %983  ;;  %1556 = vmatpush.msrb.mxu1 %v3692_v13 }
 0xbc8   :  { %v986_v6 = vmul.f32 %v984_v5, %v967_v52 }
 0xbca   :  { %1075 = vrot.lane.b32.xlu0 %v986_v6, %s4065_s29 }
 0xc2a   :  { %v1101_v14 = vpop.permute.xlu1 %1100 }
 0xc2b   :  { %3316 = vmatmul.msk.f32.vlgmr.msra.gmra.mxu3 %vm288_vm0, %v1101_v14  ;;  %3319 = vmatmul.msk.f32.vlgmr.msrb.gmra.mxu0 %vm288_vm0, %v1101_v14  ;;  %v4070_v14 = vmov 6  }
 0xc2c   :  { %1466 = vmatpush.msra.mxu3 %v4292_v42  ;;  %1530 = vmatpush.msrb.mxu0 %v3693_v15 }
 0xc2d   :  { %3434 = vset.pattern.permute.xlu2 %v4070_v14 }
 0xc2e   :  { %1467 = vmatpush.msra.mxu3 %v4298_v44  ;;  %1531 = vmatpush.msrb.mxu0 %v3694_v38 }
 0xc30   :  { %1468 = vmatpush.msra.mxu3 %v4302_v46  ;;  %1532 = vmatpush.msrb.mxu0 %v3695_v17 }
 0xc32   :  { %1469 = vmatpush.msra.mxu3 %v4308_v48  ;;  %1533 = vmatpush.msrb.mxu0 %v3696_v16  ;;  %v4513_v48 = vld [vmem:[%s5056_s5] ss:$0 sm:$0xff] }
 0xc3c   :  { %v1076_v18 = vpop.permute.xlu0 %1075 }
 0xc3d   :  { %3315 = vmatmul.msk.f32.vlgmr.msra.gmra.mxu2 %vm288_vm0, %v1076_v18  ;;  %v1208_v42 = vpop.f32.mrf.mxu1 }
 0xc3e   :  { %1441 = vmatpush.msra.mxu2 %v4290_v41 }
 0xc40   :  { %1442 = vmatpush.msra.mxu2 %v4294_v43 }
 0xc42   :  { %1443 = vmatpush.msra.mxu2 %v4300_v45 }
 0xc44   :  { %1444 = vmatpush.msra.mxu2 %v4306_v47 }
 0xca8   :  { %v1185_v44 = vpop.f32.mrf.mxu0 }
 0xca9   :  { %v1209_v46 = vadd.f32 %v1208_v42, %v1185_v44  ;;  %v3698_v42 = vld [vmem:[#allocation12 + $0x18] sm:$0xff]  ;;  %v3699_v44 = vld [vmem:[#allocation12 + $0x10] sm:$0xff] }
 0xcab   :  { %v1211_v19 = vadd.f32 %v4513_v48, %v1209_v46  ;;  %v3700_v46 = vld [vmem:[#allocation12 + $0x8] sm:$0xff] }
 0xcad   :  { %3520 = vtanh.f32 %v1211_v19  ;;  %v3321_v22 = vmul.f32 -1.442695, %v1211_v19  ;;  %v3701_v19 = vld [vmem:[#allocation12] sm:$0xff] }
 0xcae   :  { %v1121_v41 = vpop.f32.mrf.mxu3 }
 0xcb3   :  { %v3521_v20 = vpop.eup %3520 }
 0xcb4   :  { %1234 = vrot.lane.b32.xlu1 %v3521_v20, %s4063_s22 }
 0xcc0   :  { %v1096_v43 = vpop.f32.mrf.mxu2 }
 0xcc1   :  { %v1122_v21 = vadd.f32 %v1121_v41, %v1096_v43  ;;  %v3702_v41 = vld [vmem:[#allocation13 + $0x18] sm:$0xff]  ;;  %v3703_v43 = vld [vmem:[#allocation13 + $0x10] sm:$0xff] }
 0xcc3   :  { %v1124_v45 = vadd.f32 %v4349_v55, %v1122_v21  ;;  %v3704_v21 = vld [vmem:[#allocation13 + $0x8] sm:$0xff] }
 0xcc5   :  { %3522 = vtanh.f32 %v1124_v45  ;;  %v3317_v28 = vmul.f32 -1.442695, %v1124_v45  ;;  %v3705_v45 = vld [vmem:[#allocation13] sm:$0xff] }
 0xcc6   :  { %3524 = vpow2.f32 %v3321_v22 }
 0xccb   :  { %v3523_v47 = vpop.eup %3522 }
 0xccc   :  { %1147 = vrot.lane.b32.xlu0 %v3523_v47, %s4063_s22  ;;  %v3525_v24 = vpop.eup %3524 }
 0xccd   :  { %v1215_v25 = vadd.f32 1.0, %v3525_v24 }
 0xccf   :  { %3526 = vrcp.f32 %v1215_v25  ;;  %v1227_v55 = vand.u32 2147483648, %v1215_v25  ;;  %vm1221_vm14 = vweird.f32 %v1215_v25  ;;  %v1225_v33 = vand.u32 2147483647, %v1215_v25 }
 0xcd0   :  { %3528 = vpow2.f32 %v3317_v28 }
 0xcd1   :  { %v1228_v35 = vor.u32 1.1754944e-38, %v1227_v55  ;;  %vm1226_vm1 = vcmp.eq.f32.partialorder %v1225_v33, 8.507059e+37 }
 0xcd5   :  { %v3527_v26 = vpop.eup %3526 }
 0xcd6   :  { %v1217_v29 = vmul.f32 %v3527_v26, %v1215_v25  ;;  %v3529_v30 = vpop.eup %3528  ;;  %vm1222_vm13 = vweird.f32 %v3527_v26 }
 0xcd7   :  { %v1128_v32 = vadd.f32 1.0, %v3529_v30  ;;  %vm1223_vm15 = vmor %vm1221_vm14, %vm1222_vm13  ;;  %v4546_v30 = vld [vmem:[%s5059_s8] ss:$0 sm:$0xff] }
 0xcd8   :  { %v1218_v57 = vsub.f32 1.0, %v1217_v29 }
 0xcd9   :  { %3530 = vrcp.f32 %v1128_v32  ;;  %v1140_v58 = vand.u32 2147483648, %v1128_v32  ;;  %vm1134_vm3 = vweird.f32 %v1128_v32  ;;  %v1138_v60 = vand.u32 2147483647, %v1128_v32 }
 0xcda   :  { %v1219_v31 = vmul.f32 %v3527_v26, %v1218_v57 }
 0xcdb   :  { %v1141_v0 = vor.u32 1.1754944e-38, %v1140_v58  ;;  %vm1139_vm5 = vcmp.eq.f32.partialorder %v1138_v60, 8.507059e+37 }
 0xcdc   :  { %v1220_v61 = vadd.f32 %v3527_v26, %v1219_v31 }
 0xcde   :  { %v1224_v34 = vsel %vm1223_vm15, %v3527_v26, %v1220_v61 }
 0xcdf   :  { %v1229_v37 = vsel %vm1226_vm1, %v1228_v35, %v1224_v34  ;;  %v3531_v50 = vpop.eup %3530 }
 0xce0   :  { %v1130_v51 = vmul.f32 %v3531_v50, %v1128_v32  ;;  %vm1135_vm2 = vweird.f32 %v3531_v50  ;;  %v1232_v5 = vmul.f32 %v1229_v37, %v4485_v62 }
 0xce1   :  { %vm1136_vm4 = vmor %vm1134_vm3, %vm1135_vm2 }
 0xce2   :  { %v1131_v52 = vsub.f32 1.0, %v1130_v51 }
 0xce4   :  { %v1132_v54 = vmul.f32 %v3531_v50, %v1131_v52 }
 0xce6   :  { %v1133_v23 = vadd.f32 %v3531_v50, %v1132_v54 }
 0xce8   :  { %v1137_v27 = vsel %vm1136_vm4, %v3531_v50, %v1133_v23 }
 0xce9   :  { %v1142_v4 = vsel %vm1139_vm5, %v1141_v0, %v1137_v27 }
 0xcea   :  { %v1145_v6 = vmul.f32 %v1142_v4, %v4481_v59 }
 0xd26   :  { %v1235_v36 = vpop.permute.xlu1 %1234 }
 0xd27   :  { %v1237_v39 = vmul.f32 %v1235_v36, %v1229_v37 }
 0xd29   :  { %1239 = vrot.lane.b32.xlu0 %v1237_v39, %s4063_s22 }
 0xd3e   :  { %v1148_v2 = vpop.permute.xlu0 %1147 }
 0xd3f   :  { %v1150_v53 = vmul.f32 %v1148_v2, %v1142_v4 }
 0xd41   :  { %1152 = vrot.lane.b32.xlu2 %v1150_v53, %s4063_s22 }
 0xd9b   :  { %v1240_v7 = vpop.permute.xlu0 %1239  ;;  %v1153_v8 = vpop.permute.xlu2 %1152 }
 0xd9c   :  { %v4523_v9 = vadd.f32 %v1240_v7, %v1232_v5  ;;  %v4525_v63 = vadd.f32 %v1153_v8, %v1145_v6 }
 0xd9e   :  { %3532 = vtanh.f32 %v4523_v9 }
 0xd9f   :  { %3534 = vtanh.f32 %v4525_v63 }
 0xda4   :  { %v3533_v11 = vpop.eup %3532 }
 0xda5   :  { %v3535_v13 = vpop.eup %3534  ;;  %1245 = vrot.lane.b32.xlu2 %v3533_v11, %s4063_s22 }
 0xda6   :  { %1158 = vrot.lane.b32.xlu1 %v3535_v13, %s4063_s22 }
 0xdad   :  { %1338 = vperm.xlu2 %3434, %v4491_v49  }
 0xdff   :  { %v1246_v59 = vpop.permute.xlu2 %1245 }
 0xe00   :  { %v1248_v62 = vmul.f32 %v1246_v59, %v1229_v37 }
 0xe02   :  { %1275 = vrot.lane.b32.xlu1 %v1248_v62, %s4065_s29 }
 0xe07   :  { %v1339_v17 = vpop.permute.xlu2 %1338 }
 0xe08   :  { %vm1340_vm6 = vcmp.eq.s32.totalorder %v4268_v12, %v1339_v17 }
 0xe09   :  { %v3325_v16 = vsel %vm1340_vm6, 1.0, %v4062_v10 }
 0xe0a   :  { %3327 = vmatmul.msk.f32.vlgmr.msra.gmra.mxu1 %vm288_vm0, %v3325_v16 }
 0xe18   :  { %v1159_v15 = vpop.permute.xlu1 %1158 }
 0xe19   :  { %v1161_v38 = vmul.f32 %v1159_v15, %v1142_v4 }
 0xe1b   :  { %1250 = vrot.lane.b32.xlu0 %v1161_v38, %s4065_s29 }
 0xe74   :  { %v1276_v18 = vpop.permute.xlu1 %1275 }
 0xe75   :  { %3323 = vmatmul.msk.f32.vlgmr.msrb.gmra.mxu3 %vm288_vm0, %v1276_v18  ;;  %3326 = vmatmul.msk.f32.vlgmr.msra.gmra.mxu0 %vm288_vm0, %v1276_v18 }
 0xe76   :  { %1641 = vmatpush.msrb.mxu3 %v3698_v42 }
 0xe78   :  { %1642 = vmatpush.msrb.mxu3 %v3699_v44 }
 0xe7a   :  { %1643 = vmatpush.msrb.mxu3 %v3700_v46 }
 0xe7c   :  { %1644 = vmatpush.msrb.mxu3 %v3701_v19 }
 0xe87   :  { %v1383_v47 = vpop.f32.mrf.mxu1 }
 0xe8d   :  { %v1251_v20 = vpop.permute.xlu0 %1250 }
 0xe8e   :  { %3322 = vmatmul.msk.f32.vlgmr.msrb.gmra.mxu2 %vm288_vm0, %v1251_v20 }
 0xe8f   :  { %1616 = vmatpush.msrb.mxu2 %v3702_v41  ;;  %v4071_v41 = vmov 7  }
 0xe90   :  { %3435 = vset.pattern.permute.xlu2 %v4071_v41 }
 0xe91   :  { %1617 = vmatpush.msrb.mxu2 %v3703_v43 }
 0xe93   :  { %1618 = vmatpush.msrb.mxu2 %v3704_v21 }
 0xe95   :  { %1619 = vmatpush.msrb.mxu2 %v3705_v45 }
 0xef2   :  { %v1360_v22 = vpop.f32.mrf.mxu0 }
 0xef3   :  { %v1384_v24 = vadd.f32 %v1383_v47, %v1360_v22 }
 0xef5   :  { %v1386_v25 = vadd.f32 %v4513_v48, %v1384_v24 }
 0xef7   :  { %3536 = vtanh.f32 %v1386_v25  ;;  %v3328_v61 = vmul.f32 -1.442695, %v1386_v25 }
 0xef8   :  { %v1296_v28 = vpop.f32.mrf.mxu3 }
 0xefd   :  { %v3537_v26 = vpop.eup %3536 }
 0xefe   :  { %1409 = vrot.lane.b32.xlu1 %v3537_v26, %s4063_s22 }
 0xf11   :  { %v1271_v29 = vpop.f32.mrf.mxu2 }
 0xf12   :  { %v1297_v57 = vadd.f32 %v1296_v28, %v1271_v29 }
 0xf14   :  { %v1299_v31 = vadd.f32 %v4546_v30, %v1297_v57 }
 0xf16   :  { %3538 = vtanh.f32 %v1299_v31  ;;  %v3324_v37 = vmul.f32 -1.442695, %v1299_v31 }
 0xf17   :  { %3540 = vpow2.f32 %v3328_v61 }
 0xf1c   :  { %v3539_v32 = vpop.eup %3538 }
 0xf1d   :  { %1322 = vrot.lane.b32.xlu0 %v3539_v32, %s4063_s22  ;;  %v3541_v55 = vpop.eup %3540 }
 0xf1e   :  { %v1390_v33 = vadd.f32 1.0, %v3541_v55 }
 0xf20   :  { %3542 = vrcp.f32 %v1390_v33  ;;  %v1402_v51 = vand.u32 2147483648, %v1390_v33  ;;  %vm1396_vm8 = vweird.f32 %v1390_v33  ;;  %v1400_v52 = vand.u32 2147483647, %v1390_v33 }
 0xf21   :  { %3544 = vpow2.f32 %v3324_v37 }
 0xf22   :  { %v1403_v58 = vor.u32 1.1754944e-38, %v1402_v51  ;;  %vm1401_vm10 = vcmp.eq.f32.partialorder %v1400_v52, 8.507059e+37 }
 0xf26   :  { %v3543_v34 = vpop.eup %3542 }
 0xf27   :  { %v1392_v35 = vmul.f32 %v3543_v34, %v1390_v33  ;;  %vm1397_vm7 = vweird.f32 %v3543_v34  ;;  %v3545_v54 = vpop.eup %3544 }
 0xf28   :  { %vm1398_vm9 = vmor %vm1396_vm8, %vm1397_vm7  ;;  %v1303_v60 = vadd.f32 1.0, %v3545_v54 }
 0xf29   :  { %v1393_v36 = vsub.f32 1.0, %v1392_v35 }
 0xf2a   :  { %3546 = vrcp.f32 %v1303_v60  ;;  %v1315_v8 = vand.u32 2147483648, %v1303_v60  ;;  %vm1309_vm12 = vweird.f32 %v1303_v60  ;;  %v1313_v11 = vand.u32 2147483647, %v1303_v60 }
 0xf2b   :  { %v1394_v39 = vmul.f32 %v3543_v34, %v1393_v36 }
 0xf2c   :  { %v1316_v59 = vor.u32 1.1754944e-38, %v1315_v8  ;;  %vm1314_vm14 = vcmp.eq.f32.partialorder %v1313_v11, 8.507059e+37 }
 0xf2d   :  { %v1395_v50 = vadd.f32 %v3543_v34, %v1394_v39 }
 0xf2f   :  { %v1399_v23 = vsel %vm1398_vm9, %v3543_v34, %v1395_v50 }
 0xf30   :  { %v1404_v0 = vsel %vm1401_vm10, %v1403_v58, %v1399_v23  ;;  %v3547_v4 = vpop.eup %3546 }
 0xf31   :  { %v1305_v53 = vmul.f32 %v3547_v4, %v1303_v60  ;;  %vm1310_vm11 = vweird.f32 %v3547_v4  ;;  %v1407_v17 = vmul.f32 %v1404_v0, %v4523_v9 }
 0xf32   :  { %vm1311_vm13 = vmor %vm1309_vm12, %vm1310_vm11 }
 0xf33   :  { %v1306_v5 = vsub.f32 1.0, %v1305_v53 }
 0xf35   :  { %v1307_v6 = vmul.f32 %v3547_v4, %v1306_v5 }
 0xf37   :  { %v1308_v7 = vadd.f32 %v3547_v4, %v1307_v6 }
 0xf39   :  { %v1312_v13 = vsel %vm1311_vm13, %v3547_v4, %v1308_v7 }
 0xf3a   :  { %v1317_v15 = vsel %vm1314_vm14, %v1316_v59, %v1312_v13 }
 0xf3b   :  { %v1320_v42 = vmul.f32 %v1317_v15, %v4525_v63 }
 0xf70   :  { %v1410_v27 = vpop.permute.xlu1 %1409 }
 0xf71   :  { %v1412_v2 = vmul.f32 %v1410_v27, %v1404_v0 }
 0xf73   :  { %1414 = vrot.lane.b32.xlu0 %v1412_v2, %s4063_s22 }
 0xf8f   :  { %v1323_v62 = vpop.permute.xlu0 %1322 }
 0xf90   :  { %v1325_v38 = vmul.f32 %v1323_v62, %v1317_v15 }
 0xf92   :  { %1327 = vrot.lane.b32.xlu2 %v1325_v38, %s4063_s22 }
 0xfe5   :  { %v1415_v16 = vpop.permute.xlu0 %1414 }
 0xfe6   :  { %v4553_v18 = vadd.f32 %v1415_v16, %v1407_v17 }
 0xfe8   :  { %3548 = vtanh.f32 %v4553_v18 }
 0xfec   :  { %v1328_v44 = vpop.permute.xlu2 %1327 }
 0xfed   :  { %v4557_v46 = vadd.f32 %v1328_v44, %v1320_v42 }
 0xfee   :  { %v3549_v19 = vpop.eup %3548 }
 0xfef   :  { %3550 = vtanh.f32 %v4557_v46  ;;  %1420 = vrot.lane.b32.xlu2 %v3549_v19, %s4063_s22 }
 0xff5   :  { %v3551_v20 = vpop.eup %3550 }
 0xff6   :  { %1333 = vrot.lane.b32.xlu1 %v3551_v20, %s4063_s22 }
 0xff7   :  { %1513 = vperm.xlu2 %3435, %v4491_v49  }
 0xfff   :  { %3436 = vset.pattern.permute.xlu2 %v4061_v3 }
0x1049   :  { %v1421_v9 = vpop.permute.xlu2 %1420 }
0x104a   :  { %v1423_v43 = vmul.f32 %v1421_v9, %v1404_v0 }
0x104c   :  { %1450 = vrot.lane.b32.xlu1 %v1423_v43, %s4065_s29  ;;  %v4588_v43 = vld [vmem:[#allocation7] sm:$0x3] }
0x1051   :  { %v1514_v45 = vpop.permute.xlu2 %1513 }
0x1052   :  { %vm1515_vm15 = vcmp.eq.s32.totalorder %v4268_v12, %v1514_v45  ;;  %v4597_v45 = vld [vmem:[#allocation16 + $0x10] sm:$0xff] }
0x1053   :  { %v3332_v47 = vsel %vm1515_vm15, 1.0, %v4062_v10 }
0x1054   :  { %3334 = vmatmul.msk.f32.vlgmr.msrb.gmra.mxu1 %vm288_vm0, %v3332_v47  ;;  %v4601_v47 = vld [vmem:[#allocation15 + $0x10] sm:$0xff] }
0x1068   :  { %v1334_v63 = vpop.permute.xlu1 %1333 }
0x1069   :  { %v1336_v21 = vmul.f32 %v1334_v63, %v1317_v15 }
0x106b   :  { %1425 = vrot.lane.b32.xlu0 %v1336_v21, %s4065_s29  ;;  %v4593_v21 = vld [vmem:[#allocation16 + $0x18] sm:$0xff] }
0x106c   :  { %1705 = vmatpush.msra.mxu0 %v4593_v21 }
0x106e   :  { %1706 = vmatpush.msra.mxu0 %v4597_v45 }
0x10be   :  { %v1451_v22 = vpop.permute.xlu1 %1450 }
0x10bf   :  { %3330 = vmatmul.msk.f32.vlgmr.msra.gmra.mxu3 %vm288_vm0, %v1451_v22  ;;  %3333 = vmatmul.msk.f32.vlgmr.msrb.gmra.mxu0 %vm288_vm0, %v1451_v22  ;;  %v4603_v22 = vld [vmem:[#allocation16 + $0x8] sm:$0xff] }
0x10c0   :  { %1707 = vmatpush.msra.mxu0 %v4603_v22 }
0x10d1   :  { %v1558_v49 = vpop.f32.mrf.mxu1 }
0x10dd   :  { %v1426_v3 = vpop.permute.xlu0 %1425 }
0x10de   :  { %3329 = vmatmul.msk.f32.vlgmr.msra.gmra.mxu2 %vm288_vm0, %v1426_v3  ;;  %v4605_v3 = vld [vmem:[#allocation15 + $0x8] sm:$0xff] }
0x113c   :  { %v1535_v24 = vpop.f32.mrf.mxu0 }
0x113d   :  { %v1559_v25 = vadd.f32 %v1558_v49, %v1535_v24  ;;  %v4613_v49 = vld [vmem:[#allocation15] sm:$0xff] }
0x113f   :  { %v1561_v26 = vadd.f32 %v4513_v48, %v1559_v25 }
0x1141   :  { %3552 = vtanh.f32 %v1561_v26  ;;  %v3335_v55 = vmul.f32 -1.442695, %v1561_v26 }
0x1142   :  { %v1471_v29 = vpop.f32.mrf.mxu3 }
0x1147   :  { %v3553_v28 = vpop.eup %3552 }
0x1148   :  { %1584 = vrot.lane.b32.xlu1 %v3553_v28, %s4063_s22 }
0x1161   :  { %v1446_v57 = vpop.f32.mrf.mxu2 }
0x1162   :  { %v1472_v31 = vadd.f32 %v1471_v29, %v1446_v57 }
0x1164   :  { %v1474_v32 = vadd.f32 %v4546_v30, %v1472_v31 }
0x1166   :  { %3554 = vtanh.f32 %v1474_v32  ;;  %v3331_v39 = vmul.f32 -1.442695, %v1474_v32  ;;  %v4631_v32 = vld [vmem:[%s5062_s11] ss:$0 sm:$0xff] }
0x1167   :  { %3556 = vpow2.f32 %v3335_v55 }
0x116c   :  { %v3555_v61 = vpop.eup %3554 }
0x116d   :  { %1497 = vrot.lane.b32.xlu0 %v3555_v61, %s4063_s22  ;;  %v3557_v33 = vpop.eup %3556 }
0x116e   :  { %v1565_v34 = vadd.f32 1.0, %v3557_v33 }
0x1170   :  { %3558 = vrcp.f32 %v1565_v34  ;;  %v1577_v51 = vand.u32 2147483648, %v1565_v34  ;;  %vm1571_vm2 = vweird.f32 %v1565_v34  ;;  %v1575_v52 = vand.u32 2147483647, %v1565_v34 }
0x1171   :  { %3560 = vpow2.f32 %v3331_v39 }
0x1172   :  { %v1578_v23 = vor.u32 1.1754944e-38, %v1577_v51  ;;  %vm1576_vm4 = vcmp.eq.f32.partialorder %v1575_v52, 8.507059e+37 }
0x1176   :  { %v3559_v35 = vpop.eup %3558 }
0x1177   :  { %v1567_v48 = vmul.f32 %v3559_v35, %v1565_v34  ;;  %vm1572_vm1 = vweird.f32 %v3559_v35  ;;  %v3561_v0 = vpop.eup %3560 }
0x1178   :  { %vm1573_vm3 = vmor %vm1571_vm2, %vm1572_vm1  ;;  %v1478_v2 = vadd.f32 1.0, %v3561_v0 }
0x1179   :  { %v1568_v36 = vsub.f32 1.0, %v1567_v48 }
0x117a   :  { %3562 = vrcp.f32 %v1478_v2  ;;  %v1490_v8 = vand.u32 2147483648, %v1478_v2  ;;  %vm1484_vm6 = vweird.f32 %v1478_v2  ;;  %v1488_v11 = vand.u32 2147483647, %v1478_v2 }
0x117b   :  { %v1569_v37 = vmul.f32 %v3559_v35, %v1568_v36 }
0x117c   :  { %v1491_v59 = vor.u32 1.1754944e-38, %v1490_v8  ;;  %vm1489_vm8 = vcmp.eq.f32.partialorder %v1488_v11, 8.507059e+37 }
0x117d   :  { %v1570_v50 = vadd.f32 %v3559_v35, %v1569_v37 }
0x117f   :  { %v1574_v54 = vsel %vm1573_vm3, %v3559_v35, %v1570_v50 }
0x1180   :  { %v1579_v60 = vsel %vm1576_vm4, %v1578_v23, %v1574_v54  ;;  %v3563_v4 = vpop.eup %3562 }
0x1181   :  { %v1480_v53 = vmul.f32 %v3563_v4, %v1478_v2  ;;  %vm1485_vm5 = vweird.f32 %v3563_v4  ;;  %v1582_v17 = vmul.f32 %v1579_v60, %v4553_v18 }
0x1182   :  { %vm1486_vm7 = vmor %vm1484_vm6, %vm1485_vm5 }
0x1183   :  { %v1481_v5 = vsub.f32 1.0, %v1480_v53 }
0x1185   :  { %v1482_v6 = vmul.f32 %v3563_v4, %v1481_v5 }
0x1187   :  { %v1483_v7 = vadd.f32 %v3563_v4, %v1482_v6 }
0x1189   :  { %v1487_v13 = vsel %vm1486_vm7, %v3563_v4, %v1483_v7  ;;  %vm1896_vm7 = vcmask 254976  }
0x118a   :  { %v1492_v15 = vsel %vm1489_vm8, %v1491_v59, %v1487_v13 }
0x118b   :  { %v1495_v19 = vmul.f32 %v1492_v15, %v4557_v46  ;;  %v4595_v46 = vld [vmem:[#allocation15 + $0x18] sm:$0xff] }
0x118c   :  { %1728 = vmatpush.msra.mxu1 %v4595_v46 }
0x118e   :  { %1729 = vmatpush.msra.mxu1 %v4601_v47 }
0x1190   :  { %1730 = vmatpush.msra.mxu1 %v4605_v3 }
0x1192   :  { %1731 = vmatpush.msra.mxu1 %v4613_v49 }
0x1194   :  { %1941 = vmatpush.msrb.mxu1 %v4593_v21 }
0x1196   :  { %1942 = vmatpush.msrb.mxu1 %v4597_v45 }
0x1198   :  { %1943 = vmatpush.msrb.mxu1 %v4603_v22 }
0x11ba   :  { %v1585_v58 = vpop.permute.xlu1 %1584 }
0x11bb   :  { %v1587_v27 = vmul.f32 %v1585_v58, %v1579_v60 }
0x11bd   :  { %1589 = vrot.lane.b32.xlu0 %v1587_v27, %s4063_s22 }
0x11df   :  { %v1498_v62 = vpop.permute.xlu0 %1497 }
0x11e0   :  { %v1500_v38 = vmul.f32 %v1498_v62, %v1492_v15 }
0x11e2   :  { %1502 = vrot.lane.b32.xlu2 %v1500_v38, %s4063_s22 }
0x122f   :  { %v1590_v16 = vpop.permute.xlu0 %1589 }
0x1230   :  { %v4579_v42 = vadd.f32 %v1590_v16, %v1582_v17 }
0x1232   :  { %3564 = vtanh.f32 %v4579_v42 }
0x1238   :  { %v3565_v44 = vpop.eup %3564 }
0x1239   :  { %1595 = vrot.lane.b32.xlu2 %v3565_v44, %s4063_s22 }
0x123c   :  { %v1503_v20 = vpop.permute.xlu2 %1502 }
0x123d   :  { %v4584_v41 = vadd.f32 %v1503_v20, %v1495_v19 }
0x123f   :  { %3566 = vtanh.f32 %v4584_v41 }
0x1241   :  { %1688 = vperm.xlu2 %3436, %v4588_v43  }
0x1245   :  { %v3567_v9 = vpop.eup %3566 }
0x1246   :  { %1508 = vrot.lane.b32.xlu1 %v3567_v9, %s4063_s22 }
0x1249   :  { %3437 = vset.pattern.permute.xlu2 %v4064_v40  ;;  %v4611_v40 = vld [vmem:[#allocation16] sm:$0xff] }
0x124a   :  { %1708 = vmatpush.msra.mxu0 %v4611_v40  ;;  %1944 = vmatpush.msrb.mxu1 %v4611_v40 }
0x1293   :  { %v1596_v18 = vpop.permute.xlu2 %1595 }
0x1294   :  { %v1598_v63 = vmul.f32 %v1596_v18, %v1579_v60 }
0x1296   :  { %1625 = vrot.lane.b32.xlu1 %v1598_v63, %s4065_s29 }
0x129b   :  { %v1689_v26 = vpop.permute.xlu2 %1688 }
0x129c   :  { %vm1690_vm9 = vcmp.eq.s32.totalorder %v4268_v12, %v1689_v26 }
0x129d   :  { %v3339_v28 = vsel %vm1690_vm9, 1.0, %v4062_v10 }
0x129e   :  { %3341 = vmatmul.msk.f32.vlgmr.msra.gmra.mxu1 %vm288_vm0, %v3339_v28 }
0x12b8   :  { %v1509_v24 = vpop.permute.xlu1 %1508 }
0x12b9   :  { %v1511_v25 = vmul.f32 %v1509_v24, %v1492_v15 }
0x12bb   :  { %1600 = vrot.lane.b32.xlu0 %v1511_v25, %s4065_s29 }
0x1308   :  { %v1626_v29 = vpop.permute.xlu1 %1625 }
0x1309   :  { %3337 = vmatmul.msk.f32.vlgmr.msrb.gmra.mxu3 %vm288_vm0, %v1626_v29  ;;  %3340 = vmatmul.msk.f32.vlgmr.msra.gmra.mxu0 %vm288_vm0, %v1626_v29 }
0x131b   :  { %v1733_v31 = vpop.f32.mrf.mxu1 }
0x132d   :  { %v1601_v57 = vpop.permute.xlu0 %1600 }
0x132e   :  { %3336 = vmatmul.msk.f32.vlgmr.msrb.gmra.mxu2 %vm288_vm0, %v1601_v57 }
0x1386   :  { %v1710_v61 = vpop.f32.mrf.mxu0 }
0x1387   :  { %v1734_v55 = vadd.f32 %v1733_v31, %v1710_v61 }
0x1389   :  { %v1739_v33 = vadd.f32 %v4631_v32, %v1734_v55  ;;  %v4650_v55 = vld [vmem:[#allocation18 + $0x18] sm:$0xff] }
0x138a   :  { %1819 = vmatpush.msra.mxu3 %v4650_v55 }
0x138b   :  { %3568 = vtanh.f32 %v1739_v33  ;;  %v3342_v50 = vmul.f32 -1.442695, %v1739_v33  ;;  %v4652_v33 = vld [vmem:[#allocation18 + $0x10] sm:$0xff] }
0x138c   :  { %v1646_v35 = vpop.f32.mrf.mxu3  ;;  %1820 = vmatpush.msra.mxu3 %v4652_v33 }
0x1391   :  { %v3569_v34 = vpop.eup %3568 }
0x1392   :  { %1762 = vrot.lane.b32.xlu1 %v3569_v34, %s4063_s22  ;;  %v4655_v34 = vld [vmem:[#allocation18 + $0x8] sm:$0xff] }
0x1393   :  { %1821 = vmatpush.msra.mxu3 %v4655_v34 }
0x13b1   :  { %v1621_v48 = vpop.f32.mrf.mxu2 }
0x13b2   :  { %v1647_v36 = vadd.f32 %v1646_v35, %v1621_v48 }
0x13b4   :  { %v1649_v37 = vadd.f32 %v4546_v30, %v1647_v36  ;;  %v4663_v36 = vld [vmem:[#allocation19 + $0x18] sm:$0xff] }
0x13b5   :  { %1794 = vmatpush.msra.mxu2 %v4663_v36 }
0x13b6   :  { %3570 = vtanh.f32 %v1649_v37  ;;  %v3338_v4 = vmul.f32 -1.442695, %v1649_v37  ;;  %v4665_v37 = vld [vmem:[#allocation19 + $0x10] sm:$0xff] }
0x13b7   :  { %3572 = vpow2.f32 %v3342_v50  ;;  %1795 = vmatpush.msra.mxu2 %v4665_v37  ;;  %v4673_v50 = vld [vmem:[#allocation19] sm:$0xff] }
0x13bc   :  { %v3571_v39 = vpop.eup %3570 }
0x13bd   :  { %1672 = vrot.lane.b32.xlu0 %v3571_v39, %s4063_s22  ;;  %v3573_v51 = vpop.eup %3572  ;;  %v4669_v39 = vld [vmem:[#allocation19 + $0x8] sm:$0xff] }
0x13be   :  { %v1743_v52 = vadd.f32 1.0, %v3573_v51  ;;  %1796 = vmatpush.msra.mxu2 %v4669_v39 }
0x13c0   :  { %3574 = vrcp.f32 %v1743_v52  ;;  %v1755_v0 = vand.u32 2147483648, %v1743_v52  ;;  %vm1749_vm11 = vweird.f32 %v1743_v52  ;;  %v1753_v2 = vand.u32 2147483647, %v1743_v52  ;;  %1797 = vmatpush.msra.mxu2 %v4673_v50 }
0x13c1   :  { %3576 = vpow2.f32 %v3338_v4 }
0x13c2   :  { %v1756_v53 = vor.u32 1.1754944e-38, %v1755_v0  ;;  %vm1754_vm13 = vcmp.eq.f32.partialorder %v1753_v2, 8.507059e+37  ;;  %1964 = vmatpush.msrb.mxu2 %v4595_v46 }
0x13c4   :  { %1965 = vmatpush.msrb.mxu2 %v4601_v47 }
0x13c6   :  { %v3575_v54 = vpop.eup %3574  ;;  %1966 = vmatpush.msrb.mxu2 %v4605_v3 }
0x13c7   :  { %v1745_v23 = vmul.f32 %v3575_v54, %v1743_v52  ;;  %vm1750_vm10 = vweird.f32 %v3575_v54  ;;  %v3577_v8 = vpop.eup %3576 }
0x13c8   :  { %vm1751_vm12 = vmor %vm1749_vm11, %vm1750_vm10  ;;  %v1653_v11 = vadd.f32 1.0, %v3577_v8  ;;  %1967 = vmatpush.msrb.mxu2 %v4613_v49 }
0x13c9   :  { %v1746_v58 = vsub.f32 1.0, %v1745_v23 }
0x13ca   :  { %3578 = vrcp.f32 %v1653_v11  ;;  %v1665_v17 = vand.u32 2147483648, %v1653_v11  ;;  %vm1659_vm15 = vweird.f32 %v1653_v11  ;;  %v1663_v16 = vand.u32 2147483647, %v1653_v11 }
0x13cb   :  { %v1747_v60 = vmul.f32 %v3575_v54, %v1746_v58 }
0x13cc   :  { %v1666_v19 = vor.u32 1.1754944e-38, %v1665_v17  ;;  %vm1664_vm2 = vcmp.eq.f32.partialorder %v1663_v16, 8.507059e+37 }
0x13cd   :  { %v1748_v27 = vadd.f32 %v3575_v54, %v1747_v60 }
0x13cf   :  { %v1752_v30 = vsel %vm1751_vm12, %v3575_v54, %v1748_v27  ;;  %v4697_v54 = vld [vmem:[%s5065_s14] ss:$0 sm:$0xff] }
0x13d0   :  { %v1757_v6 = vsel %vm1754_vm13, %v1756_v53, %v1752_v30  ;;  %v3579_v13 = vpop.eup %3578 }
0x13d1   :  { %v1655_v59 = vmul.f32 %v3579_v13, %v1653_v11  ;;  %vm1660_vm14 = vweird.f32 %v3579_v13  ;;  %v1760_v63 = vmul.f32 %v1757_v6, %v4579_v42 }
0x13d2   :  { %vm1661_vm1 = vmor %vm1659_vm15, %vm1660_vm14 }
0x13d3   :  { %v1656_v62 = vsub.f32 1.0, %v1655_v59 }
0x13d5   :  { %v1657_v15 = vmul.f32 %v3579_v13, %v1656_v62 }
0x13d7   :  { %v1658_v38 = vadd.f32 %v3579_v13, %v1657_v15 }
0x13d9   :  { %v1662_v44 = vsel %vm1661_vm1, %v3579_v13, %v1658_v38 }
0x13da   :  { %v1667_v9 = vsel %vm1664_vm2, %v1666_v19, %v1662_v44 }
0x13db   :  { %v1670_v28 = vmul.f32 %v1667_v9, %v4584_v41  ;;  %v4658_v41 = vld [vmem:[#allocation18] sm:$0xff] }
0x13dc   :  { %1822 = vmatpush.msra.mxu3 %v4658_v41 }
0x13de   :  { %2022 = vmatpush.msrb.mxu3 %v4663_v36 }
0x13e0   :  { %2023 = vmatpush.msrb.mxu3 %v4665_v37 }
0x13e2   :  { %2024 = vmatpush.msrb.mxu3 %v4669_v39 }
0x13e4   :  { %2025 = vmatpush.msrb.mxu3 %v4673_v50 }
0x1404   :  { %v1763_v5 = vpop.permute.xlu1 %1762 }
0x1405   :  { %v1765_v7 = vmul.f32 %v1763_v5, %v1757_v6 }
0x1407   :  { %1767 = vrot.lane.b32.xlu0 %v1765_v7, %s4063_s22 }
0x142f   :  { %v1673_v20 = vpop.permute.xlu0 %1672 }
0x1430   :  { %v1675_v18 = vmul.f32 %v1673_v20, %v1667_v9 }
0x1432   :  { %1677 = vrot.lane.b32.xlu2 %v1675_v18, %s4063_s22  ;;  %v4709_v18 = vld [vmem:[#allocation21 + $0x10] sm:$0xff] }
0x1479   :  { %v1768_v24 = vpop.permute.xlu0 %1767 }
0x147a   :  { %v4640_v25 = vadd.f32 %v1768_v24, %v1760_v63  ;;  %v4713_v63 = vld [vmem:[#allocation21 + $0x8] sm:$0xff]  ;;  %v4717_v24 = vld [vmem:[#allocation21] sm:$0xff] }
0x147c   :  { %3580 = vtanh.f32 %v4640_v25 }
0x1482   :  { %v3581_v26 = vpop.eup %3580 }
0x1483   :  { %1773 = vrot.lane.b32.xlu2 %v3581_v26, %s4063_s22 }
0x148c   :  { %v1678_v29 = vpop.permute.xlu2 %1677 }
0x148d   :  { %v4645_v57 = vadd.f32 %v1678_v29, %v1670_v28 }
0x148f   :  { %3582 = vtanh.f32 %v4645_v57 }
0x1495   :  { %v3583_v31 = vpop.eup %3582 }
0x1496   :  { %1683 = vrot.lane.b32.xlu1 %v3583_v31, %s4063_s22 }
0x14dd   :  { %v1774_v61 = vpop.permute.xlu2 %1773 }
0x14de   :  { %v1776_v42 = vmul.f32 %v1774_v61, %v1757_v6 }
0x14e0   :  { %1803 = vrot.lane.b32.xlu1 %v1776_v42, %s4065_s29 }
0x1508   :  { %v1684_v35 = vpop.permute.xlu1 %1683 }
0x1509   :  { %v1686_v48 = vmul.f32 %v1684_v35, %v1667_v9  ;;  %v4707_v9 = vld [vmem:[#allocation21 + $0x18] sm:$0xff] }
0x150a   :  { %1888 = vmatpush.msrb.mxu0 %v4707_v9  ;;  %2110 = vmatpush.msra.mxu1 %v4707_v9 }
0x150b   :  { %1778 = vrot.lane.b32.xlu0 %v1686_v48, %s4065_s29 }
0x150c   :  { %1889 = vmatpush.msrb.mxu0 %v4709_v18  ;;  %2111 = vmatpush.msra.mxu1 %v4709_v18 }
0x150e   :  { %1890 = vmatpush.msrb.mxu0 %v4713_v63  ;;  %2112 = vmatpush.msra.mxu1 %v4713_v63 }
0x1510   :  { %1891 = vmatpush.msrb.mxu0 %v4717_v24  ;;  %2113 = vmatpush.msra.mxu1 %v4717_v24 }
0x1512   :  { %2047 = vmatpush.msra.mxu0 %v4650_v55 }
0x1514   :  { %2048 = vmatpush.msra.mxu0 %v4652_v33 }
0x1516   :  { %2049 = vmatpush.msra.mxu0 %v4655_v34 }
0x1518   :  { %2050 = vmatpush.msra.mxu0 %v4658_v41 }
0x1552   :  { %v1804_v51 = vpop.permute.xlu1 %1803 }
0x1553   :  { %3344 = vmatmul.msk.f32.vlgmr.msra.gmra.mxu3 %vm288_vm0, %v1804_v51  ;;  %3349 = vmatmul.msk.f32.vlgmr.msrb.gmra.mxu1 %vm288_vm0, %v1804_v51 }
0x1554   :  { %2185 = vmatpush.msra.mxu3 %v4595_v46  ;;  %2268 = vmatpush.msrb.mxu1 %v4650_v55 }
0x1556   :  { %2186 = vmatpush.msra.mxu3 %v4601_v47  ;;  %2269 = vmatpush.msrb.mxu1 %v4652_v33 }
0x1558   :  { %2187 = vmatpush.msra.mxu3 %v4605_v3  ;;  %2270 = vmatpush.msrb.mxu1 %v4655_v34 }
0x155a   :  { %2188 = vmatpush.msra.mxu3 %v4613_v49  ;;  %2271 = vmatpush.msrb.mxu1 %v4658_v41 }
0x157d   :  { %v1779_v52 = vpop.permute.xlu0 %1778 }
0x157e   :  { %3343 = vmatmul.msk.f32.vlgmr.msra.gmra.mxu2 %vm288_vm0, %v1779_v52 }
0x157f   :  { %2162 = vmatpush.msra.mxu2 %v4593_v21 }
0x1581   :  { %2163 = vmatpush.msra.mxu2 %v4597_v45 }
0x1583   :  { %2164 = vmatpush.msra.mxu2 %v4603_v22 }
0x1585   :  { %2165 = vmatpush.msra.mxu2 %v4611_v40 }
0x15d6   :  { %v1824_v23 = vpop.f32.mrf.mxu3 }
0x1601   :  { %v1799_v58 = vpop.f32.mrf.mxu2 }
0x1602   :  { %v1825_v60 = vadd.f32 %v1824_v23, %v1799_v58 }
0x1604   :  { %v1830_v27 = vadd.f32 %v4697_v54, %v1825_v60 }
0x1606   :  { %3584 = vtanh.f32 %v1830_v27  ;;  %v3345_v2 = vmul.f32 -1.442695, %v1830_v27 }
0x1608   :  { %3586 = vpow2.f32 %v3345_v2 }
0x160c   :  { %v3585_v0 = vpop.eup %3584 }
0x160d   :  { %1853 = vrot.lane.b32.xlu2 %v3585_v0, %s4063_s22 }
0x160e   :  { %v3587_v30 = vpop.eup %3586 }
0x160f   :  { %v1834_v4 = vadd.f32 1.0, %v3587_v30  ;;  %v1920_v30 = vstv %s1919_s23 }
0x1610   :  { %vm1921_vm10 = vcmp.eq.s32.totalorder %v1920_v30, 1 }
0x1611   :  { %3588 = vrcp.f32 %v1834_v4  ;;  %v1846_v11 = vand.u32 2147483648, %v1834_v4  ;;  %vm1840_vm4 = vweird.f32 %v1834_v4  ;;  %v1844_v13 = vand.u32 2147483647, %v1834_v4 }
0x1613   :  { %v1847_v62 = vor.u32 1.1754944e-38, %v1846_v11  ;;  %vm1845_vm6 = vcmp.eq.f32.partialorder %v1844_v13, 8.507059e+37  ;;  %v1946_v13 = vpop.f32.mrf.mxu1 }
0x1617   :  { %v3589_v53 = vpop.eup %3588 }
0x1618   :  { %v1836_v5 = vmul.f32 %v3589_v53, %v1834_v4  ;;  %vm1841_vm3 = vweird.f32 %v3589_v53 }
0x1619   :  { %vm1842_vm5 = vmor %vm1840_vm4, %vm1841_vm3 }
0x161a   :  { %v1837_v6 = vsub.f32 1.0, %v1836_v5 }
0x161c   :  { %v1838_v7 = vmul.f32 %v3589_v53, %v1837_v6 }
0x161e   :  { %v1839_v8 = vadd.f32 %v3589_v53, %v1838_v7 }
0x1620   :  { %v1843_v59 = vsel %vm1842_vm5, %v3589_v53, %v1839_v8 }
0x1621   :  { %v1848_v38 = vsel %vm1845_vm6, %v1847_v62, %v1843_v59 }
0x1622   :  { %v1851_v16 = vmul.f32 %v1848_v38, %v4645_v57  ;;  %v4745_v57 = vld [vmem:[%s5067_s16] ss:$0 sm:$0xff] }
0x1667   :  { %v1854_v15 = vpop.permute.xlu2 %1853 }
0x1668   :  { %v1856_v17 = vmul.f32 %v1854_v15, %v1848_v38 }
0x166a   :  { %1858 = vrot.lane.b32.xlu0 %v1856_v17, %s4063_s22 }
0x16dc   :  { %v1859_v44 = vpop.permute.xlu0 %1858 }
0x16dd   :  { %v4703_v19 = vadd.f32 %v1859_v44, %v1851_v16 }
0x16df   :  { %3590 = vtanh.f32 %v4703_v19 }
0x16e5   :  { %v3591_v20 = vpop.eup %3590 }
0x16e6   :  { %1864 = vrot.lane.b32.xlu1 %v3591_v20, %s4063_s22 }
0x1758   :  { %v1865_v26 = vpop.permute.xlu1 %1864 }
0x1759   :  { %v1867_v28 = vmul.f32 %v1865_v26, %v1848_v38 }
0x175b   :  { %1872 = vrot.lane.b32.xlu2 %v1867_v28, %s4065_s29 }
0x17b5   :  { %v1873_v29 = vpop.permute.xlu2 %1872 }
0x17b6   :  { %3346 = vmatmul.msk.f32.vlgmr.msrb.gmra.mxu0 %vm288_vm0, %v1873_v29  ;;  %3352 = vmatmul.msk.f32.vlgmr.msrb.gmra.mxu3 %vm288_vm0, %v1873_v29 }
0x17b7   :  { %2243 = vmatpush.msrb.mxu0 %v4663_v36  ;;  %2383 = vmatpush.msrb.mxu3 %v4593_v21 }
0x17b9   :  { %2244 = vmatpush.msrb.mxu0 %v4665_v37  ;;  %2384 = vmatpush.msrb.mxu3 %v4597_v45 }
0x17bb   :  { %2245 = vmatpush.msrb.mxu0 %v4669_v39  ;;  %2385 = vmatpush.msrb.mxu3 %v4603_v22 }
0x17bd   :  { %2246 = vmatpush.msrb.mxu0 %v4673_v50  ;;  %2386 = vmatpush.msrb.mxu3 %v4611_v40 }
0x1833   :  { %v1893_v31 = vpop.f32.mrf.mxu0 }
0x1834   :  { %v4748_v61 = vadd.f32 %v4745_v57, %v1893_v31 }
0x1836   :  { %v1897_v42 = vsel %vm1896_vm7, %v4748_v61, -inf }
0x1837   :  { %1898 = vmax.xlane.f32.xlu0 %v1897_v42 }
0x18aa   :  { %v1899_v35 = vpop.xlane.xlu0 %1898 }
0x18ab   :  { %vm1900_vm8 = vcmp.eq.f32.partialorder %v4748_v61, %v1899_v35 }
0x18ac   :  { %v1901_v48 = vsel %vm1900_vm8, %v4268_v12, 32 }
0x18ad   :  { %v1902_v51 = vsel %vm1896_vm7, %v1901_v48, 2147483647 }
0x18ae   :  { %v1904_v52 = vshra.s32 %v1902_v51, 16  ;;  %v1903_v58 = vand.u32 65535, %v1902_v51 }
0x18b0   :  { %v1906_v23 = vcvt.s32.f32 %v1904_v52  ;;  %v1905_v27 = vcvt.s32.f32 %v1903_v58 }
0x18b2   :  { %1907 = vmin.xlane.f32.xlu1 %v1906_v23 }
0x1925   :  { %v1908_v60 = vpop.xlane.xlu1 %1907 }
0x1926   :  { %vm1909_vm9 = vcmp.eq.f32.partialorder %v1906_v23, %v1908_v60  ;;  %v1914_v2 = vcvt.f32.s32 %v1908_v60 }
0x1927   :  { %v1910_v0 = vsel %vm1909_vm9, %v1905_v27, inf }
0x1928   :  { %1911 = vmin.xlane.f32.xlu2 %v1910_v0  ;;  %v1915_v53 = vshll.u32 %v1914_v2, 16 }
0x199b   :  { %v1912_v4 = vpop.xlane.xlu2 %1911 }
0x199c   :  { %v1913_v5 = vcvt.f32.s32 %v1912_v4 }
0x199e   :  { %v1916_v6 = vadd.s32 %v1915_v53, %v1913_v5 }
0x19a0   :  { %v1922_v7 = vsel %vm1921_vm10, %v4588_v43, %v1916_v6 }
0x19a1   :  { %1924 = vperm.xlu2 %3437, %v1922_v7  }
0x19a9   :  { %3441 = vset.pattern.permute.xlu2 %v4069_v1 }
0x19fb   :  { %v1925_v8 = vpop.permute.xlu2 %1924 }
0x19fc   :  { %vm1926_vm11 = vcmp.eq.s32.totalorder %v4268_v12, %v1925_v8 }
0x19fd   :  { %v3348_v11 = vsel %vm1926_vm11, 1.0, %v4062_v10 }
0x19fe   :  { %3350 = vmatmul.msk.f32.vlgmr.msrb.gmra.mxu2 %vm288_vm0, %v3348_v11 }
0x19ff   :  { %2331 = vmatpush.msrb.mxu2 %v4707_v9 }
0x1a01   :  { %2332 = vmatpush.msrb.mxu2 %v4709_v18 }
0x1a03   :  { %2333 = vmatpush.msrb.mxu2 %v4713_v63 }
0x1a05   :  { %2334 = vmatpush.msrb.mxu2 %v4717_v24 }
0x1a81   :  { %v1969_v59 = vpop.f32.mrf.mxu2 }
0x1a82   :  { %v1970_v62 = vadd.f32 %v1969_v59, %v1946_v13 }
0x1a84   :  { %v1972_v1 = vadd.f32 %v4631_v32, %v1970_v62 }
0x1a86   :  { %3592 = vtanh.f32 %v1972_v1  ;;  %v3351_v38 = vmul.f32 -1.442695, %v1972_v1 }
0x1a88   :  { %3594 = vpow2.f32 %v3351_v38 }
0x1a8c   :  { %v3593_v15 = vpop.eup %3592 }
0x1a8d   :  { %1995 = vrot.lane.b32.xlu0 %v3593_v15, %s4063_s22 }
0x1a8e   :  { %v3595_v17 = vpop.eup %3594 }
0x1a8f   :  { %v1976_v16 = vadd.f32 1.0, %v3595_v17 }
0x1a91   :  { %3596 = vrcp.f32 %v1976_v16  ;;  %v1988_v31 = vand.u32 2147483648, %v1976_v16  ;;  %vm1982_vm13 = vweird.f32 %v1976_v16  ;;  %v1986_v42 = vand.u32 2147483647, %v1976_v16 }
0x1a93   :  { %v1989_v48 = vor.u32 1.1754944e-38, %v1988_v31  ;;  %vm1987_vm15 = vcmp.eq.f32.partialorder %v1986_v42, 8.507059e+37 }
0x1a97   :  { %v3597_v44 = vpop.eup %3596 }
0x1a98   :  { %v1978_v20 = vmul.f32 %v3597_v44, %v1976_v16  ;;  %vm1983_vm12 = vweird.f32 %v3597_v44 }
0x1a99   :  { %vm1984_vm14 = vmor %vm1982_vm13, %vm1983_vm12 }
0x1a9a   :  { %v1979_v26 = vsub.f32 1.0, %v1978_v20 }
0x1a9c   :  { %v1980_v28 = vmul.f32 %v3597_v44, %v1979_v26 }
0x1a9e   :  { %v1981_v29 = vadd.f32 %v3597_v44, %v1980_v28 }
0x1aa0   :  { %v1985_v35 = vsel %vm1984_vm14, %v3597_v44, %v1981_v29 }
0x1aa1   :  { %v1990_v52 = vsel %vm1987_vm15, %v1989_v48, %v1985_v35 }
0x1aa2   :  { %v1993_v58 = vmul.f32 %v1990_v52, %v4640_v25  ;;  %v2027_v25 = vpop.f32.mrf.mxu3 }
0x1aff   :  { %v1996_v51 = vpop.permute.xlu0 %1995 }
0x1b00   :  { %v1998_v23 = vmul.f32 %v1996_v51, %v1990_v52 }
0x1b02   :  { %2000 = vrot.lane.b32.xlu1 %v1998_v23, %s4063_s22 }
0x1b74   :  { %v2001_v60 = vpop.permute.xlu1 %2000 }
0x1b75   :  { %v4768_v27 = vadd.f32 %v2001_v60, %v1993_v58 }
0x1b77   :  { %3598 = vtanh.f32 %v4768_v27 }
0x1b7d   :  { %v3599_v0 = vpop.eup %3598 }
0x1b7e   :  { %2006 = vrot.lane.b32.xlu0 %v3599_v0, %s4063_s22 }
0x1bf0   :  { %v2007_v2 = vpop.permute.xlu0 %2006 }
0x1bf1   :  { %v2009_v30 = vmul.f32 %v2007_v2, %v1990_v52 }
0x1bf3   :  { %2031 = vrot.lane.b32.xlu2 %v2009_v30, %s4065_s29 }
0x1c4d   :  { %v2032_v4 = vpop.permute.xlu2 %2031 }
0x1c4e   :  { %3353 = vmatmul.msk.f32.vlgmr.msra.gmra.mxu0 %vm288_vm0, %v2032_v4  ;;  %3358 = vmatmul.msk.f32.vlgmr.msra.gmra.mxu2 %vm288_vm0, %v2032_v4 }
0x1c4f   :  { %2406 = vmatpush.msra.mxu0 %v4595_v46  ;;  %2489 = vmatpush.msra.mxu2 %v4650_v55 }
0x1c51   :  { %2407 = vmatpush.msra.mxu0 %v4601_v47  ;;  %2490 = vmatpush.msra.mxu2 %v4652_v33 }
0x1c53   :  { %2408 = vmatpush.msra.mxu0 %v4605_v3  ;;  %2491 = vmatpush.msra.mxu2 %v4655_v34 }
0x1c55   :  { %2409 = vmatpush.msra.mxu0 %v4613_v49  ;;  %2492 = vmatpush.msra.mxu2 %v4658_v41 }
0x1ccb   :  { %v2052_v53 = vpop.f32.mrf.mxu0 }
0x1ccc   :  { %v2053_v5 = vadd.f32 %v2052_v53, %v2027_v25 }
0x1cce   :  { %v2055_v6 = vadd.f32 %v4697_v54, %v2053_v5 }
0x1cd0   :  { %3600 = vtanh.f32 %v2055_v6  ;;  %v3354_v8 = vmul.f32 -1.442695, %v2055_v6 }
0x1cd2   :  { %3602 = vpow2.f32 %v3354_v8 }
0x1cd6   :  { %v3601_v7 = vpop.eup %3600 }
0x1cd7   :  { %2078 = vrot.lane.b32.xlu1 %v3601_v7, %s4063_s22 }
0x1cd8   :  { %v3603_v11 = vpop.eup %3602 }
0x1cd9   :  { %v2059_v13 = vadd.f32 1.0, %v3603_v11  ;;  %v2141_v11 = vstv %s2140_s4 }
0x1cda   :  { %vm2142_vm8 = vcmp.eq.s32.totalorder %v2141_v11, 1 }
0x1cdb   :  { %3604 = vrcp.f32 %v2059_v13  ;;  %v2071_v17 = vand.u32 2147483648, %v2059_v13  ;;  %vm2065_vm2 = vweird.f32 %v2059_v13  ;;  %v2069_v16 = vand.u32 2147483647, %v2059_v13 }
0x1cdd   :  { %v2072_v20 = vor.u32 1.1754944e-38, %v2071_v17  ;;  %vm2070_vm4 = vcmp.eq.f32.partialorder %v2069_v16, 8.507059e+37  ;;  %v2167_v16 = vpop.f32.mrf.mxu2 }
0x1ce1   :  { %v3605_v59 = vpop.eup %3604 }
0x1ce2   :  { %v2061_v62 = vmul.f32 %v3605_v59, %v2059_v13  ;;  %vm2066_vm1 = vweird.f32 %v3605_v59 }
0x1ce3   :  { %vm2067_vm3 = vmor %vm2065_vm2, %vm2066_vm1 }
0x1ce4   :  { %v2062_v1 = vsub.f32 1.0, %v2061_v62 }
0x1ce6   :  { %v2063_v15 = vmul.f32 %v3605_v59, %v2062_v1 }
0x1ce8   :  { %v2064_v38 = vadd.f32 %v3605_v59, %v2063_v15 }
0x1cea   :  { %v2068_v44 = vsel %vm2067_vm3, %v3605_v59, %v2064_v38 }
0x1ceb   :  { %v2073_v28 = vsel %vm2070_vm4, %v2072_v20, %v2068_v44 }
0x1cec   :  { %v2076_v31 = vmul.f32 %v2073_v28, %v4703_v19 }
0x1d49   :  { %v2079_v26 = vpop.permute.xlu1 %2078 }
0x1d4a   :  { %v2081_v29 = vmul.f32 %v2079_v26, %v2073_v28 }
0x1d4c   :  { %2083 = vrot.lane.b32.xlu0 %v2081_v29, %s4063_s22 }
0x1dbe   :  { %v2084_v42 = vpop.permute.xlu0 %2083 }
0x1dbf   :  { %v4787_v35 = vadd.f32 %v2084_v42, %v2076_v31 }
0x1dc1   :  { %3606 = vtanh.f32 %v4787_v35 }
0x1dc7   :  { %v3607_v48 = vpop.eup %3606 }
0x1dc8   :  { %2089 = vrot.lane.b32.xlu2 %v3607_v48, %s4063_s22 }
0x1e22   :  { %v2090_v51 = vpop.permute.xlu2 %2089 }
0x1e23   :  { %v2092_v52 = vmul.f32 %v2090_v51, %v2073_v28 }
0x1e25   :  { %2094 = vrot.lane.b32.xlu1 %v2092_v52, %s4065_s29 }
0x1e97   :  { %v2095_v23 = vpop.permute.xlu1 %2094 }
0x1e98   :  { %3355 = vmatmul.msk.f32.vlgmr.msra.gmra.mxu1 %vm288_vm0, %v2095_v23  ;;  %3361 = vmatmul.msk.f32.vlgmr.msrb.gmra.mxu0 %vm288_vm0, %v2095_v23 }
0x1e99   :  { %2464 = vmatpush.msra.mxu1 %v4663_v36  ;;  %2604 = vmatpush.msrb.mxu0 %v4593_v21 }
0x1e9b   :  { %2465 = vmatpush.msra.mxu1 %v4665_v37  ;;  %2605 = vmatpush.msrb.mxu0 %v4597_v45 }
0x1e9d   :  { %2466 = vmatpush.msra.mxu1 %v4669_v39  ;;  %2606 = vmatpush.msrb.mxu0 %v4603_v22 }
0x1e9f   :  { %2467 = vmatpush.msra.mxu1 %v4673_v50  ;;  %2607 = vmatpush.msrb.mxu0 %v4611_v40 }
0x1f15   :  { %v2115_v19 = vpop.f32.mrf.mxu1 }
0x1f16   :  { %v4803_v58 = vadd.f32 %v4745_v57, %v2115_v19 }
0x1f18   :  { %v2118_v60 = vsel %vm1896_vm7, %v4803_v58, -inf }
0x1f19   :  { %2119 = vmax.xlane.f32.xlu0 %v2118_v60 }
0x1f8c   :  { %v2120_v0 = vpop.xlane.xlu0 %2119 }
0x1f8d   :  { %vm2121_vm5 = vcmp.eq.f32.partialorder %v4803_v58, %v2120_v0 }
0x1f8e   :  { %v2122_v2 = vsel %vm2121_vm5, %v4268_v12, 32 }
0x1f8f   :  { %v2123_v30 = vsel %vm1896_vm7, %v2122_v2, 2147483647 }
0x1f90   :  { %v2125_v4 = vshra.s32 %v2123_v30, 16  ;;  %v2124_v53 = vand.u32 65535, %v2123_v30 }
0x1f92   :  { %v2127_v25 = vcvt.s32.f32 %v2125_v4  ;;  %v2126_v6 = vcvt.s32.f32 %v2124_v53 }
0x1f94   :  { %2128 = vmin.xlane.f32.xlu2 %v2127_v25 }
0x2007   :  { %v2129_v5 = vpop.xlane.xlu2 %2128 }
0x2008   :  { %vm2130_vm6 = vcmp.eq.f32.partialorder %v2127_v25, %v2129_v5  ;;  %v2135_v8 = vcvt.f32.s32 %v2129_v5 }
0x2009   :  { %v2131_v7 = vsel %vm2130_vm6, %v2126_v6, inf }
0x200a   :  { %2132 = vmin.xlane.f32.xlu1 %v2131_v7  ;;  %v2136_v59 = vshll.u32 %v2135_v8, 16 }
0x207d   :  { %v2133_v13 = vpop.xlane.xlu1 %2132 }
0x207e   :  { %v2134_v62 = vcvt.f32.s32 %v2133_v13 }
0x2080   :  { %v2137_v1 = vadd.s32 %v2136_v59, %v2134_v62 }
0x2082   :  { %v2143_v15 = vsel %vm2142_vm8, %v4588_v43, %v2137_v1 }
0x2083   :  { %2145 = vperm.xlu0 %3438, %v2143_v15  }
0x208b   :  { %3440 = vset.pattern.permute.xlu0 %v4068_v56 }
0x20f5   :  { %v2146_v38 = vpop.permute.xlu0 %2145 }
0x20f6   :  { %vm2147_vm9 = vcmp.eq.s32.totalorder %v4268_v12, %v2146_v38 }
0x20f7   :  { %v3357_v17 = vsel %vm2147_vm9, 1.0, %v4062_v10 }
0x20f8   :  { %3359 = vmatmul.msk.f32.vlgmr.msra.gmra.mxu3 %vm288_vm0, %v3357_v17 }
0x20f9   :  { %2552 = vmatpush.msra.mxu3 %v4707_v9 }
0x20fb   :  { %2553 = vmatpush.msra.mxu3 %v4709_v18 }
0x20fd   :  { %2554 = vmatpush.msra.mxu3 %v4713_v63 }
0x20ff   :  { %2555 = vmatpush.msra.mxu3 %v4717_v24 }
0x217b   :  { %v2190_v43 = vpop.f32.mrf.mxu3 }
0x217c   :  { %v2191_v44 = vadd.f32 %v2190_v43, %v2167_v16 }
0x217e   :  { %v2193_v56 = vadd.f32 %v4631_v32, %v2191_v44 }
0x2180   :  { %3608 = vtanh.f32 %v2193_v56  ;;  %v3360_v26 = vmul.f32 -1.442695, %v2193_v56 }
0x2182   :  { %3610 = vpow2.f32 %v3360_v26 }
0x2186   :  { %v3609_v20 = vpop.eup %3608 }
0x2187   :  { %2216 = vrot.lane.b32.xlu2 %v3609_v20, %s4063_s22 }
0x2188   :  { %v3611_v28 = vpop.eup %3610 }
0x2189   :  { %v2197_v29 = vadd.f32 1.0, %v3611_v28 }
0x218b   :  { %3612 = vrcp.f32 %v2197_v29  ;;  %v2209_v23 = vand.u32 2147483648, %v2197_v29  ;;  %vm2203_vm11 = vweird.f32 %v2197_v29  ;;  %v2207_v19 = vand.u32 2147483647, %v2197_v29 }
0x218d   :  { %v2210_v0 = vor.u32 1.1754944e-38, %v2209_v23  ;;  %vm2208_vm13 = vcmp.eq.f32.partialorder %v2207_v19, 8.507059e+37 }
0x2191   :  { %v3613_v31 = vpop.eup %3612 }
0x2192   :  { %v2199_v42 = vmul.f32 %v3613_v31, %v2197_v29  ;;  %vm2204_vm10 = vweird.f32 %v3613_v31 }
0x2193   :  { %vm2205_vm12 = vmor %vm2203_vm11, %vm2204_vm10 }
0x2194   :  { %v2200_v48 = vsub.f32 1.0, %v2199_v42 }
0x2196   :  { %v2201_v51 = vmul.f32 %v3613_v31, %v2200_v48 }
0x2198   :  { %v2202_v52 = vadd.f32 %v3613_v31, %v2201_v51 }
0x219a   :  { %v2206_v60 = vsel %vm2205_vm12, %v3613_v31, %v2202_v52 }
0x219b   :  { %v2211_v30 = vsel %vm2208_vm13, %v2210_v0, %v2206_v60 }
0x219c   :  { %v2214_v25 = vmul.f32 %v2211_v30, %v4768_v27  ;;  %v2248_v27 = vpop.f32.mrf.mxu0 }
0x21e1   :  { %v2217_v2 = vpop.permute.xlu2 %2216 }
0x21e2   :  { %v2219_v4 = vmul.f32 %v2217_v2, %v2211_v30 }
0x21e4   :  { %2221 = vrot.lane.b32.xlu1 %v2219_v4, %s4063_s22 }
0x2256   :  { %v2222_v53 = vpop.permute.xlu1 %2221 }
0x2257   :  { %v4823_v5 = vadd.f32 %v2222_v53, %v2214_v25 }
0x2259   :  { %3614 = vtanh.f32 %v4823_v5 }
0x225f   :  { %v3615_v6 = vpop.eup %3614 }
0x2260   :  { %2227 = vrot.lane.b32.xlu2 %v3615_v6, %s4063_s22 }
0x22ba   :  { %v2228_v7 = vpop.permute.xlu2 %2227 }
0x22bb   :  { %v2230_v8 = vmul.f32 %v2228_v7, %v2211_v30  ;;  %v2362_v7 = vstv %s2361_s25 }
0x22bc   :  { %vm2363_vm5 = vcmp.eq.s32.totalorder %v2362_v7, 1 }
0x22bd   :  { %2252 = vrot.lane.b32.xlu1 %v2230_v8, %s4065_s29 }
0x232f   :  { %v2253_v11 = vpop.permute.xlu1 %2252 }
0x2330   :  { %3362 = vmatmul.msk.f32.vlgmr.msrb.gmra.mxu1 %vm288_vm0, %v2253_v11  ;;  %3367 = vmatmul.msk.f32.vlgmr.msrb.gmra.mxu3 %vm288_vm0, %v2253_v11 }
0x2331   :  { %2627 = vmatpush.msrb.mxu1 %v4595_v46  ;;  %2710 = vmatpush.msrb.mxu3 %v4650_v55 }
0x2333   :  { %2628 = vmatpush.msrb.mxu1 %v4601_v47  ;;  %2711 = vmatpush.msrb.mxu3 %v4652_v33 }
0x2335   :  { %2629 = vmatpush.msrb.mxu1 %v4605_v3  ;;  %2712 = vmatpush.msrb.mxu3 %v4655_v34 }
0x2337   :  { %2630 = vmatpush.msrb.mxu1 %v4613_v49  ;;  %2713 = vmatpush.msrb.mxu3 %v4658_v41 }
0x23ad   :  { %v2273_v13 = vpop.f32.mrf.mxu1 }
0x23ae   :  { %v2274_v59 = vadd.f32 %v2273_v13, %v2248_v27 }
0x23b0   :  { %v2276_v62 = vadd.f32 %v4697_v54, %v2274_v59  ;;  %v4865_v59 = vld [vmem:[#allocation7] sm:$0x3] }
0x23b2   :  { %3616 = vtanh.f32 %v2276_v62  ;;  %v3363_v47 = vmul.f32 -1.442695, %v2276_v62 }
0x23b4   :  { %3618 = vpow2.f32 %v3363_v47 }
0x23b8   :  { %v3617_v46 = vpop.eup %3616 }
0x23b9   :  { %2299 = vrot.lane.b32.xlu2 %v3617_v46, %s4063_s22 }
0x23ba   :  { %v3619_v1 = vpop.eup %3618 }
0x23bb   :  { %v2280_v15 = vadd.f32 1.0, %v3619_v1  ;;  %v2388_v1 = vpop.f32.mrf.mxu3 }
0x23bd   :  { %3620 = vrcp.f32 %v2280_v15  ;;  %v2292_v43 = vand.u32 2147483648, %v2280_v15  ;;  %vm2286_vm15 = vweird.f32 %v2280_v15  ;;  %v2290_v44 = vand.u32 2147483647, %v2280_v15 }
0x23bf   :  { %v2293_v20 = vor.u32 1.1754944e-38, %v2292_v43  ;;  %vm2291_vm2 = vcmp.eq.f32.partialorder %v2290_v44, 8.507059e+37 }
0x23c3   :  { %v3621_v3 = vpop.eup %3620 }
0x23c4   :  { %v2282_v38 = vmul.f32 %v3621_v3, %v2280_v15  ;;  %vm2287_vm14 = vweird.f32 %v3621_v3 }
0x23c5   :  { %vm2288_vm1 = vmor %vm2286_vm15, %vm2287_vm14 }
0x23c6   :  { %v2283_v17 = vsub.f32 1.0, %v2282_v38 }
0x23c8   :  { %v2284_v49 = vmul.f32 %v3621_v3, %v2283_v17 }
0x23ca   :  { %v2285_v16 = vadd.f32 %v3621_v3, %v2284_v49 }
0x23cc   :  { %v2289_v56 = vsel %vm2288_vm1, %v3621_v3, %v2285_v16 }
0x23cd   :  { %v2294_v28 = vsel %vm2291_vm2, %v2293_v20, %v2289_v56 }
0x23ce   :  { %v2297_v31 = vmul.f32 %v2294_v28, %v4787_v35 }
0x2413   :  { %v2300_v26 = vpop.permute.xlu2 %2299 }
0x2414   :  { %v2302_v29 = vmul.f32 %v2300_v26, %v2294_v28 }
0x2416   :  { %2304 = vrot.lane.b32.xlu1 %v2302_v29, %s4063_s22 }
0x2488   :  { %v2305_v42 = vpop.permute.xlu1 %2304 }
0x2489   :  { %v4842_v48 = vadd.f32 %v2305_v42, %v2297_v31 }
0x248b   :  { %3622 = vtanh.f32 %v4842_v48 }
0x2491   :  { %v3623_v51 = vpop.eup %3622 }
0x2492   :  { %2310 = vrot.lane.b32.xlu0 %v3623_v51, %s4063_s22 }
0x2504   :  { %v2311_v52 = vpop.permute.xlu0 %2310 }
0x2505   :  { %v2313_v23 = vmul.f32 %v2311_v52, %v2294_v28 }
0x2507   :  { %2315 = vrot.lane.b32.xlu2 %v2313_v23, %s4065_s29 }
0x2561   :  { %v2316_v19 = vpop.permute.xlu2 %2315 }
0x2562   :  { %3364 = vmatmul.msk.f32.vlgmr.msrb.gmra.mxu2 %vm288_vm0, %v2316_v19  ;;  %3370 = vmatmul.msk.f32.vlgmr.msra.gmra.mxu1 %vm288_vm0, %v2316_v19 }
0x2563   :  { %2685 = vmatpush.msrb.mxu2 %v4663_v36  ;;  %2825 = vmatpush.msra.mxu1 %v4593_v21 }
0x2565   :  { %2686 = vmatpush.msrb.mxu2 %v4665_v37  ;;  %2826 = vmatpush.msra.mxu1 %v4597_v45 }
0x2567   :  { %2687 = vmatpush.msrb.mxu2 %v4669_v39  ;;  %2827 = vmatpush.msra.mxu1 %v4603_v22 }
0x2569   :  { %2688 = vmatpush.msrb.mxu2 %v4673_v50  ;;  %2828 = vmatpush.msra.mxu1 %v4611_v40 }
0x25e5   :  { %v2336_v35 = vpop.f32.mrf.mxu2 }
0x25e6   :  { %v4858_v60 = vadd.f32 %v4745_v57, %v2336_v35 }
0x25e8   :  { %v2339_v0 = vsel %vm1896_vm7, %v4858_v60, -inf }
0x25e9   :  { %2340 = vmax.xlane.f32.xlu1 %v2339_v0 }
0x265c   :  { %v2341_v21 = vpop.xlane.xlu1 %2340 }
0x265d   :  { %vm2342_vm3 = vcmp.eq.f32.partialorder %v4858_v60, %v2341_v21 }
0x265e   :  { %v2343_v45 = vsel %vm2342_vm3, %v4268_v12, 32 }
0x265f   :  { %v2344_v2 = vsel %vm1896_vm7, %v2343_v45, 2147483647 }
0x2660   :  { %v2346_v22 = vshra.s32 %v2344_v2, 16  ;;  %v2345_v4 = vand.u32 65535, %v2344_v2 }
0x2662   :  { %v2348_v30 = vcvt.s32.f32 %v2346_v22  ;;  %v2347_v25 = vcvt.s32.f32 %v2345_v4  ;;  %v4894_v4 = vld [vmem:[#allocation15 + $0x8] sm:$0xff] }
0x2664   :  { %2349 = vmin.xlane.f32.xlu0 %v2348_v30 }
0x26d7   :  { %v2350_v40 = vpop.xlane.xlu0 %2349 }
0x26d8   :  { %vm2351_vm4 = vcmp.eq.f32.partialorder %v2348_v30, %v2350_v40  ;;  %v2356_v6 = vcvt.f32.s32 %v2350_v40  ;;  %v4886_v30 = vld [vmem:[#allocation15 + $0x18] sm:$0xff]  ;;  %v4898_v40 = vld [vmem:[#allocation15] sm:$0xff] }
0x26d9   :  { %v2352_v53 = vsel %vm2351_vm4, %v2347_v25, inf  ;;  %v2469_v25 = vpop.f32.mrf.mxu1 }
0x26da   :  { %2353 = vmin.xlane.f32.xlu2 %v2352_v53  ;;  %v2357_v11 = vshll.u32 %v2356_v6, 16 }
0x274d   :  { %v2354_v8 = vpop.xlane.xlu2 %2353 }
0x274e   :  { %v2355_v27 = vcvt.f32.s32 %v2354_v8 }
0x2750   :  { %v2358_v13 = vadd.s32 %v2357_v11, %v2355_v27 }
0x2752   :  { %v2364_v62 = vsel %vm2363_vm5, %v4865_v59, %v2358_v13 }
0x2753   :  { %2366 = vperm.xlu1 %3439, %v2364_v62  }
0x27c5   :  { %v2367_v46 = vpop.permute.xlu1 %2366 }
0x27c6   :  { %vm2368_vm6 = vcmp.eq.s32.totalorder %v4268_v12, %v2367_v46 }
0x27c7   :  { %v3366_v47 = vsel %vm2368_vm6, 1.0, %v4062_v10 }
0x27c8   :  { %3368 = vmatmul.msk.f32.vlgmr.msra.gmra.mxu0 %vm288_vm0, %v3366_v47 }
0x27c9   :  { %2773 = vmatpush.msra.mxu0 %v4707_v9 }
0x27cb   :  { %2774 = vmatpush.msra.mxu0 %v4709_v18 }
0x27cd   :  { %2775 = vmatpush.msra.mxu0 %v4713_v63 }
0x27cf   :  { %2776 = vmatpush.msra.mxu0 %v4717_v24 }
0x2845   :  { %v2411_v15 = vpop.f32.mrf.mxu0 }
0x2846   :  { %v2412_v3 = vadd.f32 %v2411_v15, %v2388_v1 }
0x2848   :  { %v2414_v38 = vadd.f32 %v4631_v32, %v2412_v3 }
0x284a   :  { %3624 = vtanh.f32 %v2414_v38  ;;  %v3369_v49 = vmul.f32 -1.442695, %v2414_v38 }
0x284c   :  { %3626 = vpow2.f32 %v3369_v49 }
0x2850   :  { %v3625_v17 = vpop.eup %3624 }
0x2851   :  { %2437 = vrot.lane.b32.xlu0 %v3625_v17, %s4063_s22 }
0x2852   :  { %v3627_v16 = vpop.eup %3626 }
0x2853   :  { %v2418_v43 = vadd.f32 1.0, %v3627_v16 }
0x2855   :  { %3628 = vrcp.f32 %v2418_v43  ;;  %v2430_v29 = vand.u32 2147483648, %v2418_v43  ;;  %vm2424_vm9 = vweird.f32 %v2418_v43  ;;  %v2428_v31 = vand.u32 2147483647, %v2418_v43 }
0x2857   :  { %v2431_v42 = vor.u32 1.1754944e-38, %v2430_v29  ;;  %vm2429_vm11 = vcmp.eq.f32.partialorder %v2428_v31, 8.507059e+37  ;;  %v3715_v29 = vld [vmem:[#allocation16] sm:$0xff] }
0x285b   :  { %v3629_v44 = vpop.eup %3628 }
0x285c   :  { %v2420_v56 = vmul.f32 %v3629_v44, %v2418_v43  ;;  %vm2425_vm8 = vweird.f32 %v3629_v44 }
0x285d   :  { %vm2426_vm10 = vmor %vm2424_vm9, %vm2425_vm8 }
0x285e   :  { %v2421_v20 = vsub.f32 1.0, %v2420_v56 }
0x2860   :  { %v2422_v26 = vmul.f32 %v3629_v44, %v2421_v20 }
0x2862   :  { %v2423_v28 = vadd.f32 %v3629_v44, %v2422_v26  ;;  %v3713_v26 = vld [vmem:[#allocation16 + $0x10] sm:$0xff] }
0x2864   :  { %v2427_v32 = vsel %vm2426_vm10, %v3629_v44, %v2423_v28  ;;  %v3714_v28 = vld [vmem:[#allocation16 + $0x8] sm:$0xff] }
0x2865   :  { %v2432_v52 = vsel %vm2429_vm11, %v2431_v42, %v2427_v32 }
0x2866   :  { %v2435_v19 = vmul.f32 %v2432_v52, %v4823_v5  ;;  %v4890_v5 = vld [vmem:[#allocation15 + $0x10] sm:$0xff] }
0x28c3   :  { %v2438_v51 = vpop.permute.xlu0 %2437 }
0x28c4   :  { %v2440_v23 = vmul.f32 %v2438_v51, %v2432_v52 }
0x28c6   :  { %2442 = vrot.lane.b32.xlu2 %v2440_v23, %s4063_s22 }
0x2920   :  { %v2443_v35 = vpop.permute.xlu2 %2442 }
0x2921   :  { %v4879_v0 = vadd.f32 %v2443_v35, %v2435_v19 }
0x2923   :  { %3630 = vtanh.f32 %v4879_v0 }
0x2929   :  { %v3631_v21 = vpop.eup %3630 }
0x292a   :  { %2448 = vrot.lane.b32.xlu0 %v3631_v21, %s4063_s22  ;;  %v2583_v21 = vstv %s2582_s7 }
0x292b   :  { %vm2584_vm3 = vcmp.eq.s32.totalorder %v2583_v21, 1 }
0x299c   :  { %v2449_v45 = vpop.permute.xlu0 %2448 }
0x299d   :  { %v2451_v2 = vmul.f32 %v2449_v45, %v2432_v52 }
0x299f   :  { %2473 = vrot.lane.b32.xlu1 %v2451_v2, %s4065_s29 }
0x2a11   :  { %v2474_v22 = vpop.permute.xlu1 %2473 }
0x2a12   :  { %3371 = vmatmul.msk.f32.vlgmr.msra.gmra.mxu2 %vm288_vm0, %v2474_v22  ;;  %3376 = vmatmul.msk.f32.vlgmr.msrb.gmra.mxu0 %vm288_vm0, %v2474_v22 }
0x2a13   :  { %2848 = vmatpush.msra.mxu2 %v4886_v30  ;;  %2931 = vmatpush.msrb.mxu0 %v4650_v55 }
0x2a15   :  { %2849 = vmatpush.msra.mxu2 %v4890_v5  ;;  %2932 = vmatpush.msrb.mxu0 %v4652_v33 }
0x2a17   :  { %2850 = vmatpush.msra.mxu2 %v4894_v4  ;;  %2933 = vmatpush.msrb.mxu0 %v4655_v34 }
0x2a19   :  { %2851 = vmatpush.msra.mxu2 %v4898_v40  ;;  %2934 = vmatpush.msrb.mxu0 %v4658_v41 }
0x2a95   :  { %v2494_v55 = vpop.f32.mrf.mxu2 }
0x2a96   :  { %v2495_v53 = vadd.f32 %v2494_v55, %v2469_v25 }
0x2a98   :  { %v2497_v6 = vadd.f32 %v4697_v54, %v2495_v53 }
0x2a9a   :  { %3632 = vtanh.f32 %v2497_v6  ;;  %v3372_v33 = vmul.f32 -1.442695, %v2497_v6 }
0x2a9c   :  { %3634 = vpow2.f32 %v3372_v33 }
0x2aa0   :  { %v3633_v7 = vpop.eup %3632 }
0x2aa1   :  { %2520 = vrot.lane.b32.xlu2 %v3633_v7, %s4063_s22  ;;  %v2609_v7 = vpop.f32.mrf.mxu0 }
0x2aa2   :  { %v3635_v8 = vpop.eup %3634 }
0x2aa3   :  { %v2501_v11 = vadd.f32 1.0, %v3635_v8 }
0x2aa5   :  { %3636 = vrcp.f32 %v2501_v11  ;;  %v2513_v41 = vand.u32 2147483648, %v2501_v11  ;;  %vm2507_vm13 = vweird.f32 %v2501_v11  ;;  %v2511_v47 = vand.u32 2147483647, %v2501_v11 }
0x2aa7   :  { %v2514_v1 = vor.u32 1.1754944e-38, %v2513_v41  ;;  %vm2512_vm15 = vcmp.eq.f32.partialorder %v2511_v47, 8.507059e+37 }
0x2aab   :  { %v3637_v34 = vpop.eup %3636 }
0x2aac   :  { %v2503_v27 = vmul.f32 %v3637_v34, %v2501_v11  ;;  %vm2508_vm12 = vweird.f32 %v3637_v34 }
0x2aad   :  { %vm2509_vm14 = vmor %vm2507_vm13, %vm2508_vm12 }
0x2aae   :  { %v2504_v13 = vsub.f32 1.0, %v2503_v27 }
0x2ab0   :  { %v2505_v62 = vmul.f32 %v3637_v34, %v2504_v13 }
0x2ab2   :  { %v2506_v46 = vadd.f32 %v3637_v34, %v2505_v62 }
0x2ab4   :  { %v2510_v54 = vsel %vm2509_vm14, %v3637_v34, %v2506_v46 }
0x2ab5   :  { %v2515_v3 = vsel %vm2512_vm15, %v2514_v1, %v2510_v54 }
0x2ab6   :  { %v2518_v17 = vmul.f32 %v2515_v3, %v4842_v48  ;;  %v3712_v48 = vld [vmem:[#allocation16 + $0x18] sm:$0xff] }
0x2afb   :  { %v2521_v15 = vpop.permute.xlu2 %2520 }
0x2afc   :  { %v2523_v38 = vmul.f32 %v2521_v15, %v2515_v3 }
0x2afe   :  { %2525 = vrot.lane.b32.xlu0 %v2523_v38, %s4063_s22 }
0x2b70   :  { %v2526_v49 = vpop.permute.xlu0 %2525 }
0x2b71   :  { %v4906_v16 = vadd.f32 %v2526_v49, %v2518_v17 }
0x2b73   :  { %3638 = vtanh.f32 %v4906_v16 }
0x2b79   :  { %v3639_v43 = vpop.eup %3638 }
0x2b7a   :  { %2531 = vrot.lane.b32.xlu1 %v3639_v43, %s4063_s22 }
0x2bec   :  { %v2532_v44 = vpop.permute.xlu1 %2531 }
0x2bed   :  { %v2534_v56 = vmul.f32 %v2532_v44, %v2515_v3 }
0x2bef   :  { %2536 = vrot.lane.b32.xlu2 %v2534_v56, %s4065_s29 }
0x2c49   :  { %v2537_v20 = vpop.permute.xlu2 %2536 }
0x2c4a   :  { %3373 = vmatmul.msk.f32.vlgmr.msra.gmra.mxu3 %vm288_vm0, %v2537_v20  ;;  %3379 = vmatmul.msk.f32.vlgmr.msrb.gmra.mxu2 %vm288_vm0, %v2537_v20 }
0x2c4b   :  { %2906 = vmatpush.msra.mxu3 %v4663_v36  ;;  %3046 = vmatpush.msrb.mxu2 %v3712_v48 }
0x2c4d   :  { %2907 = vmatpush.msra.mxu3 %v4665_v37  ;;  %3047 = vmatpush.msrb.mxu2 %v3713_v26  ;;  %v3718_v26 = vld [vmem:[#allocation18 + $0x10] sm:$0xff] }
0x2c4f   :  { %2908 = vmatpush.msra.mxu3 %v4669_v39  ;;  %3048 = vmatpush.msrb.mxu2 %v3714_v28  ;;  %v3719_v28 = vld [vmem:[#allocation18 + $0x8] sm:$0xff] }
0x2c51   :  { %2909 = vmatpush.msra.mxu3 %v4673_v50  ;;  %3049 = vmatpush.msrb.mxu2 %v3715_v29  ;;  %v3720_v29 = vld [vmem:[#allocation18] sm:$0xff] }
0x2ccd   :  { %v2557_v31 = vpop.f32.mrf.mxu3 }
0x2cce   :  { %v4918_v32 = vadd.f32 %v4745_v57, %v2557_v31  ;;  %v2690_v31 = vpop.f32.mrf.mxu2 }
0x2cd0   :  { %v2560_v36 = vsel %vm1896_vm7, %v4918_v32, -inf }
0x2cd1   :  { %2561 = vmax.xlane.f32.xlu0 %v2560_v36 }
0x2d44   :  { %v2562_v42 = vpop.xlane.xlu0 %2561 }
0x2d45   :  { %vm2563_vm1 = vcmp.eq.f32.partialorder %v4918_v32, %v2562_v42 }
0x2d46   :  { %v2564_v37 = vsel %vm2563_vm1, %v4268_v12, 32 }
0x2d47   :  { %v2565_v39 = vsel %vm1896_vm7, %v2564_v37, 2147483647 }
0x2d48   :  { %v2567_v51 = vshra.s32 %v2565_v39, 16  ;;  %v2566_v50 = vand.u32 65535, %v2565_v39 }
0x2d4a   :  { %v2569_v52 = vcvt.s32.f32 %v2567_v51  ;;  %v2568_v19 = vcvt.s32.f32 %v2566_v50 }
0x2d4c   :  { %2570 = vmin.xlane.f32.xlu1 %v2569_v52 }
0x2dbf   :  { %v2571_v23 = vpop.xlane.xlu1 %2570 }
0x2dc0   :  { %vm2572_vm2 = vcmp.eq.f32.partialorder %v2569_v52, %v2571_v23  ;;  %v2577_v35 = vcvt.f32.s32 %v2571_v23 }
0x2dc1   :  { %v2573_v57 = vsel %vm2572_vm2, %v2568_v19, inf }
0x2dc2   :  { %2574 = vmin.xlane.f32.xlu2 %v2573_v57  ;;  %v2578_v2 = vshll.u32 %v2577_v35, 16 }
0x2e35   :  { %v2575_v45 = vpop.xlane.xlu2 %2574 }
0x2e36   :  { %v2576_v22 = vcvt.f32.s32 %v2575_v45 }
0x2e38   :  { %v2579_v25 = vadd.s32 %v2578_v2, %v2576_v22 }
0x2e3a   :  { %v2585_v55 = vsel %vm2584_vm3, %v4865_v59, %v2579_v25 }
0x2e3b   :  { %2587 = vperm.xlu0 %3440, %v2585_v55  }
0x2e43   :  { %3442 = vset.pattern.permute.xlu0 %v4070_v14  ;;  %v4937_v14 = vld [vmem:[%s5062_s11] ss:$0 sm:$0xff] }
0x2ead   :  { %v2588_v53 = vpop.permute.xlu0 %2587 }
0x2eae   :  { %vm2589_vm4 = vcmp.eq.s32.totalorder %v4268_v12, %v2588_v53 }
0x2eaf   :  { %v3375_v6 = vsel %vm2589_vm4, 1.0, %v4062_v10 }
0x2eb0   :  { %3377 = vmatmul.msk.f32.vlgmr.msrb.gmra.mxu1 %vm288_vm0, %v3375_v6 }
0x2eb1   :  { %2994 = vmatpush.msrb.mxu1 %v4707_v9 }
0x2eb3   :  { %2995 = vmatpush.msrb.mxu1 %v4709_v18 }
0x2eb5   :  { %2996 = vmatpush.msrb.mxu1 %v4713_v63 }
0x2eb7   :  { %2997 = vmatpush.msrb.mxu1 %v4717_v24 }
0x2f2d   :  { %v2632_v33 = vpop.f32.mrf.mxu1 }
0x2f2e   :  { %v2633_v8 = vadd.f32 %v2632_v33, %v2609_v7 }
0x2f30   :  { %v2635_v11 = vadd.f32 %v4937_v14, %v2633_v8 }
0x2f32   :  { %3640 = vtanh.f32 %v2635_v11  ;;  %v3378_v9 = vmul.f32 -1.442695, %v2635_v11 }
0x2f34   :  { %3642 = vpow2.f32 %v3378_v9  ;;  %v3724_v9 = vld [vmem:[#allocation19 + $0x8] sm:$0xff] }
0x2f38   :  { %v3641_v34 = vpop.eup %3640 }
0x2f39   :  { %2658 = vrot.lane.b32.xlu1 %v3641_v34, %s4063_s22  ;;  %v3722_v34 = vld [vmem:[#allocation19 + $0x18] sm:$0xff] }
0x2f3a   :  { %v3643_v18 = vpop.eup %3642 }
0x2f3b   :  { %v2639_v63 = vadd.f32 1.0, %v3643_v18  ;;  %v3725_v18 = vld [vmem:[#allocation19] sm:$0xff] }
0x2f3d   :  { %3644 = vrcp.f32 %v2639_v63  ;;  %v2651_v41 = vand.u32 2147483648, %v2639_v63  ;;  %vm2645_vm6 = vweird.f32 %v2639_v63  ;;  %v2649_v47 = vand.u32 2147483647, %v2639_v63 }
0x2f3f   :  { %v2652_v1 = vor.u32 1.1754944e-38, %v2651_v41  ;;  %vm2650_vm9 = vcmp.eq.f32.partialorder %v2649_v47, 8.507059e+37 }
0x2f43   :  { %v3645_v24 = vpop.eup %3644 }
0x2f44   :  { %v2641_v27 = vmul.f32 %v3645_v24, %v2639_v63  ;;  %vm2646_vm5 = vweird.f32 %v3645_v24 }
0x2f45   :  { %vm2647_vm8 = vmor %vm2645_vm6, %vm2646_vm5 }
0x2f46   :  { %v2642_v13 = vsub.f32 1.0, %v2641_v27 }
0x2f48   :  { %v2643_v62 = vmul.f32 %v3645_v24, %v2642_v13 }
0x2f4a   :  { %v2644_v46 = vadd.f32 %v3645_v24, %v2643_v62 }
0x2f4c   :  { %v2648_v54 = vsel %vm2647_vm8, %v3645_v24, %v2644_v46  ;;  %v4973_v24 = vld [vmem:[%s5067_s16] ss:$0 sm:$0xff]  ;;  %s3383_s16 = sld [smem:[#allocation2 + $0x5]] }
0x2f4d   :  { %v2653_v3 = vsel %vm2650_vm9, %v2652_v1, %v2648_v54 }
0x2f4e   :  { %v2656_v17 = vmul.f32 %v2653_v3, %v4879_v0  ;;  %v3717_v0 = vld [vmem:[#allocation18 + $0x18] sm:$0xff] }
0x2f52   :  { %p2802_p4 = scmp.ne.s32.totalorder %s3383_s16, 0 }
0x2f54   :  { %s2803_s2 = scalar_select %p2802_p4, 1, 0 }
0x2fab   :  { %v2659_v15 = vpop.permute.xlu1 %2658 }
0x2fac   :  { %v2661_v38 = vmul.f32 %v2659_v15, %v2653_v3 }
0x2fae   :  { %2663 = vrot.lane.b32.xlu2 %v2661_v38, %s4063_s22 }
0x3008   :  { %v2664_v49 = vpop.permute.xlu2 %2663 }
0x3009   :  { %v4943_v43 = vadd.f32 %v2664_v49, %v2656_v17  ;;  %v2804_v49 = vstv %s2803_s2 }
0x300a   :  { %vm2805_vm1 = vcmp.eq.s32.totalorder %v2804_v49, 1 }
0x300b   :  { %3646 = vtanh.f32 %v4943_v43 }
0x3011   :  { %v3647_v44 = vpop.eup %3646 }
0x3012   :  { %2669 = vrot.lane.b32.xlu1 %v3647_v44, %s4063_s22 }
0x3084   :  { %v2670_v56 = vpop.permute.xlu1 %2669 }
0x3085   :  { %v2672_v20 = vmul.f32 %v2670_v56, %v2653_v3 }
0x3087   :  { %2694 = vrot.lane.b32.xlu2 %v2672_v20, %s4065_s29 }
0x30e1   :  { %v2695_v48 = vpop.permute.xlu2 %2694 }
0x30e2   :  { %3380 = vmatmul.msk.f32.vlgmr.msrb.gmra.mxu3 %vm288_vm0, %v2695_v48  ;;  %3385 = vmatmul.msk.f32.vlgmr.msra.gmra.mxu1 %vm288_vm0, %v2695_v48 }
0x30e3   :  { %3069 = vmatpush.msrb.mxu3 %v4886_v30  ;;  %3152 = vmatpush.msra.mxu1 %v3717_v0  ;;  %v4957_v30 = vld [vmem:[%s5065_s14] ss:$0 sm:$0xff] }
0x30e5   :  { %3070 = vmatpush.msrb.mxu3 %v4890_v5  ;;  %3153 = vmatpush.msra.mxu1 %v3718_v26 }
0x30e7   :  { %3071 = vmatpush.msrb.mxu3 %v4894_v4  ;;  %3154 = vmatpush.msra.mxu1 %v3719_v28 }
0x30e9   :  { %3072 = vmatpush.msrb.mxu3 %v4898_v40  ;;  %3155 = vmatpush.msra.mxu1 %v3720_v29  ;;  %v3727_v29 = vld [vmem:[#allocation21 + $0x18] sm:$0xff] }
0x3165   :  { %v2715_v36 = vpop.f32.mrf.mxu3 }
0x3166   :  { %v2716_v42 = vadd.f32 %v2715_v36, %v2690_v31  ;;  %v3728_v31 = vld [vmem:[#allocation21 + $0x10] sm:$0xff]  ;;  %v3729_v36 = vld [vmem:[#allocation21 + $0x8] sm:$0xff] }
0x3168   :  { %v2718_v5 = vadd.f32 %v4957_v30, %v2716_v42  ;;  %v3730_v42 = vld [vmem:[#allocation21] sm:$0xff] }
0x316a   :  { %3648 = vtanh.f32 %v2718_v5  ;;  %v3381_v4 = vmul.f32 -1.442695, %v2718_v5  ;;  %v2830_v5 = vpop.f32.mrf.mxu1 }
0x316c   :  { %3650 = vpow2.f32 %v3381_v4 }
0x3170   :  { %v3649_v37 = vpop.eup %3648 }
0x3171   :  { %2741 = vrot.lane.b32.xlu1 %v3649_v37, %s4063_s22 }
0x3172   :  { %v3651_v39 = vpop.eup %3650 }
0x3173   :  { %v2722_v40 = vadd.f32 1.0, %v3651_v39 }
0x3175   :  { %3652 = vrcp.f32 %v2722_v40  ;;  %v2734_v57 = vand.u32 2147483648, %v2722_v40  ;;  %vm2728_vm11 = vweird.f32 %v2722_v40  ;;  %v2732_v35 = vand.u32 2147483647, %v2722_v40 }
0x3177   :  { %v2735_v45 = vor.u32 1.1754944e-38, %v2734_v57  ;;  %vm2733_vm13 = vcmp.eq.f32.partialorder %v2732_v35, 8.507059e+37 }
0x317b   :  { %v3653_v51 = vpop.eup %3652 }
0x317c   :  { %v2724_v52 = vmul.f32 %v3653_v51, %v2722_v40  ;;  %vm2729_vm10 = vweird.f32 %v3653_v51 }
0x317d   :  { %vm2730_vm12 = vmor %vm2728_vm11, %vm2729_vm10 }
0x317e   :  { %v2725_v50 = vsub.f32 1.0, %v2724_v52 }
0x3180   :  { %v2726_v23 = vmul.f32 %v3653_v51, %v2725_v50 }
0x3182   :  { %v2727_v19 = vadd.f32 %v3653_v51, %v2726_v23 }
0x3184   :  { %v2731_v21 = vsel %vm2730_vm12, %v3653_v51, %v2727_v19 }
0x3185   :  { %v2736_v22 = vsel %vm2733_vm13, %v2735_v45, %v2731_v21 }
0x3186   :  { %v2739_v55 = vmul.f32 %v2736_v22, %v4906_v16  ;;  %v3723_v16 = vld [vmem:[#allocation19 + $0x10] sm:$0xff] }
0x31e3   :  { %v2742_v2 = vpop.permute.xlu1 %2741 }
0x31e4   :  { %v2744_v25 = vmul.f32 %v2742_v2, %v2736_v22 }
0x31e6   :  { %2746 = vrot.lane.b32.xlu2 %v2744_v25, %s4063_s22 }
0x3240   :  { %v2747_v53 = vpop.permute.xlu2 %2746 }
0x3241   :  { %v4963_v6 = vadd.f32 %v2747_v53, %v2739_v55 }
0x3243   :  { %3654 = vtanh.f32 %v4963_v6 }
0x3249   :  { %v3655_v7 = vpop.eup %3654 }
0x324a   :  { %2752 = vrot.lane.b32.xlu0 %v3655_v7, %s4063_s22 }
0x32bc   :  { %v2753_v33 = vpop.permute.xlu0 %2752 }
0x32bd   :  { %v2755_v8 = vmul.f32 %v2753_v33, %v2736_v22 }
0x32bf   :  { %2757 = vrot.lane.b32.xlu1 %v2755_v8, %s4065_s29 }
0x3331   :  { %v2758_v11 = vpop.permute.xlu1 %2757 }
0x3332   :  { %3382 = vmatmul.msk.f32.vlgmr.msra.gmra.mxu0 %vm288_vm0, %v2758_v11  ;;  %3388 = vmatmul.msk.f32.vlgmr.msra.gmra.mxu3 %vm288_vm0, %v2758_v11 }
0x3333   :  { %3127 = vmatpush.msra.mxu0 %v3722_v34 }
0x3335   :  { %3128 = vmatpush.msra.mxu0 %v3723_v16 }
0x3337   :  { %3129 = vmatpush.msra.mxu0 %v3724_v9 }
0x3339   :  { %3130 = vmatpush.msra.mxu0 %v3725_v18 }
0x33af   :  { %v2778_v63 = vpop.f32.mrf.mxu0 }
0x33b0   :  { %v4976_v27 = vadd.f32 %v4973_v24, %v2778_v63 }
0x33b2   :  { %v2781_v13 = vsel %vm1896_vm7, %v4976_v27, -inf }
0x33b3   :  { %2782 = vmax.xlane.f32.xlu2 %v2781_v13 }
0x33b5   :  { %v2911_v63 = vpop.f32.mrf.mxu3 }
0x3426   :  { %v2783_v62 = vpop.xlane.xlu2 %2782 }
0x3427   :  { %vm2784_vm14 = vcmp.eq.f32.partialorder %v4976_v27, %v2783_v62 }
0x3428   :  { %v2785_v46 = vsel %vm2784_vm14, %v4268_v12, 32 }
0x3429   :  { %v2786_v41 = vsel %vm1896_vm7, %v2785_v46, 2147483647 }
0x342a   :  { %v2788_v47 = vshra.s32 %v2786_v41, 16  ;;  %v2787_v1 = vand.u32 65535, %v2786_v41 }
0x342c   :  { %v2790_v54 = vcvt.s32.f32 %v2788_v47  ;;  %v2789_v3 = vcvt.s32.f32 %v2787_v1 }
0x342e   :  { %2791 = vmin.xlane.f32.xlu0 %v2790_v54 }
0x34a1   :  { %v2792_v15 = vpop.xlane.xlu0 %2791 }
0x34a2   :  { %vm2793_vm15 = vcmp.eq.f32.partialorder %v2790_v54, %v2792_v15  ;;  %v2798_v17 = vcvt.f32.s32 %v2792_v15 }
0x34a3   :  { %v2794_v38 = vsel %vm2793_vm15, %v2789_v3, inf }
0x34a4   :  { %2795 = vmin.xlane.f32.xlu1 %v2794_v38  ;;  %v2799_v56 = vshll.u32 %v2798_v17, 16 }
0x3517   :  { %v2796_v44 = vpop.xlane.xlu1 %2795 }
0x3518   :  { %v2797_v20 = vcvt.f32.s32 %v2796_v44 }
0x351a   :  { %v2800_v48 = vadd.s32 %v2799_v56, %v2797_v20 }
0x351c   :  { %v2806_v0 = vsel %vm2805_vm1, %v4865_v59, %v2800_v48 }
0x351d   :  { %2808 = vperm.xlu2 %3441, %v2806_v0  }
0x3577   :  { %v2809_v26 = vpop.permute.xlu2 %2808 }
0x3578   :  { %vm2810_vm2 = vcmp.eq.s32.totalorder %v4268_v12, %v2809_v26 }
0x3579   :  { %v3384_v28 = vsel %vm2810_vm2, 1.0, %v4062_v10 }
0x357a   :  { %3386 = vmatmul.msk.f32.vlgmr.msra.gmra.mxu2 %vm288_vm0, %v3384_v28 }
0x357b   :  { %3215 = vmatpush.msra.mxu2 %v3727_v29 }
0x357d   :  { %3216 = vmatpush.msra.mxu2 %v3728_v31 }
0x357f   :  { %3217 = vmatpush.msra.mxu2 %v3729_v36 }
0x3581   :  { %3218 = vmatpush.msra.mxu2 %v3730_v42 }
0x35fd   :  { %v2853_v37 = vpop.f32.mrf.mxu2 }
0x35fe   :  { %v2854_v4 = vadd.f32 %v2853_v37, %v2830_v5 }
0x3600   :  { %v2856_v39 = vadd.f32 %v4937_v14, %v2854_v4 }
0x3602   :  { %3656 = vtanh.f32 %v2856_v39  ;;  %v3387_v51 = vmul.f32 -1.442695, %v2856_v39 }
0x3604   :  { %3658 = vpow2.f32 %v3387_v51 }
0x3608   :  { %v3657_v40 = vpop.eup %3656 }
0x3609   :  { %2879 = vrot.lane.b32.xlu0 %v3657_v40, %s4063_s22 }
0x360a   :  { %v3659_v52 = vpop.eup %3658 }
0x360b   :  { %v2860_v50 = vadd.f32 1.0, %v3659_v52 }
0x360d   :  { %3660 = vrcp.f32 %v2860_v50  ;;  %v2872_v45 = vand.u32 2147483648, %v2860_v50  ;;  %vm2866_vm4 = vweird.f32 %v2860_v50  ;;  %v2870_v2 = vand.u32 2147483647, %v2860_v50 }
0x360f   :  { %v2873_v25 = vor.u32 1.1754944e-38, %v2872_v45  ;;  %vm2871_vm6 = vcmp.eq.f32.partialorder %v2870_v2, 8.507059e+37  ;;  %v3025_v2 = vstv %s3024_s30 }
0x3610   :  { %vm3026_vm14 = vcmp.eq.s32.totalorder %v3025_v2, 1 }
0x3613   :  { %v3661_v23 = vpop.eup %3660 }
0x3614   :  { %v2862_v19 = vmul.f32 %v3661_v23, %v2860_v50  ;;  %vm2867_vm3 = vweird.f32 %v3661_v23 }
0x3615   :  { %vm2868_vm5 = vmor %vm2866_vm4, %vm2867_vm3 }
0x3616   :  { %v2863_v57 = vsub.f32 1.0, %v2862_v19 }
0x3618   :  { %v2864_v35 = vmul.f32 %v3661_v23, %v2863_v57 }
0x361a   :  { %v2865_v21 = vadd.f32 %v3661_v23, %v2864_v35 }
0x361c   :  { %v2869_v22 = vsel %vm2868_vm5, %v3661_v23, %v2865_v21 }
0x361d   :  { %v2874_v53 = vsel %vm2871_vm6, %v2873_v25, %v2869_v22 }
0x361e   :  { %v2877_v33 = vmul.f32 %v2874_v53, %v4943_v43 }
0x367b   :  { %v2880_v55 = vpop.permute.xlu0 %2879 }
0x367c   :  { %v2882_v7 = vmul.f32 %v2880_v55, %v2874_v53 }
0x367e   :  { %2884 = vrot.lane.b32.xlu1 %v2882_v7, %s4063_s22 }
0x36f0   :  { %v2885_v8 = vpop.permute.xlu1 %2884 }
0x36f1   :  { %v4991_v11 = vadd.f32 %v2885_v8, %v2877_v33 }
0x36f3   :  { %3662 = vtanh.f32 %v4991_v11 }
0x36f9   :  { %v3663_v34 = vpop.eup %3662 }
0x36fa   :  { %2890 = vrot.lane.b32.xlu2 %v3663_v34, %s4063_s22 }
0x3754   :  { %v2891_v16 = vpop.permute.xlu2 %2890 }
0x3755   :  { %v2893_v9 = vmul.f32 %v2891_v16, %v2874_v53 }
0x3757   :  { %2915 = vrot.lane.b32.xlu0 %v2893_v9, %s4065_s29 }
0x37c9   :  { %v2916_v18 = vpop.permute.xlu0 %2915 }
0x37ca   :  { %3389 = vmatmul.msk.f32.vlgmr.msrb.gmra.mxu0 %vm288_vm0, %v2916_v18  ;;  %3394 = vmatmul.msk.f32.vlgmr.msrb.gmra.mxu2 %vm288_vm0, %v2916_v18 }
0x3847   :  { %v2936_v13 = vpop.f32.mrf.mxu0 }
0x3848   :  { %v2937_v43 = vadd.f32 %v2936_v13, %v2911_v63 }
0x384a   :  { %v2939_v62 = vadd.f32 %v4957_v30, %v2937_v43 }
0x384c   :  { %3664 = vtanh.f32 %v2939_v62  ;;  %v3390_v41 = vmul.f32 -1.442695, %v2939_v62 }
0x384d   :  { %v3051_v34 = vpop.f32.mrf.mxu2 }
0x384e   :  { %3666 = vpow2.f32 %v3390_v41 }
0x3852   :  { %v3665_v46 = vpop.eup %3664 }
0x3853   :  { %2962 = vrot.lane.b32.xlu2 %v3665_v46, %s4063_s22 }
0x3854   :  { %v3667_v47 = vpop.eup %3666 }
0x3855   :  { %v2943_v54 = vadd.f32 1.0, %v3667_v47 }
0x3857   :  { %3668 = vrcp.f32 %v2943_v54  ;;  %v2955_v49 = vand.u32 2147483648, %v2943_v54  ;;  %vm2949_vm9 = vweird.f32 %v2943_v54  ;;  %v2953_v44 = vand.u32 2147483647, %v2943_v54 }
0x3859   :  { %v2956_v20 = vor.u32 1.1754944e-38, %v2955_v49  ;;  %vm2954_vm11 = vcmp.eq.f32.partialorder %v2953_v44, 8.507059e+37 }
0x385d   :  { %v3669_v1 = vpop.eup %3668 }
0x385e   :  { %v2945_v15 = vmul.f32 %v3669_v1, %v2943_v54  ;;  %vm2950_vm8 = vweird.f32 %v3669_v1 }
0x385f   :  { %vm2951_vm10 = vmor %vm2949_vm9, %vm2950_vm8  ;;  %vm3248_vm9 = vcmask 523264  }
0x3860   :  { %v2946_v3 = vsub.f32 1.0, %v2945_v15 }
0x3862   :  { %v2947_v38 = vmul.f32 %v3669_v1, %v2946_v3 }
0x3864   :  { %v2948_v17 = vadd.f32 %v3669_v1, %v2947_v38 }
0x3866   :  { %v2952_v56 = vsel %vm2951_vm10, %v3669_v1, %v2948_v17  ;;  %vm3250_vm10 = vcmask 785408  }
0x3867   :  { %v2957_v0 = vsel %vm2954_vm11, %v2956_v20, %v2952_v56  ;;  %vm3258_vm11 = vcmask 1041408  }
0x3868   :  { %v2960_v28 = vmul.f32 %v2957_v0, %v4963_v6 }
0x38ad   :  { %v2963_v48 = vpop.permute.xlu2 %2962 }
0x38ae   :  { %v2965_v26 = vmul.f32 %v2963_v48, %v2957_v0 }
0x38b0   :  { %2967 = vrot.lane.b32.xlu0 %v2965_v26, %s4063_s22 }
0x3922   :  { %v2968_v29 = vpop.permute.xlu0 %2967 }
0x3923   :  { %v5002_v31 = vadd.f32 %v2968_v29, %v2960_v28 }
0x3925   :  { %3670 = vtanh.f32 %v5002_v31 }
0x392b   :  { %v3671_v36 = vpop.eup %3670 }
0x392c   :  { %2973 = vrot.lane.b32.xlu1 %v3671_v36, %s4063_s22 }
0x399e   :  { %v2974_v42 = vpop.permute.xlu1 %2973 }
0x399f   :  { %v2976_v5 = vmul.f32 %v2974_v42, %v2957_v0 }
0x39a1   :  { %2978 = vrot.lane.b32.xlu2 %v2976_v5, %s4065_s29 }
0x39fb   :  { %v2979_v37 = vpop.permute.xlu2 %2978 }
0x39fc   :  { %3391 = vmatmul.msk.f32.vlgmr.msrb.gmra.mxu1 %vm288_vm0, %v2979_v37  ;;  %3397 = vmatmul.msk.f32.vlgmr.msra.gmra.mxu0 %vm288_vm0, %v2979_v37 }
0x3a79   :  { %v2999_v4 = vpop.f32.mrf.mxu1  ;;  %v3132_v26 = vpop.f32.mrf.mxu0 }
0x3a7a   :  { %v5010_v6 = vadd.f32 %v4973_v24, %v2999_v4 }
0x3a7c   :  { %v3002_v39 = vsel %vm1896_vm7, %v5010_v6, -inf }
0x3a7d   :  { %3003 = vmax.xlane.f32.xlu0 %v3002_v39 }
0x3af0   :  { %v3004_v40 = vpop.xlane.xlu0 %3003 }
0x3af1   :  { %vm3005_vm12 = vcmp.eq.f32.partialorder %v5010_v6, %v3004_v40 }
0x3af2   :  { %v3006_v51 = vsel %vm3005_vm12, %v4268_v12, 32 }
0x3af3   :  { %v3007_v52 = vsel %vm1896_vm7, %v3006_v51, 2147483647 }
0x3af4   :  { %v3009_v50 = vshra.s32 %v3007_v52, 16  ;;  %v3008_v19 = vand.u32 65535, %v3007_v52 }
0x3af6   :  { %v3011_v23 = vcvt.s32.f32 %v3009_v50  ;;  %v3010_v35 = vcvt.s32.f32 %v3008_v19 }
0x3af8   :  { %3012 = vmin.xlane.f32.xlu1 %v3011_v23 }
0x3b6b   :  { %v3013_v57 = vpop.xlane.xlu1 %3012 }
0x3b6c   :  { %vm3014_vm13 = vcmp.eq.f32.partialorder %v3011_v23, %v3013_v57  ;;  %v3019_v45 = vcvt.f32.s32 %v3013_v57 }
0x3b6d   :  { %v3015_v21 = vsel %vm3014_vm13, %v3010_v35, inf }
0x3b6e   :  { %3016 = vmin.xlane.f32.xlu2 %v3015_v21  ;;  %v3020_v25 = vshll.u32 %v3019_v45, 16 }
0x3be1   :  { %v3017_v22 = vpop.xlane.xlu2 %3016 }
0x3be2   :  { %v3018_v55 = vcvt.f32.s32 %v3017_v22 }
0x3be4   :  { %v3021_v53 = vadd.s32 %v3020_v25, %v3018_v55 }
0x3be6   :  { %v3027_v7 = vsel %vm3026_vm14, %v4865_v59, %v3021_v53 }
0x3be7   :  { %3029 = vperm.xlu0 %3442, %v3027_v7  }
0x3c59   :  { %v3030_v33 = vpop.permute.xlu0 %3029 }
0x3c5a   :  { %vm3031_vm7 = vcmp.eq.s32.totalorder %v4268_v12, %v3030_v33 }
0x3c5b   :  { %v3393_v8 = vsel %vm3031_vm7, 1.0, %v4062_v10 }
0x3c5c   :  { %3395 = vmatmul.msk.f32.vlgmr.msrb.gmra.mxu3 %vm288_vm0, %v3393_v8 }
0x3cdf   :  { %v3074_v16 = vpop.f32.mrf.mxu3 }
0x3ce0   :  { %v3075_v9 = vadd.f32 %v3074_v16, %v3051_v34 }
0x3ce2   :  { %v3077_v18 = vadd.f32 %v4937_v14, %v3075_v9 }
0x3ce4   :  { %3672 = vtanh.f32 %v3077_v18  ;;  %v3396_v13 = vmul.f32 -1.442695, %v3077_v18 }
0x3ce6   :  { %3674 = vpow2.f32 %v3396_v13 }
0x3cea   :  { %v3673_v63 = vpop.eup %3672 }
0x3ceb   :  { %3100 = vrot.lane.b32.xlu1 %v3673_v63, %s4063_s22 }
0x3cec   :  { %v3675_v59 = vpop.eup %3674 }
0x3ced   :  { %v3081_v43 = vadd.f32 1.0, %v3675_v59 }
0x3cef   :  { %3676 = vrcp.f32 %v3081_v43  ;;  %v3093_v47 = vand.u32 2147483648, %v3081_v43  ;;  %vm3087_vm1 = vweird.f32 %v3081_v43  ;;  %v3091_v54 = vand.u32 2147483647, %v3081_v43 }
0x3cf1   :  { %v3094_v1 = vor.u32 1.1754944e-38, %v3093_v47  ;;  %vm3092_vm3 = vcmp.eq.f32.partialorder %v3091_v54, 8.507059e+37 }
0x3cf5   :  { %v3677_v62 = vpop.eup %3676 }
0x3cf6   :  { %v3083_v12 = vmul.f32 %v3677_v62, %v3081_v43  ;;  %vm3088_vm15 = vweird.f32 %v3677_v62 }
0x3cf7   :  { %vm3089_vm2 = vmor %vm3087_vm1, %vm3088_vm15 }
0x3cf8   :  { %v3084_v46 = vsub.f32 1.0, %v3083_v12 }
0x3cfa   :  { %v3085_v10 = vmul.f32 %v3677_v62, %v3084_v46 }
0x3cfc   :  { %v3086_v41 = vadd.f32 %v3677_v62, %v3085_v10 }
0x3cfe   :  { %v3090_v14 = vsel %vm3089_vm2, %v3677_v62, %v3086_v41 }
0x3cff   :  { %v3095_v3 = vsel %vm3092_vm3, %v3094_v1, %v3090_v14 }
0x3d00   :  { %v3098_v17 = vmul.f32 %v3095_v3, %v4991_v11 }
0x3d5d   :  { %v3101_v15 = vpop.permute.xlu1 %3100 }
0x3d5e   :  { %v3103_v38 = vmul.f32 %v3101_v15, %v3095_v3 }
0x3d60   :  { %3105 = vrot.lane.b32.xlu2 %v3103_v38, %s4063_s22 }
0x3dba   :  { %v3106_v49 = vpop.permute.xlu2 %3105 }
0x3dbb   :  { %v3108_v44 = vadd.f32 %v3106_v49, %v3098_v17 }
0x3dbd   :  { %3678 = vtanh.f32 %v3108_v44 }
0x3dc3   :  { %v3679_v56 = vpop.eup %3678 }
0x3dc4   :  { %3111 = vrot.lane.b32.xlu1 %v3679_v56, %s4063_s22 }
0x3e36   :  { %v3112_v20 = vpop.permute.xlu1 %3111 }
0x3e37   :  { %v3114_v48 = vmul.f32 %v3112_v20, %v3095_v3 }
0x3e39   :  { %3136 = vrot.lane.b32.xlu2 %v3114_v48, %s4065_s29 }
0x3e93   :  { %v3137_v0 = vpop.permute.xlu2 %3136 }
0x3e94   :  { %3398 = vmatmul.msk.f32.vlgmr.msra.gmra.mxu1 %vm288_vm0, %v3137_v0 }
0x3f11   :  { %v3157_v28 = vpop.f32.mrf.mxu1 }
0x3f12   :  { %v3158_v29 = vadd.f32 %v3157_v28, %v3132_v26 }
0x3f14   :  { %v3160_v36 = vadd.f32 %v4957_v30, %v3158_v29 }
0x3f16   :  { %3680 = vtanh.f32 %v3160_v36  ;;  %v3399_v42 = vmul.f32 -1.442695, %v3160_v36 }
0x3f18   :  { %3682 = vpow2.f32 %v3399_v42 }
0x3f1c   :  { %v3681_v11 = vpop.eup %3680 }
0x3f1d   :  { %3183 = vrot.lane.b32.xlu1 %v3681_v11, %s4063_s22 }
0x3f1e   :  { %v3683_v5 = vpop.eup %3682 }
0x3f1f   :  { %v3164_v37 = vadd.f32 1.0, %v3683_v5 }
0x3f21   :  { %3684 = vrcp.f32 %v3164_v37  ;;  %v3176_v50 = vand.u32 2147483648, %v3164_v37  ;;  %vm3170_vm5 = vweird.f32 %v3164_v37  ;;  %v3174_v23 = vand.u32 2147483647, %v3164_v37 }
0x3f23   :  { %v3177_v19 = vor.u32 1.1754944e-38, %v3176_v50  ;;  %vm3175_vm8 = vcmp.eq.f32.partialorder %v3174_v23, 8.507059e+37 }
0x3f27   :  { %v3685_v4 = vpop.eup %3684 }
0x3f28   :  { %v3166_v39 = vmul.f32 %v3685_v4, %v3164_v37  ;;  %vm3171_vm4 = vweird.f32 %v3685_v4 }
0x3f29   :  { %vm3172_vm6 = vmor %vm3170_vm5, %vm3171_vm4 }
0x3f2a   :  { %v3167_v40 = vsub.f32 1.0, %v3166_v39 }
0x3f2c   :  { %v3168_v51 = vmul.f32 %v3685_v4, %v3167_v40 }
0x3f2e   :  { %v3169_v52 = vadd.f32 %v3685_v4, %v3168_v51 }
0x3f30   :  { %v3173_v30 = vsel %vm3172_vm6, %v3685_v4, %v3169_v52 }
0x3f31   :  { %v3178_v35 = vsel %vm3175_vm8, %v3177_v19, %v3173_v30 }
0x3f32   :  { %v3181_v45 = vmul.f32 %v3178_v35, %v5002_v31 }
0x3f8f   :  { %v3184_v57 = vpop.permute.xlu1 %3183 }
0x3f90   :  { %v3186_v21 = vmul.f32 %v3184_v57, %v3178_v35 }
0x3f92   :  { %3188 = vrot.lane.b32.xlu2 %v3186_v21, %s4063_s22 }
0x3f9a   :  { %3236 = vrot.lane.b32.xlu2 %v4976_v27, %s4063_s22 }
0x3fec   :  { %v3189_v2 = vpop.permute.xlu2 %3188 }
0x3fed   :  { %v3191_v22 = vadd.f32 %v3189_v2, %v3181_v45 }
0x3fef   :  { %3686 = vtanh.f32 %v3191_v22 }
0x3ff5   :  { %v3687_v25 = vpop.eup %3686 }
0x3ff6   :  { %3194 = vrot.lane.b32.xlu0 %v3687_v25, %s4063_s22 }
0x3ffe   :  { %3240 = vrot.lane.b32.xlu0 %v5010_v6, %s4065_s29 }
0x4006   :  { %3228 = vrot.lane.b32.xlu0 %v4803_v58, %s4065_s29  ;;  %v3237_v58 = vpop.permute.xlu2 %3236 }
0x4007   :  { %v3252_v8 = vsel %vm288_vm0, %v4918_v32, %v3237_v58 }
0x4068   :  { %v3195_v55 = vpop.permute.xlu0 %3194 }
0x4069   :  { %v3197_v53 = vmul.f32 %v3195_v55, %v3178_v35 }
0x406b   :  { %3199 = vrot.lane.b32.xlu1 %v3197_v53, %s4065_s29 }
0x4070   :  { %v3241_v33 = vpop.permute.xlu0 %3240 }
0x4073   :  { %3224 = vrot.lane.b32.xlu1 %v4748_v61, %s4063_s22  ;;  %v3253_v61 = vsel %vm3248_vm9, %v3252_v8, %v3241_v33  ;;  %s4073_s22 = smov [#allocation22]  }
0x4074   :  { %s3267_s29 = sshll.u32 %s4073_s22, 4  ;;  %s3268_s29 = int_to_ptr.vmem [resolvable:$true] %s3267_s29 }
0x407b   :  { %3232 = vrot.lane.b32.xlu1 %v4858_v60, %s4072_s0 }
0x40dd   :  { %v3200_v27 = vpop.permute.xlu1 %3199 }
0x40de   :  { %3400 = vmatmul.msk.f32.vlgmr.msra.gmra.mxu2 %vm288_vm0, %v3200_v27 }
0x40e5   :  { %v3225_v6 = vpop.permute.xlu1 %3224 }
0x40e6   :  { %v3247_v34 = vsel %vm288_vm0, 0.0, %v3225_v6 }
0x40ed   :  { %v3233_v16 = vpop.permute.xlu1 %3232 }
0x4161   :  { %v3220_v31 = vpop.f32.mrf.mxu2 }
0x4162   :  { %v3221_v7 = vadd.f32 %v4973_v24, %v3220_v31  ;;  %v3229_v24 = vpop.permute.xlu0 %3228 }
0x4163   :  { %v3249_v18 = vsel %vm3248_vm9, %v3247_v34, %v3229_v24 }
0x4164   :  { %3244 = vrot.lane.b32.xlu2 %v3221_v7, %s4072_s0  ;;  %v3251_v13 = vsel %vm3250_vm10, %v3249_v18, %v3233_v16 }
0x41be   :  { %v3245_v60 = vpop.permute.xlu2 %3244 }
0x41bf   :  { %v3254_v9 = vsel %vm3250_vm10, %v3253_v61, %v3245_v60 }
0x41c0   :  { %v3257_v63 = vrot.slane %v3254_v9, 6 }
0x41c2   :  { %v3259_v32 = vsel %vm3258_vm11, %v3251_v13, %v3257_v63 }
0x41c3   :  { %3261 = vst [vmem:[#allocation22] sm:$0xf] %v3259_v32 }
0x41c4   :  { %3272 = dma.vmem_to_hbm [thread:$0]  %s3268_s29, 64, %s3270_s19, [#allocation4]  }
0x41c5   :  { %4045 = dma.done.wait [#allocation4], 64  }
0x41c6   :  { %4046 = vsyncadd [#allocation4], 4294967232 }
0x41c7   :  { %3277 = vsyncpa [#allocation3], 1 }
0x41c8   :  { %3278 = vsyncpa [#allocation8], 1 }
0x41c9   :  { %3279 = vsyncpa [#allocation11], 1 }
0x41ca   :  { %3280 = vsyncpa [#allocation14], 1 }
0x41cb   :  { %3281 = vsyncpa [#allocation17], 1 }
0x41cc   :  { %3282 = vsyncpa [#allocation20], 1 }
0x41cd   :  { %3283 = vsyncpa [#allocation4], 1 }
0x41ce   :  { %3284 = vsyncpa [#allocation5], 1 }

</bundles_post_ra>
